<compile_context>
chip_gen: v5e
topology: v5e:2x2
jax: 0.10.0
libtpu: 0.0.40
codegen_flags: <defaults>
</compile_context>

<pallas_src>
import jax
import jax.numpy as jnp
from jax.experimental import pallas as pl
from jax.experimental.pallas import tpu as pltpu


_TILE_CAP = 1024   # max rows per matmul grid step (amortizes ~0.35us/step)
_LANES = 128       # FC output padded to a full lane width


def _round_up(v, m):
    return (v + m - 1) // m * m


def _pick_tile_m(m, cap=_TILE_CAP):
    """16-aligned row tile; >=2 grid steps when possible, capped at `cap`."""
    m16 = _round_up(m, 16)
    if m16 <= 16:
        return m16
    half = _round_up((m16 + 1) // 2, 16)
    return min(cap, half)


# --------------------------------------------------------------------------
# Pallas kernels
# --------------------------------------------------------------------------

def _conv_bn_relu_pool_kernel(p_ref, w_ref, b_ref, o_ref):
    """Fused im2col matmul + folded-BN bias + ReLU (+ fused 2x2 max-pool).

    p_ref: (NQ, TILE_M, K) bf16 im2col patches; NQ = 4 pool quadrants
                            (or 1 when there is no pool).
    w_ref: (K, Cout)       bf16 conv weight, BN scale folded in.
    b_ref: (1, Cout)       f32 folded conv-bias / BN shift.
    o_ref: (TILE_M, Cout)  bf16 pooled (or plain) activation tile.
    """
    w = w_ref[...]
    acc = jnp.dot(p_ref[0], w, preferred_element_type=jnp.float32)
    for q in range(1, p_ref.shape[0]):          # static unroll, NQ <= 4
        acc = jnp.maximum(
            acc, jnp.dot(p_ref[q], w, preferred_element_type=jnp.float32))
    # max over quadrants commutes with (+bias, ReLU) => exact fused max-pool.
    # Epilogue in f32 (no bf16 VPU on v5e), cast only on store.
    o_ref[...] = jnp.maximum(acc + b_ref[...], 0.0).astype(o_ref.dtype)


def _fc_kernel(x_ref, w_ref, b_ref, o_ref):
    """Final Linear layer tile: (tile_n, K) @ (K, 128) + (1, 128)."""
    o_ref[...] = (jnp.dot(x_ref[...], w_ref[...],
                          preferred_element_type=jnp.float32)
                  + b_ref[...]).astype(o_ref.dtype)


# --------------------------------------------------------------------------
# Wrappers (JAX glue + pallas_call plumbing)
# --------------------------------------------------------------------------

def conv_bn_relu(x_nhwc, w_mat, bias, *, pool):
    """VALID 3x3 conv + folded BN + ReLU, optionally fused 2x2/2 max-pool.

    x_nhwc: (N, H, W, Cin) bf16.  w_mat: (9*Cin, Cout) bf16 (BN-folded).
    bias:   (1, Cout) f32.  Returns bf16 NHWC (pooled dims when pool=True).
    """
    N, H, W, Cin = x_nhwc.shape
    K, Cout = w_mat.shape
    KH = KW = 3
    assert K == KH * KW * Cin
    Ho, Wo = H - KH + 1, W - KW + 1

    if pool:
        # im2col patches per 2x2-pool quadrant: quadrant (di, dj) holds the
        # patches of conv-output positions (2*hp + di, 2*wp + dj).  The
        # kernel maxes over quadrants => pool fused into the matmul epilogue.
        Hp, Wp = Ho // 2, Wo // 2        # floor mode == nn.MaxPool2d(2, 2)
        quads = []
        for di in range(2):
            for dj in range(2):
                taps = []
                for i in range(KH):
                    for j in range(KW):
                        taps.append(
                            x_nhwc[:, di + i:di + i + 2 * Hp:2,
                                   dj + j:dj + j + 2 * Wp:2, :])
                quads.append(
                    jnp.concatenate(taps, axis=-1).reshape(N * Hp * Wp, K))
        patches = jnp.stack(quads, axis=0)                  # (4, M, K) bf16
        out_h, out_w = Hp, Wp
    else:
        taps = []
        for i in range(KH):
            for j in range(KW):
                taps.append(x_nhwc[:, i:i + Ho, j:j + Wo, :])
        patches = jnp.concatenate(taps, axis=-1).reshape(1, N * Ho * Wo, K)
        out_h, out_w = Ho, Wo

    nq, m, _ = patches.shape
    tile_m = _pick_tile_m(m)
    m_pad = _round_up(m, tile_m)
    if m_pad != m:
        patches = jnp.pad(patches, ((0, 0), (0, m_pad - m), (0, 0)))

    out = pl.pallas_call(
        _conv_bn_relu_pool_kernel,
        out_shape=jax.ShapeDtypeStruct((m_pad, Cout), jnp.bfloat16),
        grid=(m_pad // tile_m,),
        in_specs=[
            pl.BlockSpec((nq, tile_m, K), lambda t: (0, t, 0)),
            pl.BlockSpec((K, Cout), lambda t: (0, 0)),
            pl.BlockSpec((1, Cout), lambda t: (0, 0)),
        ],
        out_specs=pl.BlockSpec((tile_m, Cout), lambda t: (t, 0)),
        compiler_params=pltpu.CompilerParams(
            dimension_semantics=("parallel",)),
    )(patches, w_mat, bias)
    return out[:m].reshape(N, out_h, out_w, Cout)


def linear(x, w_t, b):
    """x: (N, K) bf16, w_t: (K, 128) bf16 (pre-permuted + lane-padded),
    b: (1, 128) f32.  Returns (N, 128) f32 (caller slices the real classes)."""
    n, k = x.shape
    m = w_t.shape[1]
    tile_n = min(256, _round_up(n, 16))
    n_pad = _round_up(n, tile_n)
    if n_pad != n:
        x = jnp.pad(x, ((0, n_pad - n), (0, 0)))
    out = pl.pallas_call(
        _fc_kernel,
        out_shape=jax.ShapeDtypeStruct((n_pad, m), jnp.float32),
        grid=(n_pad // tile_n,),
        in_specs=[
            pl.BlockSpec((tile_n, k), lambda t: (t, 0)),
            pl.BlockSpec((k, m), lambda t: (0, 0)),
            pl.BlockSpec((1, m), lambda t: (0, 0)),
        ],
        out_specs=pl.BlockSpec((tile_n, m), lambda t: (t, 0)),
        compiler_params=pltpu.CompilerParams(
            dimension_semantics=("parallel",)),
    )(x, w_t, b)
    return out[:n]


def cnn1_bn_forward(x_nchw, params):
    """Forward pass matching CNN1_BN.forward (NCHW input, (N, 10) output)."""
    x = jnp.transpose(x_nchw, (0, 2, 3, 1)).astype(jnp.bfloat16)  # NCHW->NHWC
    x = conv_bn_relu(x, params["wm1"], params["b1"], pool=True)
    x = conv_bn_relu(x, params["wm2"], params["b2"], pool=True)
    x = conv_bn_relu(x, params["wm3"], params["b3"], pool=False)
    n = x.shape[0]
    # NHWC flatten; params["wf"] rows were pre-permuted at init so this is
    # equivalent to torch's NCHW x.view(N, -1) @ fc.weight.T.
    feats = x.reshape(n, -1)
    nc = params["bf_raw"].shape[0]
    return linear(feats, params["wf"], params["bf"])[:, :nc]


# --------------------------------------------------------------------------
# Deterministic synthetic parameters (shapes from CNN1_BN.__init__)
# --------------------------------------------------------------------------

def init_params(key, channel_num=(32, 64, 128), num_classes=10, eps=1e-5):
    keys = iter(jax.random.split(key, 20))
    params = {}
    cin = 3
    for li, cout in enumerate(channel_num, start=1):
        # HWIO layout (a torch OIHW conv weight maps via transpose(2,3,1,0)).
        w = 0.05 * jax.random.normal(next(keys), (3, 3, cin, cout), jnp.float32)
        conv_b = 0.05 * jax.random.normal(next(keys), (cout,), jnp.float32)
        gamma = 1.0 + 0.1 * jax.random.normal(next(keys), (cout,), jnp.float32)
        beta = 0.1 * jax.random.normal(next(keys), (cout,), jnp.float32)
        rmean = 0.1 * jax.random.normal(next(keys), (cout,), jnp.float32)
        rvar = jax.random.uniform(next(keys), (cout,), jnp.float32, 0.5, 1.5)
        scale = gamma / jnp.sqrt(rvar + eps)
        bias = (conv_b - rmean) * scale + beta   # fold conv bias + BN shift
        # f32 copies for the XLA reference check.
        params[f"w{li}"] = w
        params[f"s{li}"] = scale
        params[f"bv{li}"] = bias
        # Kernel-ready: BN-scale folded into the weight, reshaped, bf16.
        params[f"wm{li}"] = (w * scale).reshape(9 * cin, cout).astype(
            jnp.bfloat16)
        params[f"b{li}"] = bias.reshape(1, cout)          # f32 epilogue bias
        cin = cout

    c_last = channel_num[-1]
    feat = c_last * 4 * 4                        # 128 * 4 * 4 = 2048
    nc_pad = _round_up(num_classes, _LANES)
    # (in_features, num_classes), rows in torch's NCHW flatten order.
    wf_chw = 0.02 * jax.random.normal(next(keys), (feat, num_classes),
                                      jnp.float32)
    bf_raw = 0.02 * jax.random.normal(next(keys), (num_classes,), jnp.float32)
    params["wf_chw"] = wf_chw                    # kept for the reference check
    params["bf_raw"] = bf_raw
    # One-time permutation of FC rows from torch order (c*16 + h*4 + w) to
    # the kernel's NHWC flatten order ((h*4 + w)*C + c), then zero-pad the
    # output columns to 128 lanes for an unmasked store.
    wf_nhwc = (wf_chw.reshape(c_last, 16, num_classes)
               .transpose(1, 0, 2).reshape(feat, num_classes))
    params["wf"] = jnp.pad(
        wf_nhwc, ((0, 0), (0, nc_pad - num_classes))).astype(jnp.bfloat16)
    params["bf"] = jnp.pad(bf_raw, (0, nc_pad - num_classes)).reshape(1, nc_pad)
    return params


# --------------------------------------------------------------------------
# Pure-XLA f32 reference (torch semantics, eval-mode BN) for a numeric check
# --------------------------------------------------------------------------

def cnn1_bn_reference(x_nchw, params):
    x = jnp.transpose(x_nchw, (0, 2, 3, 1))
    for li in (1, 2, 3):
        y = jax.lax.conv_general_dilated(
            x, params[f"w{li}"], window_strides=(1, 1), padding="VALID",
            dimension_numbers=("NHWC", "HWIO", "NHWC"))
        y = jnp.maximum(y * params[f"s{li}"] + params[f"bv{li}"], 0.0)
        if li < 3:
            y = jax.lax.reduce_window(y, -jnp.inf, jax.lax.max,
                                      (1, 2, 2, 1), (1, 2, 2, 1), "VALID")
        x = y
    n = x.shape[0]
    feats = jnp.transpose(x, (0, 3, 1, 2)).reshape(n, -1)   # torch view(N, -1)
    return feats @ params["wf_chw"] + params["bf_raw"]


# --------------------------------------------------------------------------

if __name__ == "__main__":
    import numpy as np

    root = jax.random.PRNGKey(0)
    pkey, xkey = jax.random.split(root)
    params = init_params(pkey)

    # Spatial size must be 32 so conv3 output is 4x4 (fc expects 128*4*4).
    x = jax.random.normal(xkey, (2, 3, 32, 32), jnp.float32)   # NCHW

    fwd = jax.jit(cnn1_bn_forward)
    out = fwd(x, params)
    jax.block_until_ready(out)
    assert out.shape == (2, 10) and out.dtype == jnp.float32

    ref = cnn1_bn_reference(x, params)
    # bf16 MXU operands / bf16 inter-layer activations vs f32 reference.
    np.testing.assert_allclose(np.asarray(out), np.asarray(ref),
                               rtol=5e-2, atol=2e-2)
    print("KERNEL_OK")
</pallas_src>

<mosaic_0001>
module attributes {stable_mosaic.version = 11 : i64} {
  func.func @_conv_bn_relu_pool_kernel(%arg0: i32, %arg1: memref<4x240x27xbf16, #tpu.memory_space<vmem>>, %arg2: memref<27x32xbf16, #tpu.memory_space<vmem>>, %arg3: memref<1x32xf32, #tpu.memory_space<vmem>>, %arg4: memref<240x32xbf16, #tpu.memory_space<vmem>>) attributes {dimension_semantics = [#tpu.dimension_semantics<parallel>], iteration_bounds = array<i64: 2>, scalar_prefetch = 0 : i64, scratch_operands = 0 : i64, tpu.core_type = #tpu.core_type<tc>, window_params = [{transform_indices = @transform_0, window_bounds = array<i64: 4, 240, 27>}, {pipeline_mode = #tpu.pipeline_mode<synchronous>, transform_indices = @transform_1, window_bounds = array<i64: 27, 32>}, {pipeline_mode = #tpu.pipeline_mode<synchronous>, transform_indices = @transform_2, window_bounds = array<i64: 1, 32>}, {transform_indices = @transform_3, window_bounds = array<i64: 240, 32>}]} {
    %c0 = arith.constant 0 : index
    %c0_0 = arith.constant 0 : index
    %0 = vector.load %arg2[%c0, %c0_0] : memref<27x32xbf16, #tpu.memory_space<vmem>>, vector<27x32xbf16>
    %c0_1 = arith.constant 0 : index
    %c0_2 = arith.constant 0 : index
    %c0_3 = arith.constant 0 : index
    %1 = vector.load %arg1[%c0_1, %c0_2, %c0_3] : memref<4x240x27xbf16, #tpu.memory_space<vmem>>, vector<1x240x27xbf16>
    %2 = vector.shape_cast %1 : vector<1x240x27xbf16> to vector<240x27xbf16>
    %cst = arith.constant dense<0.000000e+00> : vector<240x32xf32>
    %3 = tpu.matmul %2, %0, %cst {dimension_numbers = #tpu.dot_dimension_numbers<[1], [0], [0], [1], [0, 0, 1, 1], [], []>} : vector<240x27xbf16>, vector<27x32xbf16>, vector<240x32xf32> -> vector<240x32xf32>
    %c1 = arith.constant 1 : index
    %c0_4 = arith.constant 0 : index
    %c0_5 = arith.constant 0 : index
    %4 = vector.load %arg1[%c1, %c0_4, %c0_5] : memref<4x240x27xbf16, #tpu.memory_space<vmem>>, vector<1x240x27xbf16>
    %5 = vector.shape_cast %4 : vector<1x240x27xbf16> to vector<240x27xbf16>
    %cst_6 = arith.constant dense<0.000000e+00> : vector<240x32xf32>
    %6 = tpu.matmul %5, %0, %cst_6 {dimension_numbers = #tpu.dot_dimension_numbers<[1], [0], [0], [1], [0, 0, 1, 1], [], []>} : vector<240x27xbf16>, vector<27x32xbf16>, vector<240x32xf32> -> vector<240x32xf32>
    %7 = arith.maximumf %3, %6 : vector<240x32xf32>
    %c2 = arith.constant 2 : index
    %c0_7 = arith.constant 0 : index
    %c0_8 = arith.constant 0 : index
    %8 = vector.load %arg1[%c2, %c0_7, %c0_8] : memref<4x240x27xbf16, #tpu.memory_space<vmem>>, vector<1x240x27xbf16>
    %9 = vector.shape_cast %8 : vector<1x240x27xbf16> to vector<240x27xbf16>
    %cst_9 = arith.constant dense<0.000000e+00> : vector<240x32xf32>
    %10 = tpu.matmul %9, %0, %cst_9 {dimension_numbers = #tpu.dot_dimension_numbers<[1], [0], [0], [1], [0, 0, 1, 1], [], []>} : vector<240x27xbf16>, vector<27x32xbf16>, vector<240x32xf32> -> vector<240x32xf32>
    %11 = arith.maximumf %7, %10 : vector<240x32xf32>
    %c3 = arith.constant 3 : index
    %c0_10 = arith.constant 0 : index
    %c0_11 = arith.constant 0 : index
    %12 = vector.load %arg1[%c3, %c0_10, %c0_11] : memref<4x240x27xbf16, #tpu.memory_space<vmem>>, vector<1x240x27xbf16>
    %13 = vector.shape_cast %12 : vector<1x240x27xbf16> to vector<240x27xbf16>
    %cst_12 = arith.constant dense<0.000000e+00> : vector<240x32xf32>
    %14 = tpu.matmul %13, %0, %cst_12 {dimension_numbers = #tpu.dot_dimension_numbers<[1], [0], [0], [1], [0, 0, 1, 1], [], []>} : vector<240x27xbf16>, vector<27x32xbf16>, vector<240x32xf32> -> vector<240x32xf32>
    %15 = arith.maximumf %11, %14 : vector<240x32xf32>
    %c0_13 = arith.constant 0 : index
    %c0_14 = arith.constant 0 : index
    %16 = vector.load %arg3[%c0_13, %c0_14] : memref<1x32xf32, #tpu.memory_space<vmem>>, vector<1x32xf32>
    %17 = vector.broadcast %16 : vector<1x32xf32> to vector<240x32xf32>
    %18 = arith.addf %15, %17 : vector<240x32xf32>
    %cst_15 = arith.constant 0.000000e+00 : f32
    %19 = vector.broadcast %cst_15 : f32 to vector<240x32xf32>
    %20 = arith.maximumf %18, %19 : vector<240x32xf32>
    %21 = arith.truncf %20 : vector<240x32xf32> to vector<240x32xbf16>
    %c0_16 = arith.constant 0 : index
    %c0_17 = arith.constant 0 : index
    %22 = vector.load %arg4[%c0_16, %c0_17] : memref<240x32xbf16, #tpu.memory_space<vmem>>, vector<240x32xbf16>
    tpu.vector_store %arg4[%c0_16, %c0_17], %21 {strides = array<i32>} : memref<240x32xbf16, #tpu.memory_space<vmem>>, vector<240x32xbf16>,
    return
  }
  func.func @transform_0(%arg0: i32) -> (i32, i32, i32) {
    %c0_i32 = arith.constant 0 : i32
    %c0_i32_0 = arith.constant 0 : i32
    %c0_i32_1 = arith.constant 0 : i32
    return %c0_i32, %arg0, %c0_i32_0 : i32, i32, i32
  }
  func.func @transform_1(%arg0: i32) -> (i32, i32) {
    %c0_i32 = arith.constant 0 : i32
    %c0_i32_0 = arith.constant 0 : i32
    %c0_i32_1 = arith.constant 0 : i32
    return %c0_i32, %c0_i32_0 : i32, i32
  }
  func.func @transform_2(%arg0: i32) -> (i32, i32) {
    %c0_i32 = arith.constant 0 : i32
    %c0_i32_0 = arith.constant 0 : i32
    %c0_i32_1 = arith.constant 0 : i32
    return %c0_i32, %c0_i32_0 : i32, i32
  }
  func.func @transform_3(%arg0: i32) -> (i32, i32) {
    %c0_i32 = arith.constant 0 : i32
    %c0_i32_0 = arith.constant 0 : i32
    return %arg0, %c0_i32 : i32, i32
  }
}

module attributes {stable_mosaic.version = 11 : i64} {
  func.func @_conv_bn_relu_pool_kernel(%arg0: i32, %arg1: memref<4x48x288xbf16, #tpu.memory_space<vmem>>, %arg2: memref<288x64xbf16, #tpu.memory_space<vmem>>, %arg3: memref<1x64xf32, #tpu.memory_space<vmem>>, %arg4: memref<48x64xbf16, #tpu.memory_space<vmem>>) attributes {dimension_semantics = [#tpu.dimension_semantics<parallel>], iteration_bounds = array<i64: 2>, scalar_prefetch = 0 : i64, scratch_operands = 0 : i64, tpu.core_type = #tpu.core_type<tc>, window_params = [{transform_indices = @transform_0, window_bounds = array<i64: 4, 48, 288>}, {pipeline_mode = #tpu.pipeline_mode<synchronous>, transform_indices = @transform_1, window_bounds = array<i64: 288, 64>}, {pipeline_mode = #tpu.pipeline_mode<synchronous>, transform_indices = @transform_2, window_bounds = array<i64: 1, 64>}, {transform_indices = @transform_3, window_bounds = array<i64: 48, 64>}]} {
    %c0 = arith.constant 0 : index
    %c0_0 = arith.constant 0 : index
    %0 = vector.load %arg2[%c0, %c0_0] : memref<288x64xbf16, #tpu.memory_space<vmem>>, vector<288x64xbf16>
    %c0_1 = arith.constant 0 : index
    %c0_2 = arith.constant 0 : index
    %c0_3 = arith.constant 0 : index
    %1 = vector.load %arg1[%c0_1, %c0_2, %c0_3] : memref<4x48x288xbf16, #tpu.memory_space<vmem>>, vector<1x48x288xbf16>
    %2 = vector.shape_cast %1 : vector<1x48x288xbf16> to vector<48x288xbf16>
    %cst = arith.constant dense<0.000000e+00> : vector<48x64xf32>
    %3 = tpu.matmul %2, %0, %cst {dimension_numbers = #tpu.dot_dimension_numbers<[1], [0], [0], [1], [0, 0, 1, 1], [], []>} : vector<48x288xbf16>, vector<288x64xbf16>, vector<48x64xf32> -> vector<48x64xf32>
    %c1 = arith.constant 1 : index
    %c0_4 = arith.constant 0 : index
    %c0_5 = arith.constant 0 : index
    %4 = vector.load %arg1[%c1, %c0_4, %c0_5] : memref<4x48x288xbf16, #tpu.memory_space<vmem>>, vector<1x48x288xbf16>
    %5 = vector.shape_cast %4 : vector<1x48x288xbf16> to vector<48x288xbf16>
    %cst_6 = arith.constant dense<0.000000e+00> : vector<48x64xf32>
    %6 = tpu.matmul %5, %0, %cst_6 {dimension_numbers = #tpu.dot_dimension_numbers<[1], [0], [0], [1], [0, 0, 1, 1], [], []>} : vector<48x288xbf16>, vector<288x64xbf16>, vector<48x64xf32> -> vector<48x64xf32>
    %7 = arith.maximumf %3, %6 : vector<48x64xf32>
    %c2 = arith.constant 2 : index
    %c0_7 = arith.constant 0 : index
    %c0_8 = arith.constant 0 : index
    %8 = vector.load %arg1[%c2, %c0_7, %c0_8] : memref<4x48x288xbf16, #tpu.memory_space<vmem>>, vector<1x48x288xbf16>
    %9 = vector.shape_cast %8 : vector<1x48x288xbf16> to vector<48x288xbf16>
    %cst_9 = arith.constant dense<0.000000e+00> : vector<48x64xf32>
    %10 = tpu.matmul %9, %0, %cst_9 {dimension_numbers = #tpu.dot_dimension_numbers<[1], [0], [0], [1], [0, 0, 1, 1], [], []>} : vector<48x288xbf16>, vector<288x64xbf16>, vector<48x64xf32> -> vector<48x64xf32>
    %11 = arith.maximumf %7, %10 : vector<48x64xf32>
    %c3 = arith.constant 3 : index
    %c0_10 = arith.constant 0 : index
    %c0_11 = arith.constant 0 : index
    %12 = vector.load %arg1[%c3, %c0_10, %c0_11] : memref<4x48x288xbf16, #tpu.memory_space<vmem>>, vector<1x48x288xbf16>
    %13 = vector.shape_cast %12 : vector<1x48x288xbf16> to vector<48x288xbf16>
    %cst_12 = arith.constant dense<0.000000e+00> : vector<48x64xf32>
    %14 = tpu.matmul %13, %0, %cst_12 {dimension_numbers = #tpu.dot_dimension_numbers<[1], [0], [0], [1], [0, 0, 1, 1], [], []>} : vector<48x288xbf16>, vector<288x64xbf16>, vector<48x64xf32> -> vector<48x64xf32>
    %15 = arith.maximumf %11, %14 : vector<48x64xf32>
    %c0_13 = arith.constant 0 : index
    %c0_14 = arith.constant 0 : index
    %16 = vector.load %arg3[%c0_13, %c0_14] : memref<1x64xf32, #tpu.memory_space<vmem>>, vector<1x64xf32>
    %17 = vector.broadcast %16 : vector<1x64xf32> to vector<48x64xf32>
    %18 = arith.addf %15, %17 : vector<48x64xf32>
    %cst_15 = arith.constant 0.000000e+00 : f32
    %19 = vector.broadcast %cst_15 : f32 to vector<48x64xf32>
    %20 = arith.maximumf %18, %19 : vector<48x64xf32>
    %21 = arith.truncf %20 : vector<48x64xf32> to vector<48x64xbf16>
    %c0_16 = arith.constant 0 : index
    %c0_17 = arith.constant 0 : index
    %22 = vector.load %arg4[%c0_16, %c0_17] : memref<48x64xbf16, #tpu.memory_space<vmem>>, vector<48x64xbf16>
    tpu.vector_store %arg4[%c0_16, %c0_17], %21 {strides = array<i32>} : memref<48x64xbf16, #tpu.memory_space<vmem>>, vector<48x64xbf16>,
    return
  }
  func.func @transform_0(%arg0: i32) -> (i32, i32, i32) {
    %c0_i32 = arith.constant 0 : i32
    %c0_i32_0 = arith.constant 0 : i32
    %c0_i32_1 = arith.constant 0 : i32
    return %c0_i32, %arg0, %c0_i32_0 : i32, i32, i32
  }
  func.func @transform_1(%arg0: i32) -> (i32, i32) {
    %c0_i32 = arith.constant 0 : i32
    %c0_i32_0 = arith.constant 0 : i32
    %c0_i32_1 = arith.constant 0 : i32
    return %c0_i32, %c0_i32_0 : i32, i32
  }
  func.func @transform_2(%arg0: i32) -> (i32, i32) {
    %c0_i32 = arith.constant 0 : i32
    %c0_i32_0 = arith.constant 0 : i32
    %c0_i32_1 = arith.constant 0 : i32
    return %c0_i32, %c0_i32_0 : i32, i32
  }
  func.func @transform_3(%arg0: i32) -> (i32, i32) {
    %c0_i32 = arith.constant 0 : i32
    %c0_i32_0 = arith.constant 0 : i32
    return %arg0, %c0_i32 : i32, i32
  }
}

module attributes {stable_mosaic.version = 11 : i64} {
  func.func @_conv_bn_relu_pool_kernel(%arg0: i32, %arg1: memref<1x16x576xbf16, #tpu.memory_space<vmem>>, %arg2: memref<576x128xbf16, #tpu.memory_space<vmem>>, %arg3: memref<1x128xf32, #tpu.memory_space<vmem>>, %arg4: memref<16x128xbf16, #tpu.memory_space<vmem>>) attributes {dimension_semantics = [#tpu.dimension_semantics<parallel>], iteration_bounds = array<i64: 2>, scalar_prefetch = 0 : i64, scratch_operands = 0 : i64, tpu.core_type = #tpu.core_type<tc>, window_params = [{transform_indices = @transform_0, window_bounds = array<i64: 1, 16, 576>}, {pipeline_mode = #tpu.pipeline_mode<synchronous>, transform_indices = @transform_1, window_bounds = array<i64: 576, 128>}, {pipeline_mode = #tpu.pipeline_mode<synchronous>, transform_indices = @transform_2, window_bounds = array<i64: 1, 128>}, {transform_indices = @transform_3, window_bounds = array<i64: 16, 128>}]} {
    %c0 = arith.constant 0 : index
    %c0_0 = arith.constant 0 : index
    %0 = vector.load %arg2[%c0, %c0_0] : memref<576x128xbf16, #tpu.memory_space<vmem>>, vector<576x128xbf16>
    %c0_1 = arith.constant 0 : index
    %c0_2 = arith.constant 0 : index
    %c0_3 = arith.constant 0 : index
    %1 = vector.load %arg1[%c0_1, %c0_2, %c0_3] : memref<1x16x576xbf16, #tpu.memory_space<vmem>>, vector<1x16x576xbf16>
    %2 = vector.shape_cast %1 : vector<1x16x576xbf16> to vector<16x576xbf16>
    %cst = arith.constant dense<0.000000e+00> : vector<16x128xf32>
    %3 = tpu.matmul %2, %0, %cst {dimension_numbers = #tpu.dot_dimension_numbers<[1], [0], [0], [1], [0, 0, 1, 1], [], []>} : vector<16x576xbf16>, vector<576x128xbf16>, vector<16x128xf32> -> vector<16x128xf32>
    %c0_4 = arith.constant 0 : index
    %c0_5 = arith.constant 0 : index
    %4 = vector.load %arg3[%c0_4, %c0_5] : memref<1x128xf32, #tpu.memory_space<vmem>>, vector<1x128xf32>
    %5 = vector.broadcast %4 : vector<1x128xf32> to vector<16x128xf32>
    %6 = arith.addf %3, %5 : vector<16x128xf32>
    %cst_6 = arith.constant 0.000000e+00 : f32
    %7 = vector.broadcast %cst_6 : f32 to vector<16x128xf32>
    %8 = arith.maximumf %6, %7 : vector<16x128xf32>
    %9 = arith.truncf %8 : vector<16x128xf32> to vector<16x128xbf16>
    %c0_7 = arith.constant 0 : index
    %c0_8 = arith.constant 0 : index
    %10 = vector.load %arg4[%c0_7, %c0_8] : memref<16x128xbf16, #tpu.memory_space<vmem>>, vector<16x128xbf16>
    tpu.vector_store %arg4[%c0_7, %c0_8], %9 {strides = array<i32>} : memref<16x128xbf16, #tpu.memory_space<vmem>>, vector<16x128xbf16>,
    return
  }
  func.func @transform_0(%arg0: i32) -> (i32, i32, i32) {
    %c0_i32 = arith.constant 0 : i32
    %c0_i32_0 = arith.constant 0 : i32
    %c0_i32_1 = arith.constant 0 : i32
    return %c0_i32, %arg0, %c0_i32_0 : i32, i32, i32
  }
  func.func @transform_1(%arg0: i32) -> (i32, i32) {
    %c0_i32 = arith.constant 0 : i32
    %c0_i32_0 = arith.constant 0 : i32
    %c0_i32_1 = arith.constant 0 : i32
    return %c0_i32, %c0_i32_0 : i32, i32
  }
  func.func @transform_2(%arg0: i32) -> (i32, i32) {
    %c0_i32 = arith.constant 0 : i32
    %c0_i32_0 = arith.constant 0 : i32
    %c0_i32_1 = arith.constant 0 : i32
    return %c0_i32, %c0_i32_0 : i32, i32
  }
  func.func @transform_3(%arg0: i32) -> (i32, i32) {
    %c0_i32 = arith.constant 0 : i32
    %c0_i32_0 = arith.constant 0 : i32
    return %arg0, %c0_i32 : i32, i32
  }
}

module attributes {stable_mosaic.version = 11 : i64} {
  func.func @_fc_kernel(%arg0: i32, %arg1: memref<16x2048xbf16, #tpu.memory_space<vmem>>, %arg2: memref<2048x128xbf16, #tpu.memory_space<vmem>>, %arg3: memref<1x128xf32, #tpu.memory_space<vmem>>, %arg4: memref<16x128xf32, #tpu.memory_space<vmem>>) attributes {dimension_semantics = [#tpu.dimension_semantics<parallel>], iteration_bounds = array<i64: 1>, scalar_prefetch = 0 : i64, scratch_operands = 0 : i64, tpu.core_type = #tpu.core_type<tc>, window_params = [{transform_indices = @transform_0, window_bounds = array<i64: 16, 2048>}, {pipeline_mode = #tpu.pipeline_mode<synchronous>, transform_indices = @transform_1, window_bounds = array<i64: 2048, 128>}, {pipeline_mode = #tpu.pipeline_mode<synchronous>, transform_indices = @transform_2, window_bounds = array<i64: 1, 128>}, {transform_indices = @transform_3, window_bounds = array<i64: 16, 128>}]} {
    %c0 = arith.constant 0 : index
    %c0_0 = arith.constant 0 : index
    %0 = vector.load %arg1[%c0, %c0_0] : memref<16x2048xbf16, #tpu.memory_space<vmem>>, vector<16x2048xbf16>
    %c0_1 = arith.constant 0 : index
    %c0_2 = arith.constant 0 : index
    %1 = vector.load %arg2[%c0_1, %c0_2] : memref<2048x128xbf16, #tpu.memory_space<vmem>>, vector<2048x128xbf16>
    %cst = arith.constant dense<0.000000e+00> : vector<16x128xf32>
    %2 = tpu.matmul %0, %1, %cst {dimension_numbers = #tpu.dot_dimension_numbers<[1], [0], [0], [1], [0, 0, 1, 1], [], []>} : vector<16x2048xbf16>, vector<2048x128xbf16>, vector<16x128xf32> -> vector<16x128xf32>
    %c0_3 = arith.constant 0 : index
    %c0_4 = arith.constant 0 : index
    %3 = vector.load %arg3[%c0_3, %c0_4] : memref<1x128xf32, #tpu.memory_space<vmem>>, vector<1x128xf32>
    %4 = vector.broadcast %3 : vector<1x128xf32> to vector<16x128xf32>
    %5 = arith.addf %2, %4 : vector<16x128xf32>
    %c0_5 = arith.constant 0 : index
    %c0_6 = arith.constant 0 : index
    %6 = vector.load %arg4[%c0_5, %c0_6] : memref<16x128xf32, #tpu.memory_space<vmem>>, vector<16x128xf32>
    tpu.vector_store %arg4[%c0_5, %c0_6], %5 {strides = array<i32>} : memref<16x128xf32, #tpu.memory_space<vmem>>, vector<16x128xf32>,
    return
  }
  func.func @transform_0(%arg0: i32) -> (i32, i32) {
    %c0_i32 = arith.constant 0 : i32
    %c0_i32_0 = arith.constant 0 : i32
    return %arg0, %c0_i32 : i32, i32
  }
  func.func @transform_1(%arg0: i32) -> (i32, i32) {
    %c0_i32 = arith.constant 0 : i32
    %c0_i32_0 = arith.constant 0 : i32
    %c0_i32_1 = arith.constant 0 : i32
    return %c0_i32, %c0_i32_0 : i32, i32
  }
  func.func @transform_2(%arg0: i32) -> (i32, i32) {
    %c0_i32 = arith.constant 0 : i32
    %c0_i32_0 = arith.constant 0 : i32
    %c0_i32_1 = arith.constant 0 : i32
    return %c0_i32, %c0_i32_0 : i32, i32
  }
  func.func @transform_3(%arg0: i32) -> (i32, i32) {
    %c0_i32 = arith.constant 0 : i32
    %c0_i32_0 = arith.constant 0 : i32
    return %arg0, %c0_i32 : i32, i32
  }
}

</mosaic_0001>

<bundles_post_ra>
// kernel: cnn1_bn_forward.4
= control target key start
LH: loop header
LB: loop body
LE: loop exit
PB: predicated region body
PF: predicated region fallthrough
CT: control target
= control target key end

     0   :  { %s2476_s12 = smov 0   ;;  %s2478_s13 = smov 0   ;;  %s2880_s0 = inlined_call_operand.vmem [shape: bf16[4,480,27], index: 0, kind: input, shape index: {}]   ;;  %s2881_s1 = inlined_call_operand.vmem [shape: bf16[27,32], index: 1, kind: input, shape index: {}]   ;;  %s2882_s2 = inlined_call_operand.vmem [shape: f32[1,32], index: 2, kind: input, shape index: {}]   ;;  %s2883_s3 = inlined_call_operand.vmem [shape: bf16[480,32], index: 3, kind: output, shape index: {}]  }
   0x1   :  { %s2480_s14 = smov 0  }
   0x2 LB: > { %s1933_s15 = sadd.s32 4294967295, %s2453_s14   ;;  %s2493_s16 = sadd.s32 1, %s2453_s14   ;;  %s2453_s14 = sphi %s2480_s14, %s2886_s14   ;;  %s2449_s13 = sphi %s2478_s13, %s2885_s13   ;;  %s2445_s12 = sphi %s2476_s12, %s2884_s12  }
   0x3   : > { %s17_s17 = ssub.s32 %s2453_s14, %s2493_s16  ;;  %s20_s18 = sadd.s32 1, %s2449_s13 }
   0x4   : > { %p18_p0 = scmp.eq.s32.totalorder %s17_s17, 0  ;;  %p27_p1 = scmp.ne.s32.totalorder %s2449_s13, %s2445_s12 }
   0x5   : > { %p28_p2 = scmp.eq.s32.totalorder %s2453_s14, 0  ;;  %p1936_p4 = scmp.ge.s32.totalorder %s2453_s14, 2 }
   0x6   : > { %s2502_s19 = scalar_select %p18_p0, %s2449_s13, %s20_s18  }
   0x7   : > { %p29_p3 = por %p28_p2, %p27_p1  ;;  %127 = sbr.rel (%p1936_p4) target bundleno = 77 (0x4d), region = 24 }
   0xc   : > { %130 = sbr.rel (!%p29_p3) target bundleno = 77 (0x4d), region = 28  ;;  %s132_s20 = sand.u32 (%p29_p3), 1, %s2449_s13  }
   0xd   : > { %s2340_s21 = smul.u32 (%p29_p3), 120, %s2453_s14 }
   0xe   : > { %s2403_s22 = smul.u32 (%p29_p3), 480, %s132_s20 }
   0xf   : > { %s2510_s25 = scalar_lea.vmem (%p29_p3), %s2880_s0, %s2340_s21 }
  0x10   : > { %v154_v0 = vld [vmem:[%s2510_s25] sm:$0xff] (%p29_p3)   ;;  %v158_v1 = vld [vmem:[%s2510_s25 + $0x8] sm:$0xff] (%p29_p3)   ;;  %v162_v2 = vld [vmem:[%s2510_s25 + $0x10] sm:$0xff] (%p29_p3)   ;;  %s2515_s26 = scalar_lea.vmem (%p29_p3), [#allocation2], %s2403_s22 }
  0x11   : > { %155 = vst [vmem:[%s2515_s26] sm:$0xff] %v154_v0   ;;  %v166_v3 = vld [vmem:[%s2510_s25 + $0x18] sm:$0xff]   ;;  %v170_v4 = vld [vmem:[%s2510_s25 + $0x20] sm:$0xff]   ;;  %v174_v5 = vld [vmem:[%s2510_s25 + $0x28] sm:$0xff]  }
  0x12   : > { %159 = vst [vmem:[%s2515_s26 + $0x8] sm:$0xff] %v158_v1   ;;  %v178_v6 = vld [vmem:[%s2510_s25 + $0x30] sm:$0xff]   ;;  %v182_v7 = vld [vmem:[%s2510_s25 + $0x38] sm:$0xff]   ;;  %v186_v8 = vld [vmem:[%s2510_s25 + $0x40] sm:$0xff]  }
  0x13   : > { %163 = vst [vmem:[%s2515_s26 + $0x10] sm:$0xff] %v162_v2   ;;  %v190_v9 = vld [vmem:[%s2510_s25 + $0x48] sm:$0xff]   ;;  %v194_v10 = vld [vmem:[%s2510_s25 + $0x50] sm:$0xff]   ;;  %v198_v11 = vld [vmem:[%s2510_s25 + $0x58] sm:$0xff]  }
  0x14   : > { %167 = vst [vmem:[%s2515_s26 + $0x18] sm:$0xff] %v166_v3   ;;  %v202_v12 = vld [vmem:[%s2510_s25 + $0x60] sm:$0xff]   ;;  %v206_v13 = vld [vmem:[%s2510_s25 + $0x68] sm:$0xff]   ;;  %v210_v14 = vld [vmem:[%s2510_s25 + $0x70] sm:$0xff]  }
  0x15   : > { %171 = vst [vmem:[%s2515_s26 + $0x20] sm:$0xff] %v170_v4   ;;  %v214_v15 = vld [vmem:[%s2510_s25 + $0xf0] sm:$0xff]   ;;  %v218_v16 = vld [vmem:[%s2510_s25 + $0xf8] sm:$0xff]   ;;  %v222_v17 = vld [vmem:[%s2510_s25 + $0x100] sm:$0xff]  }
  0x16   : > { %175 = vst [vmem:[%s2515_s26 + $0x28] sm:$0xff] %v174_v5   ;;  %v226_v18 = vld [vmem:[%s2510_s25 + $0x108] sm:$0xff]   ;;  %v230_v19 = vld [vmem:[%s2510_s25 + $0x110] sm:$0xff]   ;;  %v234_v20 = vld [vmem:[%s2510_s25 + $0x118] sm:$0xff]  }
  0x17   : > { %179 = vst [vmem:[%s2515_s26 + $0x30] sm:$0xff] %v178_v6   ;;  %v238_v21 = vld [vmem:[%s2510_s25 + $0x120] sm:$0xff]   ;;  %v242_v22 = vld [vmem:[%s2510_s25 + $0x128] sm:$0xff]   ;;  %v246_v23 = vld [vmem:[%s2510_s25 + $0x130] sm:$0xff]  }
  0x18   : > { %183 = vst [vmem:[%s2515_s26 + $0x38] sm:$0xff] %v182_v7   ;;  %v250_v24 = vld [vmem:[%s2510_s25 + $0x138] sm:$0xff]   ;;  %v254_v25 = vld [vmem:[%s2510_s25 + $0x140] sm:$0xff]   ;;  %v258_v26 = vld [vmem:[%s2510_s25 + $0x148] sm:$0xff]  }
  0x19   : > { %187 = vst [vmem:[%s2515_s26 + $0x40] sm:$0xff] %v186_v8   ;;  %v262_v27 = vld [vmem:[%s2510_s25 + $0x150] sm:$0xff]   ;;  %v266_v28 = vld [vmem:[%s2510_s25 + $0x158] sm:$0xff]   ;;  %v270_v29 = vld [vmem:[%s2510_s25 + $0x160] sm:$0xff]  }
  0x1a   : > { %191 = vst [vmem:[%s2515_s26 + $0x48] sm:$0xff] %v190_v9   ;;  %v274_v30 = vld [vmem:[%s2510_s25 + $0x1e0] sm:$0xff]   ;;  %v278_v31 = vld [vmem:[%s2510_s25 + $0x1e8] sm:$0xff]   ;;  %v282_v32 = vld [vmem:[%s2510_s25 + $0x1f0] sm:$0xff]  }
  0x1b   : > { %195 = vst [vmem:[%s2515_s26 + $0x50] sm:$0xff] %v194_v10   ;;  %v286_v33 = vld [vmem:[%s2510_s25 + $0x1f8] sm:$0xff]   ;;  %v290_v34 = vld [vmem:[%s2510_s25 + $0x200] sm:$0xff]   ;;  %v294_v35 = vld [vmem:[%s2510_s25 + $0x208] sm:$0xff]  }
  0x1c   : > { %199 = vst [vmem:[%s2515_s26 + $0x58] sm:$0xff] %v198_v11   ;;  %v298_v36 = vld [vmem:[%s2510_s25 + $0x210] sm:$0xff]   ;;  %v302_v37 = vld [vmem:[%s2510_s25 + $0x218] sm:$0xff]   ;;  %v306_v38 = vld [vmem:[%s2510_s25 + $0x220] sm:$0xff]  }
  0x1d   : > { %203 = vst [vmem:[%s2515_s26 + $0x60] sm:$0xff] %v202_v12   ;;  %v310_v39 = vld [vmem:[%s2510_s25 + $0x228] sm:$0xff]   ;;  %v314_v40 = vld [vmem:[%s2510_s25 + $0x230] sm:$0xff]   ;;  %v318_v41 = vld [vmem:[%s2510_s25 + $0x238] sm:$0xff]  }
  0x1e   : > { %207 = vst [vmem:[%s2515_s26 + $0x68] sm:$0xff] %v206_v13   ;;  %v322_v42 = vld [vmem:[%s2510_s25 + $0x240] sm:$0xff]   ;;  %v326_v43 = vld [vmem:[%s2510_s25 + $0x248] sm:$0xff]   ;;  %v330_v44 = vld [vmem:[%s2510_s25 + $0x250] sm:$0xff]  }
  0x1f   : > { %211 = vst [vmem:[%s2515_s26 + $0x70] sm:$0xff] %v210_v14   ;;  %v334_v45 = vld [vmem:[%s2510_s25 + $0x2d0] sm:$0xff]   ;;  %v338_v46 = vld [vmem:[%s2510_s25 + $0x2d8] sm:$0xff]   ;;  %v342_v47 = vld [vmem:[%s2510_s25 + $0x2e0] sm:$0xff]  }
  0x20   : > { %215 = vst [vmem:[%s2515_s26 + $0x78] sm:$0xff] %v214_v15   ;;  %v346_v48 = vld [vmem:[%s2510_s25 + $0x2e8] sm:$0xff]   ;;  %v350_v49 = vld [vmem:[%s2510_s25 + $0x2f0] sm:$0xff]   ;;  %v354_v50 = vld [vmem:[%s2510_s25 + $0x2f8] sm:$0xff]  }
  0x21   : > { %219 = vst [vmem:[%s2515_s26 + $0x80] sm:$0xff] %v218_v16   ;;  %v358_v51 = vld [vmem:[%s2510_s25 + $0x300] sm:$0xff]   ;;  %v362_v52 = vld [vmem:[%s2510_s25 + $0x308] sm:$0xff]   ;;  %v366_v53 = vld [vmem:[%s2510_s25 + $0x310] sm:$0xff]  }
  0x22   : > { %223 = vst [vmem:[%s2515_s26 + $0x88] sm:$0xff] %v222_v17   ;;  %v370_v54 = vld [vmem:[%s2510_s25 + $0x318] sm:$0xff]   ;;  %v374_v55 = vld [vmem:[%s2510_s25 + $0x320] sm:$0xff]   ;;  %v378_v56 = vld [vmem:[%s2510_s25 + $0x328] sm:$0xff]  }
  0x23   : > { %227 = vst [vmem:[%s2515_s26 + $0x90] sm:$0xff] %v226_v18   ;;  %v382_v57 = vld [vmem:[%s2510_s25 + $0x330] sm:$0xff]   ;;  %v386_v58 = vld [vmem:[%s2510_s25 + $0x338] sm:$0xff]   ;;  %v390_v59 = vld [vmem:[%s2510_s25 + $0x340] sm:$0xff]  }
  0x24   : > { %231 = vst [vmem:[%s2515_s26 + $0x98] sm:$0xff] %v230_v19  }
  0x25   : > { %235 = vst [vmem:[%s2515_s26 + $0xa0] sm:$0xff] %v234_v20  }
  0x26   : > { %239 = vst [vmem:[%s2515_s26 + $0xa8] sm:$0xff] %v238_v21  }
  0x27   : > { %243 = vst [vmem:[%s2515_s26 + $0xb0] sm:$0xff] %v242_v22  }
  0x28   : > { %247 = vst [vmem:[%s2515_s26 + $0xb8] sm:$0xff] %v246_v23  }
  0x29   : > { %251 = vst [vmem:[%s2515_s26 + $0xc0] sm:$0xff] %v250_v24  }
  0x2a   : > { %255 = vst [vmem:[%s2515_s26 + $0xc8] sm:$0xff] %v254_v25  }
  0x2b   : > { %259 = vst [vmem:[%s2515_s26 + $0xd0] sm:$0xff] %v258_v26  }
  0x2c   : > { %263 = vst [vmem:[%s2515_s26 + $0xd8] sm:$0xff] %v262_v27  }
  0x2d   : > { %267 = vst [vmem:[%s2515_s26 + $0xe0] sm:$0xff] %v266_v28  }
  0x2e   : > { %271 = vst [vmem:[%s2515_s26 + $0xe8] sm:$0xff] %v270_v29  }
  0x2f   : > { %275 = vst [vmem:[%s2515_s26 + $0xf0] sm:$0xff] %v274_v30  }
  0x30   : > { %279 = vst [vmem:[%s2515_s26 + $0xf8] sm:$0xff] %v278_v31  }
  0x31   : > { %283 = vst [vmem:[%s2515_s26 + $0x100] sm:$0xff] %v282_v32  }
  0x32   : > { %287 = vst [vmem:[%s2515_s26 + $0x108] sm:$0xff] %v286_v33  }
  0x33   : > { %291 = vst [vmem:[%s2515_s26 + $0x110] sm:$0xff] %v290_v34  }
  0x34   : > { %295 = vst [vmem:[%s2515_s26 + $0x118] sm:$0xff] %v294_v35  }
  0x35   : > { %299 = vst [vmem:[%s2515_s26 + $0x120] sm:$0xff] %v298_v36  }
  0x36   : > { %303 = vst [vmem:[%s2515_s26 + $0x128] sm:$0xff] %v302_v37  }
  0x37   : > { %307 = vst [vmem:[%s2515_s26 + $0x130] sm:$0xff] %v306_v38  }
  0x38   : > { %311 = vst [vmem:[%s2515_s26 + $0x138] sm:$0xff] %v310_v39  }
  0x39   : > { %315 = vst [vmem:[%s2515_s26 + $0x140] sm:$0xff] %v314_v40  }
  0x3a   : > { %319 = vst [vmem:[%s2515_s26 + $0x148] sm:$0xff] %v318_v41  }
  0x3b   : > { %323 = vst [vmem:[%s2515_s26 + $0x150] sm:$0xff] %v322_v42  }
  0x3c   : > { %327 = vst [vmem:[%s2515_s26 + $0x158] sm:$0xff] %v326_v43  }
  0x3d   : > { %331 = vst [vmem:[%s2515_s26 + $0x160] sm:$0xff] %v330_v44  }
  0x3e   : > { %335 = vst [vmem:[%s2515_s26 + $0x168] sm:$0xff] %v334_v45  }
  0x3f   : > { %339 = vst [vmem:[%s2515_s26 + $0x170] sm:$0xff] %v338_v46  }
  0x40   : > { %343 = vst [vmem:[%s2515_s26 + $0x178] sm:$0xff] %v342_v47  }
  0x41   : > { %347 = vst [vmem:[%s2515_s26 + $0x180] sm:$0xff] %v346_v48  }
  0x42   : > { %351 = vst [vmem:[%s2515_s26 + $0x188] sm:$0xff] %v350_v49  }
  0x43   : > { %355 = vst [vmem:[%s2515_s26 + $0x190] sm:$0xff] %v354_v50  }
  0x44   : > { %359 = vst [vmem:[%s2515_s26 + $0x198] sm:$0xff] %v358_v51  }
  0x45   : > { %363 = vst [vmem:[%s2515_s26 + $0x1a0] sm:$0xff] %v362_v52  }
  0x46   : > { %367 = vst [vmem:[%s2515_s26 + $0x1a8] sm:$0xff] %v366_v53  }
  0x47   : > { %371 = vst [vmem:[%s2515_s26 + $0x1b0] sm:$0xff] %v370_v54  }
  0x48   : > { %375 = vst [vmem:[%s2515_s26 + $0x1b8] sm:$0xff] %v374_v55  }
  0x49   : > { %379 = vst [vmem:[%s2515_s26 + $0x1c0] sm:$0xff] %v378_v56  }
  0x4a   : > { %383 = vst [vmem:[%s2515_s26 + $0x1c8] sm:$0xff] %v382_v57  }
  0x4b   : > { %387 = vst [vmem:[%s2515_s26 + $0x1d0] sm:$0xff] %v386_v58  }
  0x4c   : > { %391 = vst [vmem:[%s2515_s26 + $0x1d8] sm:$0xff] %v390_v59  }
  0x4d PF: > { %p1938_p5 = scmp.ge.s32.totalorder %s2453_s14, 1  ;;  %p656_p6 = scmp.lt.s32.totalorder %s2453_s14, 3 }
  0x4f   : > { %p657_p7 = pnand %p1938_p5, %p656_p6 }
  0x50   : > { %s663_s4 = sand.u32 (!%p657_p7), 1, %s2445_s12   ;;  %s687_s9 = smul.u32 (!%p657_p7), 30, %s1933_s15 }
  0x51   : > { %660 = sbr.rel (%p657_p7) target bundleno = 475 (0x1db), region = 69 }
  0x52   : > { %s2404_s5 = smul.u32 (!%p657_p7), 480, %s663_s4  ;;  %p688_p8 = scmp.lt.s32.totalorder (!%p657_p7), %s687_s9, 59 }
  0x54   : > { %s2646_s8 = scalar_lea.vmem (!%p657_p7), [#allocation2], %s2404_s5 }
  0x56   : > { %v2006_v60 = vld [vmem:[%s2881_s1 + $0x8] sm:$0xf]  ;;  %v2342_v61 = vld [vmem:[%s2881_s1 + $0x8] sm:$0x30]  ;;  %vm860_vm0 = vcmask 1044480   ;;  %vm861_vm1 = vcmask 1045504  }
  0x57   : > { %v2007_v62 = vor.u32 %v2342_v61, %v2006_v60  ;;  %v2455_v63 = vmov 65535   ;;  %v2341_v3 = vld [vmem:[%s2881_s1] sm:$0xff]  ;;  %v2358_v5 = vld [vmem:[%s2646_s8 + $0x78] sm:$0xff]  ;;  %vm814_vm2 = vcmask 220160   ;;  %v2373_v6 = vld [vmem:[%s2646_s8 + $0xf0] sm:$0xff]  ;;  %s2888_s9 = smov (!%p688_p8, %s687_s9), 59 }
  0x58   : > { %v862_v0 = vsel %vm860_vm0, 4294967295, %v2455_v63  ;;  %v2343_v4 = vld [vmem:[%s2646_s8] sm:$0xff]  ;;  %v2388_v7 = vld [vmem:[%s2646_s8 + $0x168] sm:$0xff]  ;;  %v2374_v10 = vld [vmem:[%s2646_s8 + $0xf8] sm:$0xff]  ;;  %s1939_s12 = sshll.u32 %s2888_s9, 2  ;;  %vm1840_vm3 = vcmask 257024  }
  0x59   : > { %v863_v1 = vsel %vm861_vm1, %v862_v0, 0  ;;  %v2344_v8 = vld [vmem:[%s2646_s8 + $0x8] sm:$0xff]  ;;  %v2359_v9 = vld [vmem:[%s2646_s8 + $0x80] sm:$0xff]  ;;  %v2389_v11 = vld [vmem:[%s2646_s8 + $0x170] sm:$0xff]  ;;  %s2731_s17 = scalar_lea.vmem %s2883_s3, %s1939_s12 }
  0x5a   : > { %v865_v2 = vand.u32 %v2007_v62, %v863_v1  ;;  %v2345_v12 = vld [vmem:[%s2646_s8 + $0x10] sm:$0xff]  ;;  %v2360_v13 = vld [vmem:[%s2646_s8 + $0x88] sm:$0xff]  ;;  %v2375_v14 = vld [vmem:[%s2646_s8 + $0x100] sm:$0xff] }
  0x5b   : > { %v2390_v15 = vld [vmem:[%s2646_s8 + $0x178] sm:$0xff]  ;;  %v2361_v17 = vld [vmem:[%s2646_s8 + $0x90] sm:$0xff]  ;;  %v2376_v18 = vld [vmem:[%s2646_s8 + $0x108] sm:$0xff] }
  0x5c   : > { %873 = vmatpush.bf16.msra.mxu0 %v865_v2  ;;  %1108 = vmatpush.bf16.msra.mxu1 %v865_v2  ;;  %v2346_v16 = vld [vmem:[%s2646_s8 + $0x18] sm:$0xff]  ;;  %v2391_v19 = vld [vmem:[%s2646_s8 + $0x180] sm:$0xff]  ;;  %v2377_v22 = vld [vmem:[%s2646_s8 + $0x110] sm:$0xff] }
  0x5d   : > { %1373 = vmatpush.bf16.msra.mxu2 %v865_v2  ;;  %1638 = vmatpush.bf16.msra.mxu3 %v865_v2  ;;  %v2347_v20 = vld [vmem:[%s2646_s8 + $0x20] sm:$0xff]  ;;  %v2362_v21 = vld [vmem:[%s2646_s8 + $0x98] sm:$0xff]  ;;  %v2392_v23 = vld [vmem:[%s2646_s8 + $0x188] sm:$0xff] }
  0x5e   : > { %v2348_v24 = vld [vmem:[%s2646_s8 + $0x28] sm:$0xff]  ;;  %v2363_v25 = vld [vmem:[%s2646_s8 + $0xa0] sm:$0xff]  ;;  %v2378_v26 = vld [vmem:[%s2646_s8 + $0x118] sm:$0xff] }
  0x5f   : > { %v2393_v27 = vld [vmem:[%s2646_s8 + $0x190] sm:$0xff]  ;;  %v2364_v29 = vld [vmem:[%s2646_s8 + $0xa8] sm:$0xff]  ;;  %v2379_v30 = vld [vmem:[%s2646_s8 + $0x120] sm:$0xff] }
  0x60   : > { %874 = vmatpush.bf16.msra.mxu0 %v2341_v3  ;;  %1109 = vmatpush.bf16.msra.mxu1 %v2341_v3  ;;  %v2349_v28 = vld [vmem:[%s2646_s8 + $0x30] sm:$0xff]  ;;  %v2394_v31 = vld [vmem:[%s2646_s8 + $0x198] sm:$0xff]  ;;  %v2380_v34 = vld [vmem:[%s2646_s8 + $0x128] sm:$0xff] }
  0x61   : > { %1374 = vmatpush.bf16.msra.mxu2 %v2341_v3  ;;  %1639 = vmatpush.bf16.msra.mxu3 %v2341_v3  ;;  %v2350_v32 = vld [vmem:[%s2646_s8 + $0x38] sm:$0xff]  ;;  %v2365_v33 = vld [vmem:[%s2646_s8 + $0xb0] sm:$0xff]  ;;  %v2395_v35 = vld [vmem:[%s2646_s8 + $0x1a0] sm:$0xff] }
  0x62   : > { %v2351_v36 = vld [vmem:[%s2646_s8 + $0x40] sm:$0xff]  ;;  %v2366_v37 = vld [vmem:[%s2646_s8 + $0xb8] sm:$0xff]  ;;  %v2381_v40 = vld [vmem:[%s2646_s8 + $0x130] sm:$0xff] }
  0x63   : > { %2008 = vmatmul.msk.bf16.vlgmr.msra.gmra.mxu0 %vm814_vm2, %v2343_v4  ;;  %2113 = vmatmul.msk.bf16.vlgmr.msra.gmra.mxu1 %vm814_vm2, %v2358_v5  ;;  %v2396_v41 = vld [vmem:[%s2646_s8 + $0x1a8] sm:$0xff]  ;;  %v2725_v46 = vld [vmem:[%s2882_s2] ss:$0 sm:$0xff]  ;;  %v2382_v61 = vld [vmem:[%s2646_s8 + $0x138] sm:$0xff] }
  0x64   : > { %2218 = vmatmul.msk.bf16.vlgmr.msra.gmra.mxu2 %vm814_vm2, %v2373_v6  ;;  %2323 = vmatmul.msk.bf16.vlgmr.msra.gmra.mxu3 %vm814_vm2, %v2388_v7  ;;  %v2352_v55 = vld [vmem:[%s2646_s8 + $0x48] sm:$0xff]  ;;  %v2367_v56 = vld [vmem:[%s2646_s8 + $0xc0] sm:$0xff]  ;;  %v2397_v62 = vld [vmem:[%s2646_s8 + $0x1b0] sm:$0xff] }
  0x73   : > { %2009 = vmatmul.msk.bf16.gmra.mxu0 %vm814_vm2, %v2344_v8  ;;  %2114 = vmatmul.msk.bf16.gmra.mxu1 %vm814_vm2, %v2359_v9 }
  0x74   : > { %2219 = vmatmul.msk.bf16.gmra.mxu2 %vm814_vm2, %v2374_v10  ;;  %2324 = vmatmul.msk.bf16.gmra.mxu3 %vm814_vm2, %v2389_v11 }
  0x83   : > { %2010 = vmatmul.msk.bf16.gmra.mxu0 %vm814_vm2, %v2345_v12  ;;  %2115 = vmatmul.msk.bf16.gmra.mxu1 %vm814_vm2, %v2360_v13 }
  0x84   : > { %2220 = vmatmul.msk.bf16.gmra.mxu2 %vm814_vm2, %v2375_v14  ;;  %2325 = vmatmul.msk.bf16.gmra.mxu3 %vm814_vm2, %v2390_v15  ;;  %v2353_v15 = vld [vmem:[%s2646_s8 + $0x50] sm:$0xff] }
  0x93   : > { %2011 = vmatmul.msk.bf16.gmra.mxu0 %vm814_vm2, %v2346_v16  ;;  %2116 = vmatmul.msk.bf16.gmra.mxu1 %vm814_vm2, %v2361_v17  ;;  %v2368_v16 = vld [vmem:[%s2646_s8 + $0xc8] sm:$0xff] }
  0x94   : > { %2221 = vmatmul.msk.bf16.gmra.mxu2 %vm814_vm2, %v2376_v18  ;;  %2326 = vmatmul.msk.bf16.gmra.mxu3 %vm814_vm2, %v2391_v19 }
  0xa3   : > { %2012 = vmatmul.msk.bf16.gmra.mxu0 %vm814_vm2, %v2347_v20  ;;  %2117 = vmatmul.msk.bf16.gmra.mxu1 %vm814_vm2, %v2362_v21  ;;  %v2383_v21 = vld [vmem:[%s2646_s8 + $0x140] sm:$0xff] }
  0xa4   : > { %2222 = vmatmul.msk.bf16.gmra.mxu2 %vm814_vm2, %v2377_v22  ;;  %2327 = vmatmul.msk.bf16.gmra.mxu3 %vm814_vm2, %v2392_v23  ;;  %v2398_v22 = vld [vmem:[%s2646_s8 + $0x1b8] sm:$0xff] }
  0xb3   : > { %2013 = vmatmul.msk.bf16.gmra.mxu0 %vm814_vm2, %v2348_v24  ;;  %2118 = vmatmul.msk.bf16.gmra.mxu1 %vm814_vm2, %v2363_v25 }
  0xb4   : > { %2223 = vmatmul.msk.bf16.gmra.mxu2 %vm814_vm2, %v2378_v26  ;;  %2328 = vmatmul.msk.bf16.gmra.mxu3 %vm814_vm2, %v2393_v27 }
  0xc3   : > { %2014 = vmatmul.msk.bf16.gmra.mxu0 %vm814_vm2, %v2349_v28  ;;  %2119 = vmatmul.msk.bf16.gmra.mxu1 %vm814_vm2, %v2364_v29 }
  0xc4   : > { %2224 = vmatmul.msk.bf16.gmra.mxu2 %vm814_vm2, %v2379_v30  ;;  %2329 = vmatmul.msk.bf16.gmra.mxu3 %vm814_vm2, %v2394_v31 }
  0xd3   : > { %2015 = vmatmul.msk.bf16.gmra.mxu0 %vm814_vm2, %v2350_v32  ;;  %2120 = vmatmul.msk.bf16.gmra.mxu1 %vm814_vm2, %v2365_v33 }
  0xd4   : > { %2225 = vmatmul.msk.bf16.gmra.mxu2 %vm814_vm2, %v2380_v34  ;;  %2330 = vmatmul.msk.bf16.gmra.mxu3 %vm814_vm2, %v2395_v35 }
  0xe0   : > { %v876_v38 = vpop.f32.mrf.mxu0  ;;  %v1111_v39 = vpop.f32.mrf.mxu1 }
  0xe1   : > { %v1186_v42 = vmax.f32 %v876_v38, %v1111_v39  ;;  %v2354_v39 = vld [vmem:[%s2646_s8 + $0x58] sm:$0xff] }
  0xe3   : > { %2016 = vmatmul.msk.bf16.gmra.mxu0 %vm814_vm2, %v2351_v36  ;;  %2121 = vmatmul.msk.bf16.gmra.mxu1 %vm814_vm2, %v2366_v37 }
  0xe4   : > { %2226 = vmatmul.msk.bf16.gmra.mxu2 %vm814_vm2, %v2381_v40  ;;  %2331 = vmatmul.msk.bf16.gmra.mxu3 %vm814_vm2, %v2396_v41  ;;  %v2369_v40 = vld [vmem:[%s2646_s8 + $0xd0] sm:$0xff] }
  0xe7   : > { %v1376_v43 = vpop.f32.mrf.mxu2  ;;  %v1641_v44 = vpop.f32.mrf.mxu3 }
  0xe8   : > { %v1451_v45 = vmax.f32 %v1186_v42, %v1376_v43  ;;  %v878_v47 = vpop.f32.mrf.mxu0  ;;  %v1113_v48 = vpop.f32.mrf.mxu1 }
  0xe9   : > { %v1187_v52 = vmax.f32 %v878_v47, %v1113_v48  ;;  %v2399_v47 = vld [vmem:[%s2646_s8 + $0x1c0] sm:$0xff] }
  0xea   : > { %v1716_v49 = vmax.f32 %v1451_v45, %v1641_v44  ;;  %v2384_v45 = vld [vmem:[%s2646_s8 + $0x148] sm:$0xff] }
  0xec   : > { %v1750_v50 = vadd.f32 %v2725_v46, %v1716_v49 }
  0xee   : > { %v1780_v51 = vmax.f32 %v1750_v50, 0.0 }
  0xef   : > { %v1378_v53 = vpop.f32.mrf.mxu2  ;;  %v1643_v54 = vpop.f32.mrf.mxu3 }
  0xf0   : > { %v1810_v57 = vpack.c.bf16 %v1780_v51, %v1780_v51  ;;  %v1452_v58 = vmax.f32 %v1187_v52, %v1378_v53  ;;  %v881_v59 = vpop.f32.mrf.mxu0  ;;  %v1116_v60 = vpop.f32.mrf.mxu1 }
  0xf1   : > { %v1188_v1 = vmax.f32 %v881_v59, %v1116_v60 }
  0xf2   : > { %1841 = vst.msk [vmem:[%s2731_s17] sm:$0xf] %vm1840_vm3, %v1810_v57  ;;  %v1717_v63 = vmax.f32 %v1452_v58, %v1643_v54 }
  0xf3   : > { %2017 = vmatmul.msk.bf16.gmra.mxu0 %vm814_vm2, %v2352_v55  ;;  %2122 = vmatmul.msk.bf16.gmra.mxu1 %vm814_vm2, %v2367_v56 }
  0xf4   : > { %v1751_v0 = vadd.f32 %v2725_v46, %v1717_v63  ;;  %2227 = vmatmul.msk.bf16.gmra.mxu2 %vm814_vm2, %v2382_v61  ;;  %2332 = vmatmul.msk.bf16.gmra.mxu3 %vm814_vm2, %v2397_v62 }
  0xf6   : > { %v1781_v2 = vmax.f32 %v1751_v0, 0.0  ;;  %v2355_v0 = vld [vmem:[%s2646_s8 + $0x60] sm:$0xff] }
  0xf7   : > { %v1381_v3 = vpop.f32.mrf.mxu2  ;;  %v1646_v4 = vpop.f32.mrf.mxu3 }
  0xf8   : > { %v1811_v5 = vpack.c.bf16 %v1781_v2, %v1781_v2  ;;  %v1453_v6 = vmax.f32 %v1188_v1, %v1381_v3  ;;  %v883_v7 = vpop.f32.mrf.mxu0  ;;  %v1118_v8 = vpop.f32.mrf.mxu1  ;;  %v2370_v1 = vld [vmem:[%s2646_s8 + $0xd8] sm:$0xff] }
  0xf9   : > { %v1189_v12 = vmax.f32 %v883_v7, %v1118_v8  ;;  %v2400_v7 = vld [vmem:[%s2646_s8 + $0x1c8] sm:$0xff] }
  0xfa   : > { %1842 = vst.msk [vmem:[%s2731_s17 + $0x4] sm:$0xf] %vm1840_vm3, %v1811_v5  ;;  %v1718_v9 = vmax.f32 %v1453_v6, %v1646_v4  ;;  %v2385_v6 = vld [vmem:[%s2646_s8 + $0x150] sm:$0xff] }
  0xfc   : > { %v1752_v10 = vadd.f32 %v2725_v46, %v1718_v9 }
  0xfe   : > { %v1782_v11 = vmax.f32 %v1752_v10, 0.0 }
  0xff   : > { %v1383_v13 = vpop.f32.mrf.mxu2  ;;  %v1648_v14 = vpop.f32.mrf.mxu3 }
 0x100   : > { %v1812_v17 = vpack.c.bf16 %v1782_v11, %v1782_v11  ;;  %v1454_v18 = vmax.f32 %v1189_v12, %v1383_v13  ;;  %v886_v19 = vpop.f32.mrf.mxu0  ;;  %v1121_v20 = vpop.f32.mrf.mxu1 }
 0x101   : > { %v1190_v25 = vmax.f32 %v886_v19, %v1121_v20 }
 0x102   : > { %1843 = vst.msk [vmem:[%s2731_s17 + $0x8] sm:$0xf] %vm1840_vm3, %v1812_v17  ;;  %v1719_v23 = vmax.f32 %v1454_v18, %v1648_v14 }
 0x103   : > { %2018 = vmatmul.msk.bf16.gmra.mxu0 %vm814_vm2, %v2353_v15  ;;  %2123 = vmatmul.msk.bf16.gmra.mxu1 %vm814_vm2, %v2368_v16 }
 0x104   : > { %v1753_v24 = vadd.f32 %v2725_v46, %v1719_v23  ;;  %2228 = vmatmul.msk.bf16.gmra.mxu2 %vm814_vm2, %v2383_v21  ;;  %2333 = vmatmul.msk.bf16.gmra.mxu3 %vm814_vm2, %v2398_v22 }
 0x106   : > { %v1783_v26 = vmax.f32 %v1753_v24, 0.0  ;;  %v2356_v24 = vld [vmem:[%s2646_s8 + $0x68] sm:$0xff] }
 0x107   : > { %v1386_v27 = vpop.f32.mrf.mxu2  ;;  %v1651_v28 = vpop.f32.mrf.mxu3 }
 0x108   : > { %v1813_v29 = vpack.c.bf16 %v1783_v26, %v1783_v26  ;;  %v1455_v30 = vmax.f32 %v1190_v25, %v1386_v27  ;;  %v888_v31 = vpop.f32.mrf.mxu0  ;;  %v1123_v32 = vpop.f32.mrf.mxu1  ;;  %v2371_v25 = vld [vmem:[%s2646_s8 + $0xe0] sm:$0xff] }
 0x109   : > { %v1191_v36 = vmax.f32 %v888_v31, %v1123_v32  ;;  %v2401_v31 = vld [vmem:[%s2646_s8 + $0x1d0] sm:$0xff] }
 0x10a   : > { %1844 = vst.msk [vmem:[%s2731_s17 + $0xc] sm:$0xf] %vm1840_vm3, %v1813_v29  ;;  %v1720_v33 = vmax.f32 %v1455_v30, %v1651_v28  ;;  %v2386_v30 = vld [vmem:[%s2646_s8 + $0x158] sm:$0xff] }
 0x10c   : > { %v1754_v34 = vadd.f32 %v2725_v46, %v1720_v33 }
 0x10e   : > { %v1784_v35 = vmax.f32 %v1754_v34, 0.0 }
 0x10f   : > { %v1388_v37 = vpop.f32.mrf.mxu2  ;;  %v1653_v38 = vpop.f32.mrf.mxu3 }
 0x110   : > { %v1814_v41 = vpack.c.bf16 %v1784_v35, %v1784_v35  ;;  %v1456_v42 = vmax.f32 %v1191_v36, %v1388_v37  ;;  %v891_v43 = vpop.f32.mrf.mxu0  ;;  %v1126_v44 = vpop.f32.mrf.mxu1 }
 0x111   : > { %v1192_v50 = vmax.f32 %v891_v43, %v1126_v44 }
 0x112   : > { %1845 = vst.msk [vmem:[%s2731_s17 + $0x10] sm:$0xf] %vm1840_vm3, %v1814_v41  ;;  %v1721_v48 = vmax.f32 %v1456_v42, %v1653_v38 }
 0x113   : > { %2019 = vmatmul.msk.bf16.gmra.mxu0 %vm814_vm2, %v2354_v39  ;;  %2124 = vmatmul.msk.bf16.gmra.mxu1 %vm814_vm2, %v2369_v40 }
 0x114   : > { %v1755_v49 = vadd.f32 %v2725_v46, %v1721_v48  ;;  %2229 = vmatmul.msk.bf16.gmra.mxu2 %vm814_vm2, %v2384_v45  ;;  %2334 = vmatmul.msk.bf16.gmra.mxu3 %vm814_vm2, %v2399_v47 }
 0x116   : > { %v1785_v51 = vmax.f32 %v1755_v49, 0.0  ;;  %v2357_v49 = vld [vmem:[%s2646_s8 + $0x70] sm:$0xff] }
 0x117   : > { %v1391_v52 = vpop.f32.mrf.mxu2  ;;  %v1656_v53 = vpop.f32.mrf.mxu3 }
 0x118   : > { %v1815_v54 = vpack.c.bf16 %v1785_v51, %v1785_v51  ;;  %v1457_v55 = vmax.f32 %v1192_v50, %v1391_v52  ;;  %v893_v56 = vpop.f32.mrf.mxu0  ;;  %v1128_v57 = vpop.f32.mrf.mxu1  ;;  %v2372_v50 = vld [vmem:[%s2646_s8 + $0xe8] sm:$0xff] }
 0x119   : > { %v1193_v61 = vmax.f32 %v893_v56, %v1128_v57  ;;  %v2402_v56 = vld [vmem:[%s2646_s8 + $0x1d8] sm:$0xff] }
 0x11a   : > { %1846 = vst.msk [vmem:[%s2731_s17 + $0x14] sm:$0xf] %vm1840_vm3, %v1815_v54  ;;  %v1722_v58 = vmax.f32 %v1457_v55, %v1656_v53  ;;  %v2387_v55 = vld [vmem:[%s2646_s8 + $0x160] sm:$0xff] }
 0x11c   : > { %v1756_v59 = vadd.f32 %v2725_v46, %v1722_v58 }
 0x11e   : > { %v1786_v60 = vmax.f32 %v1756_v59, 0.0 }
 0x11f   : > { %v1393_v62 = vpop.f32.mrf.mxu2  ;;  %v1658_v63 = vpop.f32.mrf.mxu3 }
 0x120   : > { %v1816_v2 = vpack.c.bf16 %v1786_v60, %v1786_v60  ;;  %v1458_v3 = vmax.f32 %v1193_v61, %v1393_v62  ;;  %v896_v4 = vpop.f32.mrf.mxu0  ;;  %v1131_v5 = vpop.f32.mrf.mxu1 }
 0x121   : > { %v1194_v10 = vmax.f32 %v896_v4, %v1131_v5 }
 0x122   : > { %1847 = vst.msk [vmem:[%s2731_s17 + $0x18] sm:$0xf] %vm1840_vm3, %v1816_v2  ;;  %v1723_v8 = vmax.f32 %v1458_v3, %v1658_v63 }
 0x123   : > { %2020 = vmatmul.msk.bf16.gmra.mxu0 %vm814_vm2, %v2355_v0  ;;  %2125 = vmatmul.msk.bf16.gmra.mxu1 %vm814_vm2, %v2370_v1 }
 0x124   : > { %v1757_v9 = vadd.f32 %v2725_v46, %v1723_v8  ;;  %2230 = vmatmul.msk.bf16.gmra.mxu2 %vm814_vm2, %v2385_v6  ;;  %2335 = vmatmul.msk.bf16.gmra.mxu3 %vm814_vm2, %v2400_v7 }
 0x126   : > { %v1787_v11 = vmax.f32 %v1757_v9, 0.0 }
 0x127   : > { %v1396_v12 = vpop.f32.mrf.mxu2  ;;  %v1661_v13 = vpop.f32.mrf.mxu3 }
 0x128   : > { %v1817_v14 = vpack.c.bf16 %v1787_v11, %v1787_v11  ;;  %v1459_v15 = vmax.f32 %v1194_v10, %v1396_v12  ;;  %v898_v16 = vpop.f32.mrf.mxu0  ;;  %v1133_v17 = vpop.f32.mrf.mxu1 }
 0x129   : > { %v1195_v21 = vmax.f32 %v898_v16, %v1133_v17 }
 0x12a   : > { %1848 = vst.msk [vmem:[%s2731_s17 + $0x1c] sm:$0xf] %vm1840_vm3, %v1817_v14  ;;  %v1724_v18 = vmax.f32 %v1459_v15, %v1661_v13 }
 0x12c   : > { %v1758_v19 = vadd.f32 %v2725_v46, %v1724_v18 }
 0x12e   : > { %v1788_v20 = vmax.f32 %v1758_v19, 0.0 }
 0x12f   : > { %v1398_v22 = vpop.f32.mrf.mxu2  ;;  %v1663_v23 = vpop.f32.mrf.mxu3 }
 0x130   : > { %v1818_v26 = vpack.c.bf16 %v1788_v20, %v1788_v20  ;;  %v1460_v27 = vmax.f32 %v1195_v21, %v1398_v22  ;;  %v901_v28 = vpop.f32.mrf.mxu0  ;;  %v1136_v29 = vpop.f32.mrf.mxu1 }
 0x131   : > { %v1196_v34 = vmax.f32 %v901_v28, %v1136_v29 }
 0x132   : > { %1849 = vst.msk [vmem:[%s2731_s17 + $0x20] sm:$0xf] %vm1840_vm3, %v1818_v26  ;;  %v1725_v32 = vmax.f32 %v1460_v27, %v1663_v23 }
 0x133   : > { %2021 = vmatmul.msk.bf16.gmra.mxu0 %vm814_vm2, %v2356_v24  ;;  %2126 = vmatmul.msk.bf16.gmra.mxu1 %vm814_vm2, %v2371_v25 }
 0x134   : > { %v1759_v33 = vadd.f32 %v2725_v46, %v1725_v32  ;;  %2231 = vmatmul.msk.bf16.gmra.mxu2 %vm814_vm2, %v2386_v30  ;;  %2336 = vmatmul.msk.bf16.gmra.mxu3 %vm814_vm2, %v2401_v31 }
 0x136   : > { %v1789_v35 = vmax.f32 %v1759_v33, 0.0 }
 0x137   : > { %v1401_v36 = vpop.f32.mrf.mxu2  ;;  %v1666_v37 = vpop.f32.mrf.mxu3 }
 0x138   : > { %v1819_v38 = vpack.c.bf16 %v1789_v35, %v1789_v35  ;;  %v1461_v39 = vmax.f32 %v1196_v34, %v1401_v36  ;;  %v903_v40 = vpop.f32.mrf.mxu0  ;;  %v1138_v41 = vpop.f32.mrf.mxu1 }
 0x139   : > { %v1197_v45 = vmax.f32 %v903_v40, %v1138_v41 }
 0x13a   : > { %1850 = vst.msk [vmem:[%s2731_s17 + $0x24] sm:$0xf] %vm1840_vm3, %v1819_v38  ;;  %v1726_v42 = vmax.f32 %v1461_v39, %v1666_v37 }
 0x13c   : > { %v1760_v43 = vadd.f32 %v2725_v46, %v1726_v42 }
 0x13e   : > { %v1790_v44 = vmax.f32 %v1760_v43, 0.0 }
 0x13f   : > { %v1403_v47 = vpop.f32.mrf.mxu2  ;;  %v1668_v48 = vpop.f32.mrf.mxu3 }
 0x140   : > { %v1820_v51 = vpack.c.bf16 %v1790_v44, %v1790_v44  ;;  %v1462_v52 = vmax.f32 %v1197_v45, %v1403_v47  ;;  %v906_v53 = vpop.f32.mrf.mxu0  ;;  %v1141_v54 = vpop.f32.mrf.mxu1 }
 0x141   : > { %v1198_v59 = vmax.f32 %v906_v53, %v1141_v54 }
 0x142   : > { %1851 = vst.msk [vmem:[%s2731_s17 + $0x28] sm:$0xf] %vm1840_vm3, %v1820_v51  ;;  %v1727_v57 = vmax.f32 %v1462_v52, %v1668_v48 }
 0x143   : > { %2022 = vmatmul.msk.bf16.gmra.mxu0 %vm814_vm2, %v2357_v49  ;;  %2127 = vmatmul.msk.bf16.gmra.mxu1 %vm814_vm2, %v2372_v50 }
 0x144   : > { %v1761_v58 = vadd.f32 %v2725_v46, %v1727_v57  ;;  %2232 = vmatmul.msk.bf16.gmra.mxu2 %vm814_vm2, %v2387_v55  ;;  %2337 = vmatmul.msk.bf16.gmra.mxu3 %vm814_vm2, %v2402_v56 }
 0x146   : > { %v1791_v60 = vmax.f32 %v1761_v58, 0.0 }
 0x147   : > { %v1406_v61 = vpop.f32.mrf.mxu2  ;;  %v1671_v62 = vpop.f32.mrf.mxu3 }
 0x148   : > { %v1821_v63 = vpack.c.bf16 %v1791_v60, %v1791_v60  ;;  %v1463_v0 = vmax.f32 %v1198_v59, %v1406_v61  ;;  %v908_v1 = vpop.f32.mrf.mxu0  ;;  %v1143_v2 = vpop.f32.mrf.mxu1 }
 0x149   : > { %v1199_v6 = vmax.f32 %v908_v1, %v1143_v2 }
 0x14a   : > { %1852 = vst.msk [vmem:[%s2731_s17 + $0x2c] sm:$0xf] %vm1840_vm3, %v1821_v63  ;;  %v1728_v3 = vmax.f32 %v1463_v0, %v1671_v62 }
 0x14c   : > { %v1762_v4 = vadd.f32 %v2725_v46, %v1728_v3 }
 0x14e   : > { %v1792_v5 = vmax.f32 %v1762_v4, 0.0 }
 0x14f   : > { %v1408_v7 = vpop.f32.mrf.mxu2  ;;  %v1673_v8 = vpop.f32.mrf.mxu3 }
 0x150   : > { %v1822_v9 = vpack.c.bf16 %v1792_v5, %v1792_v5  ;;  %v1464_v10 = vmax.f32 %v1199_v6, %v1408_v7  ;;  %v911_v11 = vpop.f32.mrf.mxu0  ;;  %v1146_v12 = vpop.f32.mrf.mxu1 }
 0x151   : > { %v1200_v15 = vmax.f32 %v911_v11, %v1146_v12 }
 0x152   : > { %1853 = vst.msk [vmem:[%s2731_s17 + $0x30] sm:$0xf] %vm1840_vm3, %v1822_v9  ;;  %v1729_v13 = vmax.f32 %v1464_v10, %v1673_v8 }
 0x154   : > { %v1763_v14 = vadd.f32 %v2725_v46, %v1729_v13 }
 0x156   : > { %v1793_v16 = vmax.f32 %v1763_v14, 0.0 }
 0x157   : > { %v1411_v17 = vpop.f32.mrf.mxu2  ;;  %v1676_v18 = vpop.f32.mrf.mxu3 }
 0x158   : > { %v1823_v19 = vpack.c.bf16 %v1793_v16, %v1793_v16  ;;  %v1465_v20 = vmax.f32 %v1200_v15, %v1411_v17  ;;  %v913_v21 = vpop.f32.mrf.mxu0  ;;  %v1148_v22 = vpop.f32.mrf.mxu1 }
 0x159   : > { %v1201_v26 = vmax.f32 %v913_v21, %v1148_v22 }
 0x15a   : > { %1854 = vst.msk [vmem:[%s2731_s17 + $0x34] sm:$0xf] %vm1840_vm3, %v1823_v19  ;;  %v1730_v23 = vmax.f32 %v1465_v20, %v1676_v18 }
 0x15c   : > { %v1764_v24 = vadd.f32 %v2725_v46, %v1730_v23 }
 0x15e   : > { %v1794_v25 = vmax.f32 %v1764_v24, 0.0 }
 0x15f   : > { %v1413_v27 = vpop.f32.mrf.mxu2  ;;  %v1678_v28 = vpop.f32.mrf.mxu3 }
 0x160   : > { %v1824_v29 = vpack.c.bf16 %v1794_v25, %v1794_v25  ;;  %v1466_v30 = vmax.f32 %v1201_v26, %v1413_v27  ;;  %v916_v31 = vpop.f32.mrf.mxu0  ;;  %v1151_v32 = vpop.f32.mrf.mxu1 }
 0x161   : > { %v1202_v35 = vmax.f32 %v916_v31, %v1151_v32 }
 0x162   : > { %1855 = vst.msk [vmem:[%s2731_s17 + $0x38] sm:$0xf] %vm1840_vm3, %v1824_v29  ;;  %v1731_v33 = vmax.f32 %v1466_v30, %v1678_v28 }
 0x164   : > { %v1765_v34 = vadd.f32 %v2725_v46, %v1731_v33 }
 0x166   : > { %v1795_v36 = vmax.f32 %v1765_v34, 0.0 }
 0x167   : > { %v1416_v37 = vpop.f32.mrf.mxu2  ;;  %v1681_v38 = vpop.f32.mrf.mxu3 }
 0x168   : > { %v1825_v39 = vpack.c.bf16 %v1795_v36, %v1795_v36  ;;  %v1467_v40 = vmax.f32 %v1202_v35, %v1416_v37  ;;  %v918_v41 = vpop.f32.mrf.mxu0  ;;  %v1153_v42 = vpop.f32.mrf.mxu1 }
 0x169   : > { %v1203_v47 = vmax.f32 %v918_v41, %v1153_v42 }
 0x16a   : > { %1856 = vst.msk [vmem:[%s2731_s17 + $0x3c] sm:$0xf] %vm1840_vm3, %v1825_v39  ;;  %v1732_v43 = vmax.f32 %v1467_v40, %v1681_v38 }
 0x16c   : > { %v1766_v44 = vadd.f32 %v2725_v46, %v1732_v43 }
 0x16e   : > { %v1796_v45 = vmax.f32 %v1766_v44, 0.0 }
 0x16f   : > { %v1418_v48 = vpop.f32.mrf.mxu2  ;;  %v1683_v49 = vpop.f32.mrf.mxu3 }
 0x170   : > { %v1826_v50 = vpack.c.bf16 %v1796_v45, %v1796_v45  ;;  %v1468_v51 = vmax.f32 %v1203_v47, %v1418_v48  ;;  %v921_v52 = vpop.f32.mrf.mxu0  ;;  %v1156_v53 = vpop.f32.mrf.mxu1 }
 0x171   : > { %v1204_v56 = vmax.f32 %v921_v52, %v1156_v53 }
 0x172   : > { %1857 = vst.msk [vmem:[%s2731_s17 + $0x40] sm:$0xf] %vm1840_vm3, %v1826_v50  ;;  %v1733_v54 = vmax.f32 %v1468_v51, %v1683_v49 }
 0x174   : > { %v1767_v55 = vadd.f32 %v2725_v46, %v1733_v54 }
 0x176   : > { %v1797_v57 = vmax.f32 %v1767_v55, 0.0 }
 0x177   : > { %v1421_v58 = vpop.f32.mrf.mxu2  ;;  %v1686_v59 = vpop.f32.mrf.mxu3 }
 0x178   : > { %v1827_v60 = vpack.c.bf16 %v1797_v57, %v1797_v57  ;;  %v1469_v61 = vmax.f32 %v1204_v56, %v1421_v58  ;;  %v923_v62 = vpop.f32.mrf.mxu0  ;;  %v1158_v63 = vpop.f32.mrf.mxu1 }
 0x179   : > { %v1205_v3 = vmax.f32 %v923_v62, %v1158_v63 }
 0x17a   : > { %1858 = vst.msk [vmem:[%s2731_s17 + $0x44] sm:$0xf] %vm1840_vm3, %v1827_v60  ;;  %v1734_v0 = vmax.f32 %v1469_v61, %v1686_v59 }
 0x17c   : > { %v1768_v1 = vadd.f32 %v2725_v46, %v1734_v0 }
 0x17e   : > { %v1798_v2 = vmax.f32 %v1768_v1, 0.0 }
 0x17f   : > { %v1423_v4 = vpop.f32.mrf.mxu2  ;;  %v1688_v5 = vpop.f32.mrf.mxu3 }
 0x180   : > { %v1828_v6 = vpack.c.bf16 %v1798_v2, %v1798_v2  ;;  %v1470_v7 = vmax.f32 %v1205_v3, %v1423_v4  ;;  %v926_v8 = vpop.f32.mrf.mxu0  ;;  %v1161_v9 = vpop.f32.mrf.mxu1 }
 0x181   : > { %v1206_v12 = vmax.f32 %v926_v8, %v1161_v9 }
 0x182   : > { %1859 = vst.msk [vmem:[%s2731_s17 + $0x48] sm:$0xf] %vm1840_vm3, %v1828_v6  ;;  %v1735_v10 = vmax.f32 %v1470_v7, %v1688_v5 }
 0x184   : > { %v1769_v11 = vadd.f32 %v2725_v46, %v1735_v10 }
 0x186   : > { %v1799_v13 = vmax.f32 %v1769_v11, 0.0 }
 0x187   : > { %v1426_v14 = vpop.f32.mrf.mxu2  ;;  %v1691_v15 = vpop.f32.mrf.mxu3 }
 0x188   : > { %v1829_v16 = vpack.c.bf16 %v1799_v13, %v1799_v13  ;;  %v1471_v17 = vmax.f32 %v1206_v12, %v1426_v14  ;;  %v928_v18 = vpop.f32.mrf.mxu0  ;;  %v1163_v19 = vpop.f32.mrf.mxu1 }
 0x189   : > { %v1207_v23 = vmax.f32 %v928_v18, %v1163_v19 }
 0x18a   : > { %1860 = vst.msk [vmem:[%s2731_s17 + $0x4c] sm:$0xf] %vm1840_vm3, %v1829_v16  ;;  %v1736_v20 = vmax.f32 %v1471_v17, %v1691_v15 }
 0x18c   : > { %v1770_v21 = vadd.f32 %v2725_v46, %v1736_v20 }
 0x18e   : > { %v1800_v22 = vmax.f32 %v1770_v21, 0.0 }
 0x18f   : > { %v1428_v24 = vpop.f32.mrf.mxu2  ;;  %v1693_v25 = vpop.f32.mrf.mxu3 }
 0x190   : > { %v1830_v26 = vpack.c.bf16 %v1800_v22, %v1800_v22  ;;  %v1472_v27 = vmax.f32 %v1207_v23, %v1428_v24  ;;  %v931_v28 = vpop.f32.mrf.mxu0  ;;  %v1166_v29 = vpop.f32.mrf.mxu1 }
 0x191   : > { %v1208_v32 = vmax.f32 %v931_v28, %v1166_v29 }
 0x192   : > { %1861 = vst.msk [vmem:[%s2731_s17 + $0x50] sm:$0xf] %vm1840_vm3, %v1830_v26  ;;  %v1737_v30 = vmax.f32 %v1472_v27, %v1693_v25 }
 0x194   : > { %v1771_v31 = vadd.f32 %v2725_v46, %v1737_v30 }
 0x196   : > { %v1801_v33 = vmax.f32 %v1771_v31, 0.0 }
 0x197   : > { %v1431_v34 = vpop.f32.mrf.mxu2  ;;  %v1696_v35 = vpop.f32.mrf.mxu3 }
 0x198   : > { %v1831_v36 = vpack.c.bf16 %v1801_v33, %v1801_v33  ;;  %v1473_v37 = vmax.f32 %v1208_v32, %v1431_v34  ;;  %v933_v38 = vpop.f32.mrf.mxu0  ;;  %v1168_v39 = vpop.f32.mrf.mxu1 }
 0x199   : > { %v1209_v43 = vmax.f32 %v933_v38, %v1168_v39 }
 0x19a   : > { %1862 = vst.msk [vmem:[%s2731_s17 + $0x54] sm:$0xf] %vm1840_vm3, %v1831_v36  ;;  %v1738_v40 = vmax.f32 %v1473_v37, %v1696_v35 }
 0x19c   : > { %v1772_v41 = vadd.f32 %v2725_v46, %v1738_v40 }
 0x19e   : > { %v1802_v42 = vmax.f32 %v1772_v41, 0.0 }
 0x19f   : > { %v1433_v44 = vpop.f32.mrf.mxu2  ;;  %v1698_v45 = vpop.f32.mrf.mxu3 }
 0x1a0   : > { %v1832_v47 = vpack.c.bf16 %v1802_v42, %v1802_v42  ;;  %v1474_v48 = vmax.f32 %v1209_v43, %v1433_v44  ;;  %v936_v49 = vpop.f32.mrf.mxu0  ;;  %v1171_v50 = vpop.f32.mrf.mxu1 }
 0x1a1   : > { %v1210_v53 = vmax.f32 %v936_v49, %v1171_v50 }
 0x1a2   : > { %1863 = vst.msk [vmem:[%s2731_s17 + $0x58] sm:$0xf] %vm1840_vm3, %v1832_v47  ;;  %v1739_v51 = vmax.f32 %v1474_v48, %v1698_v45 }
 0x1a4   : > { %v1773_v52 = vadd.f32 %v2725_v46, %v1739_v51 }
 0x1a6   : > { %v1803_v54 = vmax.f32 %v1773_v52, 0.0 }
 0x1a7   : > { %v1436_v55 = vpop.f32.mrf.mxu2  ;;  %v1701_v56 = vpop.f32.mrf.mxu3 }
 0x1a8   : > { %v1833_v57 = vpack.c.bf16 %v1803_v54, %v1803_v54  ;;  %v1475_v58 = vmax.f32 %v1210_v53, %v1436_v55  ;;  %v938_v59 = vpop.f32.mrf.mxu0  ;;  %v1173_v60 = vpop.f32.mrf.mxu1 }
 0x1a9   : > { %v1211_v0 = vmax.f32 %v938_v59, %v1173_v60 }
 0x1aa   : > { %1864 = vst.msk [vmem:[%s2731_s17 + $0x5c] sm:$0xf] %vm1840_vm3, %v1833_v57  ;;  %v1740_v61 = vmax.f32 %v1475_v58, %v1701_v56 }
 0x1ac   : > { %v1774_v62 = vadd.f32 %v2725_v46, %v1740_v61 }
 0x1ae   : > { %v1804_v63 = vmax.f32 %v1774_v62, 0.0 }
 0x1af   : > { %v1438_v1 = vpop.f32.mrf.mxu2  ;;  %v1703_v2 = vpop.f32.mrf.mxu3 }
 0x1b0   : > { %v1834_v3 = vpack.c.bf16 %v1804_v63, %v1804_v63  ;;  %v1476_v4 = vmax.f32 %v1211_v0, %v1438_v1  ;;  %v941_v5 = vpop.f32.mrf.mxu0  ;;  %v1176_v6 = vpop.f32.mrf.mxu1 }
 0x1b1   : > { %v1212_v9 = vmax.f32 %v941_v5, %v1176_v6 }
 0x1b2   : > { %1865 = vst.msk [vmem:[%s2731_s17 + $0x60] sm:$0xf] %vm1840_vm3, %v1834_v3  ;;  %v1741_v7 = vmax.f32 %v1476_v4, %v1703_v2 }
 0x1b4   : > { %v1775_v8 = vadd.f32 %v2725_v46, %v1741_v7 }
 0x1b6   : > { %v1805_v10 = vmax.f32 %v1775_v8, 0.0 }
 0x1b7   : > { %v1441_v11 = vpop.f32.mrf.mxu2  ;;  %v1706_v12 = vpop.f32.mrf.mxu3 }
 0x1b8   : > { %v1835_v13 = vpack.c.bf16 %v1805_v10, %v1805_v10  ;;  %v1477_v14 = vmax.f32 %v1212_v9, %v1441_v11  ;;  %v943_v15 = vpop.f32.mrf.mxu0  ;;  %v1178_v16 = vpop.f32.mrf.mxu1 }
 0x1b9   : > { %v1213_v20 = vmax.f32 %v943_v15, %v1178_v16 }
 0x1ba   : > { %1866 = vst.msk [vmem:[%s2731_s17 + $0x64] sm:$0xf] %vm1840_vm3, %v1835_v13  ;;  %v1742_v17 = vmax.f32 %v1477_v14, %v1706_v12 }
 0x1bc   : > { %v1776_v18 = vadd.f32 %v2725_v46, %v1742_v17 }
 0x1be   : > { %v1806_v19 = vmax.f32 %v1776_v18, 0.0 }
 0x1bf   : > { %v1443_v21 = vpop.f32.mrf.mxu2  ;;  %v1708_v22 = vpop.f32.mrf.mxu3 }
 0x1c0   : > { %v1836_v23 = vpack.c.bf16 %v1806_v19, %v1806_v19  ;;  %v1478_v24 = vmax.f32 %v1213_v20, %v1443_v21  ;;  %v946_v25 = vpop.f32.mrf.mxu0  ;;  %v1181_v26 = vpop.f32.mrf.mxu1 }
 0x1c1   : > { %v1214_v29 = vmax.f32 %v946_v25, %v1181_v26 }
 0x1c2   : > { %1867 = vst.msk [vmem:[%s2731_s17 + $0x68] sm:$0xf] %vm1840_vm3, %v1836_v23  ;;  %v1743_v27 = vmax.f32 %v1478_v24, %v1708_v22 }
 0x1c4   : > { %v1777_v28 = vadd.f32 %v2725_v46, %v1743_v27 }
 0x1c6   : > { %v1807_v30 = vmax.f32 %v1777_v28, 0.0 }
 0x1c7   : > { %v1446_v31 = vpop.f32.mrf.mxu2  ;;  %v1711_v32 = vpop.f32.mrf.mxu3 }
 0x1c8   : > { %v1837_v33 = vpack.c.bf16 %v1807_v30, %v1807_v30  ;;  %v1479_v34 = vmax.f32 %v1214_v29, %v1446_v31  ;;  %v948_v36 = vpop.f32.mrf.mxu0  ;;  %v1183_v37 = vpop.f32.mrf.mxu1 }
 0x1c9   : > { %v1215_v40 = vmax.f32 %v948_v36, %v1183_v37 }
 0x1ca   : > { %1868 = vst.msk [vmem:[%s2731_s17 + $0x6c] sm:$0xf] %vm1840_vm3, %v1837_v33  ;;  %v1744_v35 = vmax.f32 %v1479_v34, %v1711_v32 }
 0x1cc   : > { %v1778_v38 = vadd.f32 %v2725_v46, %v1744_v35 }
 0x1ce   : > { %v1808_v39 = vmax.f32 %v1778_v38, 0.0 }
 0x1cf   : > { %v1448_v41 = vpop.f32.mrf.mxu2  ;;  %v1713_v44 = vpop.f32.mrf.mxu3 }
 0x1d0   : > { %v1838_v42 = vpack.c.bf16 %v1808_v39, %v1808_v39  ;;  %v1480_v43 = vmax.f32 %v1215_v40, %v1448_v41 }
 0x1d2   : > { %1869 = vst.msk [vmem:[%s2731_s17 + $0x70] sm:$0xf] %vm1840_vm3, %v1838_v42  ;;  %v1745_v45 = vmax.f32 %v1480_v43, %v1713_v44 }
 0x1d4   : > { %v1779_v47 = vadd.f32 %v2725_v46, %v1745_v45 }
 0x1d6   : > { %v1809_v48 = vmax.f32 %v1779_v47, 0.0 }
 0x1d8   : > { %v1839_v49 = vpack.c.bf16 %v1809_v48, %v1809_v48 }
 0x1da   : > { %1870 = vst.msk [vmem:[%s2731_s17 + $0x74] sm:$0xf] %vm1840_vm3, %v1839_v49 }
 0x1db PF: > { %p10_p9 = scmp.ge.s32.totalorder %s2493_s16, 4   ;;  %s2884_s12 = smov %s2449_s13 }
 0x1dc   : > { %s2885_s13 = smov %s2502_s19  ;;  %s2886_s14 = smov %s2493_s16 }
 0x1dd   :  { %12 = sbr.rel (!%p10_p9) target bundleno = 2 (0x2), region = 111 }

// kernel: cnn1_bn_forward.5
= control target key start
LH: loop header
LB: loop body
LE: loop exit
PB: predicated region body
PF: predicated region fallthrough
CT: control target
= control target key end

     0   :  { %s1562_s12 = smov 0   ;;  %s1564_s13 = smov 0   ;;  %s2040_s0 = inlined_call_operand.vmem [shape: bf16[4,96,288], index: 0, kind: input, shape index: {}]   ;;  %s2041_s1 = inlined_call_operand.vmem [shape: bf16[288,64], index: 1, kind: input, shape index: {}]   ;;  %s2042_s2 = inlined_call_operand.vmem [shape: f32[1,64], index: 2, kind: input, shape index: {}]   ;;  %s2043_s3 = inlined_call_operand.vmem [shape: bf16[96,64], index: 3, kind: output, shape index: {}]  }
   0x1   :  { %s1566_s14 = smov 0  }
   0x2 LB: > { %s1112_s15 = sadd.s32 4294967295, %s1540_s14   ;;  %s1579_s16 = sadd.s32 1, %s1540_s14   ;;  %s1540_s14 = sphi %s1566_s14, %s2046_s14   ;;  %s1536_s13 = sphi %s1564_s13, %s2045_s13   ;;  %s1532_s12 = sphi %s1562_s12, %s2044_s12  }
   0x3   : > { %s17_s17 = ssub.s32 %s1540_s14, %s1579_s16  ;;  %s20_s18 = sadd.s32 1, %s1536_s13 }
   0x4   : > { %p18_p0 = scmp.eq.s32.totalorder %s17_s17, 0  ;;  %p27_p1 = scmp.ne.s32.totalorder %s1536_s13, %s1532_s12 }
   0x5   : > { %p28_p2 = scmp.eq.s32.totalorder %s1540_s14, 0  ;;  %p1115_p4 = scmp.ge.s32.totalorder %s1540_s14, 2 }
   0x6   : > { %s1588_s19 = scalar_select %p18_p0, %s1536_s13, %s20_s18  }
   0x7   : > { %p29_p3 = por %p28_p2, %p27_p1  ;;  %127 = sbr.rel (%p1115_p4) target bundleno = 66 (0x42), region = 24 }
   0xc   : > { %130 = sbr.rel (!%p29_p3) target bundleno = 66 (0x42), region = 28  ;;  %s132_s20 = sand.u32 (%p29_p3), 1, %s1536_s13  }
   0xd   : > { %s1489_s21 = smul.u32 (%p29_p3), 288, %s132_s20 }
   0xe   : > { %s1492_s22 = smul.u32 (%p29_p3), 72, %s1540_s14 }
   0xf   : > { %s1601_s26 = scalar_lea.vmem (%p29_p3), [#allocation2], %s1489_s21 }
  0x10   : > { %s1596_s25 = scalar_lea.vmem (%p29_p3), %s2040_s0, %s1492_s22 }
  0x11   : > { %v153_v0 = vld [vmem:[%s1596_s25] sm:$0xff]  ;;  %v155_v1 = vld [vmem:[%s1596_s25 + $0xc] sm:$0xff]  ;;  %v157_v2 = vld [vmem:[%s1596_s25 + $0x18] sm:$0xff] }
  0x12   : > { %154 = vst [vmem:[%s1601_s26] sm:$0xff] %v153_v0  ;;  %v159_v3 = vld [vmem:[%s1596_s25 + $0x24] sm:$0xff]  ;;  %v161_v4 = vld [vmem:[%s1596_s25 + $0x30] sm:$0xff]  ;;  %v163_v5 = vld [vmem:[%s1596_s25 + $0x3c] sm:$0xff] }
  0x13   : > { %156 = vst [vmem:[%s1601_s26 + $0xc] sm:$0xff] %v155_v1  ;;  %v165_v6 = vld [vmem:[%s1596_s25 + $0x90] sm:$0xff]  ;;  %v167_v7 = vld [vmem:[%s1596_s25 + $0x9c] sm:$0xff]  ;;  %v169_v8 = vld [vmem:[%s1596_s25 + $0xa8] sm:$0xff] }
  0x14   : > { %158 = vst [vmem:[%s1601_s26 + $0x18] sm:$0xff] %v157_v2  ;;  %v171_v9 = vld [vmem:[%s1596_s25 + $0xb4] sm:$0xff]  ;;  %v173_v10 = vld [vmem:[%s1596_s25 + $0xc0] sm:$0xff]  ;;  %v175_v11 = vld [vmem:[%s1596_s25 + $0xcc] sm:$0xff] }
  0x15   : > { %160 = vst [vmem:[%s1601_s26 + $0x24] sm:$0xff] %v159_v3  ;;  %v177_v12 = vld [vmem:[%s1596_s25 + $0x120] sm:$0xff]  ;;  %v179_v13 = vld [vmem:[%s1596_s25 + $0x12c] sm:$0xff]  ;;  %v181_v14 = vld [vmem:[%s1596_s25 + $0x138] sm:$0xff] }
  0x16   : > { %162 = vst [vmem:[%s1601_s26 + $0x30] sm:$0xff] %v161_v4  ;;  %v183_v15 = vld [vmem:[%s1596_s25 + $0x144] sm:$0xff]  ;;  %v185_v16 = vld [vmem:[%s1596_s25 + $0x150] sm:$0xff]  ;;  %v187_v17 = vld [vmem:[%s1596_s25 + $0x15c] sm:$0xff] }
  0x17   : > { %164 = vst [vmem:[%s1601_s26 + $0x3c] sm:$0xff] %v163_v5  ;;  %v189_v18 = vld [vmem:[%s1596_s25 + $0x1b0] sm:$0xff]  ;;  %v191_v19 = vld [vmem:[%s1596_s25 + $0x1bc] sm:$0xff]  ;;  %v193_v20 = vld [vmem:[%s1596_s25 + $0x1c8] sm:$0xff] }
  0x18   : > { %166 = vst [vmem:[%s1601_s26 + $0x48] sm:$0xff] %v165_v6  ;;  %v195_v21 = vld [vmem:[%s1596_s25 + $0x1d4] sm:$0xff]  ;;  %v197_v22 = vld [vmem:[%s1596_s25 + $0x1e0] sm:$0xff]  ;;  %v199_v23 = vld [vmem:[%s1596_s25 + $0x1ec] sm:$0xff] }
  0x19   : > { %168 = vst [vmem:[%s1601_s26 + $0x54] sm:$0xff] %v167_v7  ;;  %v1117_v24 = vld [vmem:[%s1596_s25 + $0x8] sm:$0xf]  ;;  %v1119_v25 = vld [vmem:[%s1596_s25 + $0x14] sm:$0xf] }
  0x1a   : > { %170 = vst [vmem:[%s1601_s26 + $0x60] sm:$0xff] %v169_v8  ;;  %v1121_v26 = vld [vmem:[%s1596_s25 + $0x20] sm:$0xf]  ;;  %v1123_v27 = vld [vmem:[%s1596_s25 + $0x2c] sm:$0xf] }
  0x1b   : > { %172 = vst [vmem:[%s1601_s26 + $0x6c] sm:$0xff] %v171_v9  ;;  %v1125_v28 = vld [vmem:[%s1596_s25 + $0x38] sm:$0xf]  ;;  %v1127_v29 = vld [vmem:[%s1596_s25 + $0x44] sm:$0xf] }
  0x1c   : > { %174 = vst [vmem:[%s1601_s26 + $0x78] sm:$0xff] %v173_v10  ;;  %v1129_v30 = vld [vmem:[%s1596_s25 + $0x98] sm:$0xf]  ;;  %v1131_v31 = vld [vmem:[%s1596_s25 + $0xa4] sm:$0xf] }
  0x1d   : > { %176 = vst [vmem:[%s1601_s26 + $0x84] sm:$0xff] %v175_v11  ;;  %v1133_v32 = vld [vmem:[%s1596_s25 + $0xb0] sm:$0xf]  ;;  %v1135_v33 = vld [vmem:[%s1596_s25 + $0xbc] sm:$0xf] }
  0x1e   : > { %178 = vst [vmem:[%s1601_s26 + $0x90] sm:$0xff] %v177_v12  ;;  %v1137_v34 = vld [vmem:[%s1596_s25 + $0xc8] sm:$0xf]  ;;  %v1139_v35 = vld [vmem:[%s1596_s25 + $0xd4] sm:$0xf] }
  0x1f   : > { %180 = vst [vmem:[%s1601_s26 + $0x9c] sm:$0xff] %v179_v13  ;;  %v1141_v36 = vld [vmem:[%s1596_s25 + $0x128] sm:$0xf]  ;;  %v1143_v37 = vld [vmem:[%s1596_s25 + $0x134] sm:$0xf] }
  0x20   : > { %182 = vst [vmem:[%s1601_s26 + $0xa8] sm:$0xff] %v181_v14  ;;  %v1145_v38 = vld [vmem:[%s1596_s25 + $0x140] sm:$0xf]  ;;  %v1147_v39 = vld [vmem:[%s1596_s25 + $0x14c] sm:$0xf] }
  0x21   : > { %184 = vst [vmem:[%s1601_s26 + $0xb4] sm:$0xff] %v183_v15  ;;  %v1149_v40 = vld [vmem:[%s1596_s25 + $0x158] sm:$0xf]  ;;  %v1151_v41 = vld [vmem:[%s1596_s25 + $0x164] sm:$0xf] }
  0x22   : > { %186 = vst [vmem:[%s1601_s26 + $0xc0] sm:$0xff] %v185_v16  ;;  %v1153_v42 = vld [vmem:[%s1596_s25 + $0x1b8] sm:$0xf]  ;;  %v1155_v43 = vld [vmem:[%s1596_s25 + $0x1c4] sm:$0xf] }
  0x23   : > { %188 = vst [vmem:[%s1601_s26 + $0xcc] sm:$0xff] %v187_v17  ;;  %v1157_v44 = vld [vmem:[%s1596_s25 + $0x1d0] sm:$0xf]  ;;  %v1159_v45 = vld [vmem:[%s1596_s25 + $0x1dc] sm:$0xf] }
  0x24   : > { %190 = vst [vmem:[%s1601_s26 + $0xd8] sm:$0xff] %v189_v18  ;;  %v1161_v46 = vld [vmem:[%s1596_s25 + $0x1e8] sm:$0xf]  ;;  %v1163_v47 = vld [vmem:[%s1596_s25 + $0x1f4] sm:$0xf] }
  0x25   : > { %192 = vst [vmem:[%s1601_s26 + $0xe4] sm:$0xff] %v191_v19 }
  0x26   : > { %194 = vst [vmem:[%s1601_s26 + $0xf0] sm:$0xff] %v193_v20 }
  0x27   : > { %196 = vst [vmem:[%s1601_s26 + $0xfc] sm:$0xff] %v195_v21 }
  0x28   : > { %198 = vst [vmem:[%s1601_s26 + $0x108] sm:$0xff] %v197_v22 }
  0x29   : > { %200 = vst [vmem:[%s1601_s26 + $0x114] sm:$0xff] %v199_v23 }
  0x2a   : > { %1118 = vst [vmem:[%s1601_s26 + $0x8] sm:$0xf] %v1117_v24 }
  0x2b   : > { %1120 = vst [vmem:[%s1601_s26 + $0x14] sm:$0xf] %v1119_v25 }
  0x2c   : > { %1122 = vst [vmem:[%s1601_s26 + $0x20] sm:$0xf] %v1121_v26 }
  0x2d   : > { %1124 = vst [vmem:[%s1601_s26 + $0x2c] sm:$0xf] %v1123_v27 }
  0x2e   : > { %1126 = vst [vmem:[%s1601_s26 + $0x38] sm:$0xf] %v1125_v28 }
  0x2f   : > { %1128 = vst [vmem:[%s1601_s26 + $0x44] sm:$0xf] %v1127_v29 }
  0x30   : > { %1130 = vst [vmem:[%s1601_s26 + $0x50] sm:$0xf] %v1129_v30 }
  0x31   : > { %1132 = vst [vmem:[%s1601_s26 + $0x5c] sm:$0xf] %v1131_v31 }
  0x32   : > { %1134 = vst [vmem:[%s1601_s26 + $0x68] sm:$0xf] %v1133_v32 }
  0x33   : > { %1136 = vst [vmem:[%s1601_s26 + $0x74] sm:$0xf] %v1135_v33 }
  0x34   : > { %1138 = vst [vmem:[%s1601_s26 + $0x80] sm:$0xf] %v1137_v34 }
  0x35   : > { %1140 = vst [vmem:[%s1601_s26 + $0x8c] sm:$0xf] %v1139_v35 }
  0x36   : > { %1142 = vst [vmem:[%s1601_s26 + $0x98] sm:$0xf] %v1141_v36 }
  0x37   : > { %1144 = vst [vmem:[%s1601_s26 + $0xa4] sm:$0xf] %v1143_v37 }
  0x38   : > { %1146 = vst [vmem:[%s1601_s26 + $0xb0] sm:$0xf] %v1145_v38 }
  0x39   : > { %1148 = vst [vmem:[%s1601_s26 + $0xbc] sm:$0xf] %v1147_v39 }
  0x3a   : > { %1150 = vst [vmem:[%s1601_s26 + $0xc8] sm:$0xf] %v1149_v40 }
  0x3b   : > { %1152 = vst [vmem:[%s1601_s26 + $0xd4] sm:$0xf] %v1151_v41 }
  0x3c   : > { %1154 = vst [vmem:[%s1601_s26 + $0xe0] sm:$0xf] %v1153_v42 }
  0x3d   : > { %1156 = vst [vmem:[%s1601_s26 + $0xec] sm:$0xf] %v1155_v43 }
  0x3e   : > { %1158 = vst [vmem:[%s1601_s26 + $0xf8] sm:$0xf] %v1157_v44 }
  0x3f   : > { %1160 = vst [vmem:[%s1601_s26 + $0x104] sm:$0xf] %v1159_v45 }
  0x40   : > { %1162 = vst [vmem:[%s1601_s26 + $0x110] sm:$0xf] %v1161_v46 }
  0x41   : > { %1164 = vst [vmem:[%s1601_s26 + $0x11c] sm:$0xf] %v1163_v47 }
  0x42 PF: > { %p1165_p5 = scmp.ge.s32.totalorder %s1540_s14, 1  ;;  %p261_p6 = scmp.lt.s32.totalorder %s1540_s14, 3 }
  0x44   : > { %p262_p7 = pnand %p1165_p5, %p261_p6 }
  0x45   : > { %s268_s6 = sand.u32 (!%p262_p7), 1, %s1532_s12  }
  0x46   : > { %265 = sbr.rel (%p262_p7) target bundleno = 389 (0x185), region = 54 }
  0x47   : > { %s1491_s7 = smul.u32 (!%p262_p7), 288, %s268_s6 }
  0x49   : > { %s1733_s18 = scalar_lea.vmem (!%p262_p7), [#allocation2], %s1491_s7 }
  0x4b   : > { %v1701_v48 = vld [vmem:[%s2041_s1 + $0x38] sm:$0xff]  ;;  %v1711_v50 = vld [vmem:[%s2041_s1 + $0x88] sm:$0xff]  ;;  %v1719_v51 = vld [vmem:[%s2041_s1 + $0x30] sm:$0xff]  ;;  %vm500_vm0 = vcmask 261120   ;;  %vm1039_vm1 = vcmask 519168  }
  0x4c   : > { %v1706_v49 = vld [vmem:[%s2041_s1 + $0x78] sm:$0xff]  ;;  %510 = vmatpush.bf16.msra.mxu0 %v1701_v48  ;;  %v1724_v52 = vld [vmem:[%s2041_s1 + $0x70] sm:$0xff]  ;;  %564 = vmatpush.bf16.msra.mxu2 %v1711_v50  ;;  %v1731_v53 = vld [vmem:[%s2041_s1 + $0x80] sm:$0xff] }
  0x4d   : > { %534 = vmatpush.bf16.msra.mxu1 %v1706_v49  ;;  %649 = vmatpush.bf16.msra.mxu3 %v1701_v48  ;;  %v1177_v54 = vld [vmem:[%s1733_s18 + $0x8] sm:$0xf]  ;;  %v1453_v55 = vld [vmem:[%s1733_s18 + $0x10] sm:$0xf0]  ;;  %v1757_v59 = vld [vmem:[%s2041_s1 + $0x20] sm:$0xff] }
  0x4e   : > { %v1178_v56 = vor.u32 %v1453_v55, %v1177_v54  ;;  %v1742_v57 = vld [vmem:[%s2041_s1 + $0x28] sm:$0xff]  ;;  %v1764_v60 = vld [vmem:[%s2041_s1 + $0x60] sm:$0xff]  ;;  %v1771_v61 = vld [vmem:[%s2041_s1 + $0x18] sm:$0xff] }
  0x4f   : > { %v1749_v58 = vld [vmem:[%s2041_s1 + $0x68] sm:$0xff]  ;;  %v1778_v62 = vld [vmem:[%s2041_s1 + $0x58] sm:$0xff]  ;;  %v1785_v63 = vld [vmem:[%s2041_s1 + $0x10] sm:$0xff] }
  0x50   : > { %511 = vmatpush.bf16.msra.mxu0 %v1719_v51  ;;  %565 = vmatpush.bf16.msra.mxu2 %v1731_v53  ;;  %v1792_v0 = vld [vmem:[%s2041_s1 + $0x50] sm:$0xff]  ;;  %v1189_v1 = vld [vmem:[%s1733_s18 + $0x20] sm:$0xf]  ;;  %v1456_v2 = vld [vmem:[%s1733_s18 + $0x28] sm:$0xf0] }
  0x51   : > { %535 = vmatpush.bf16.msra.mxu1 %v1724_v52  ;;  %650 = vmatpush.bf16.msra.mxu3 %v1719_v51  ;;  %v1190_v3 = vor.u32 %v1456_v2, %v1189_v1  ;;  %v1801_v4 = vld [vmem:[%s2041_s1 + $0x8] sm:$0xff]  ;;  %v1814_v6 = vld [vmem:[%s2041_s1] sm:$0xff]  ;;  %v1171_v11 = vld [vmem:[%s1733_s18 + $0xc] sm:$0xf0] }
  0x52   : > { %v1808_v5 = vld [vmem:[%s2041_s1 + $0x48] sm:$0xff]  ;;  %v1819_v7 = vld [vmem:[%s2041_s1 + $0x40] sm:$0xff]  ;;  %v1461_v13 = vld [vmem:[%s1733_s18 + $0x50] sm:$0xf0] }
  0x53   : > { %1275 = vmatmul.msk.bf16.vlgmr.msra.gmra.mxu2 %vm500_vm0, %v1178_v56  ;;  %v1169_v8 = vld [vmem:[%s1733_s18] sm:$0xf]  ;;  %v1452_v9 = vld [vmem:[%s1733_s18 + $0x8] sm:$0xf0]  ;;  %v1451_v10 = vld [vmem:[%s1733_s18 + $0x4] sm:$0xf] }
  0x54   : > { %673 = vmatpush.bf16.msrb.mxu2 %v1706_v49  ;;  %512 = vmatpush.bf16.msra.mxu0 %v1742_v57  ;;  %v1292_v12 = vld [vmem:[%s1733_s18 + $0x48] sm:$0xf]  ;;  %v1170_v14 = vor.u32 %v1452_v9, %v1169_v8  ;;  %v1174_v15 = vor.u32 %v1451_v10, %v1171_v11  ;;  %v1201_v17 = vld [vmem:[%s1733_s18 + $0x38] sm:$0xf]  ;;  %v1459_v18 = vld [vmem:[%s1733_s18 + $0x40] sm:$0xf0] }
  0x55   : > { %536 = vmatpush.bf16.msra.mxu1 %v1749_v58  ;;  %651 = vmatpush.bf16.msra.mxu3 %v1742_v57  ;;  %v1293_v16 = vor.u32 %v1461_v13, %v1292_v12  ;;  %v1202_v19 = vor.u32 %v1459_v18, %v1201_v17  ;;  %v1181_v20 = vld [vmem:[%s1733_s18 + $0x18] sm:$0xf]  ;;  %v1455_v21 = vld [vmem:[%s1733_s18 + $0x20] sm:$0xf0]  ;;  %v1454_v22 = vld [vmem:[%s1733_s18 + $0x1c] sm:$0xf] }
  0x56   : > { %v1183_v23 = vld [vmem:[%s1733_s18 + $0x24] sm:$0xf0]  ;;  %v1304_v24 = vld [vmem:[%s1733_s18 + $0x60] sm:$0xf]  ;;  %v1464_v25 = vld [vmem:[%s1733_s18 + $0x68] sm:$0xf0]  ;;  %v1182_v26 = vor.u32 %v1455_v21, %v1181_v20 }
  0x57   : > { %v1186_v27 = vor.u32 %v1454_v22, %v1183_v23  ;;  %v1305_v28 = vor.u32 %v1464_v25, %v1304_v24  ;;  %v1460_v29 = vld [vmem:[%s1733_s18 + $0x4c] sm:$0xf]  ;;  %v1294_v30 = vld [vmem:[%s1733_s18 + $0x54] sm:$0xf0]  ;;  %v1193_v32 = vld [vmem:[%s1733_s18 + $0x30] sm:$0xf] }
  0x58   : > { %674 = vmatpush.bf16.msrb.mxu2 %v1724_v52  ;;  %513 = vmatpush.bf16.msra.mxu0 %v1757_v59  ;;  %v1297_v31 = vor.u32 %v1460_v29, %v1294_v30  ;;  %v1458_v33 = vld [vmem:[%s1733_s18 + $0x38] sm:$0xf0]  ;;  %v1457_v34 = vld [vmem:[%s1733_s18 + $0x34] sm:$0xf]  ;;  %v1195_v35 = vld [vmem:[%s1733_s18 + $0x3c] sm:$0xf0] }
  0x59   : > { %537 = vmatpush.bf16.msra.mxu1 %v1764_v60  ;;  %652 = vmatpush.bf16.msra.mxu3 %v1757_v59  ;;  %v1316_v36 = vld [vmem:[%s1733_s18 + $0x78] sm:$0xf]  ;;  %v1467_v37 = vld [vmem:[%s1733_s18 + $0x80] sm:$0xf0]  ;;  %v1194_v38 = vor.u32 %v1458_v33, %v1193_v32  ;;  %v1198_v39 = vor.u32 %v1457_v34, %v1195_v35  ;;  %v1306_v42 = vld [vmem:[%s1733_s18 + $0x6c] sm:$0xf0] }
  0x5a   : > { %v1317_v40 = vor.u32 %v1467_v37, %v1316_v36  ;;  %v1463_v41 = vld [vmem:[%s1733_s18 + $0x64] sm:$0xf]  ;;  %v1300_v44 = vld [vmem:[%s1733_s18 + $0x50] sm:$0xf]  ;;  %v1462_v45 = vld [vmem:[%s1733_s18 + $0x58] sm:$0xf0] }
  0x5b   : > { %v1309_v43 = vor.u32 %v1463_v41, %v1306_v42  ;;  %v1343_v46 = vld [vmem:[%s1733_s18 + $0x90] sm:$0xf]  ;;  %v1470_v47 = vld [vmem:[%s1733_s18 + $0x98] sm:$0xf0]  ;;  %v1318_v54 = vld [vmem:[%s1733_s18 + $0x84] sm:$0xf0] }
  0x5c   : > { %675 = vmatpush.bf16.msrb.mxu2 %v1749_v58  ;;  %514 = vmatpush.bf16.msra.mxu0 %v1771_v61  ;;  %v1312_v56 = vld [vmem:[%s1733_s18 + $0x68] sm:$0xf]  ;;  %v1324_v1 = vld [vmem:[%s1733_s18 + $0x80] sm:$0xf]  ;;  %v1468_v2 = vld [vmem:[%s1733_s18 + $0x88] sm:$0xf0] }
  0x5d   : > { %538 = vmatpush.bf16.msra.mxu1 %v1778_v62  ;;  %653 = vmatpush.bf16.msra.mxu3 %v1771_v61  ;;  %v1475_v8 = vld [vmem:[%s1733_s18 + $0xc4] sm:$0xf]  ;;  %v1369_v9 = vld [vmem:[%s1733_s18 + $0xcc] sm:$0xf0]  ;;  %v1351_v13 = vld [vmem:[%s1733_s18 + $0x98] sm:$0xf] }
  0x5e   : > { %v1372_v12 = vor.u32 %v1475_v8, %v1369_v9  ;;  %v1406_v17 = vld [vmem:[%s1733_s18 + $0xf0] sm:$0xf]  ;;  %v1482_v18 = vld [vmem:[%s1733_s18 + $0xf8] sm:$0xf0]  ;;  %v1402_v20 = vld [vmem:[%s1733_s18 + $0xe0] sm:$0xf] }
  0x5f   : > { %v1480_v21 = vld [vmem:[%s1733_s18 + $0xe8] sm:$0xf0]  ;;  %v1407_v22 = vor.u32 %v1482_v18, %v1406_v17  ;;  %v1363_v25 = vld [vmem:[%s1733_s18 + $0xb0] sm:$0xf]  ;;  %v1418_v29 = vld [vmem:[%s1733_s18 + $0x108] sm:$0xf] }
  0x60   : > { %676 = vmatpush.bf16.msrb.mxu2 %v1764_v60  ;;  %515 = vmatpush.bf16.msra.mxu0 %v1785_v63  ;;  %v1403_v24 = vor.u32 %v1480_v21, %v1402_v20  ;;  %v1485_v30 = vld [vmem:[%s1733_s18 + $0x110] sm:$0xf0]  ;;  %v1414_v32 = vld [vmem:[%s1733_s18 + $0xf8] sm:$0xf]  ;;  %v1483_v33 = vld [vmem:[%s1733_s18 + $0x100] sm:$0xf0] }
  0x61   : > { %539 = vmatpush.bf16.msra.mxu1 %v1792_v0  ;;  %654 = vmatpush.bf16.msra.mxu3 %v1785_v63  ;;  %v1419_v35 = vor.u32 %v1485_v30, %v1418_v29  ;;  %v1415_v37 = vor.u32 %v1483_v33, %v1414_v32  ;;  %v1484_v42 = vld [vmem:[%s1733_s18 + $0x10c] sm:$0xf] }
  0x63   : > { %1276 = vmatmul.msk.bf16.gmra.mxu2 %vm500_vm0, %v1190_v3  ;;  %v1325_v3 = vor.u32 %v1468_v2, %v1324_v1 }
  0x64   : > { %677 = vmatpush.bf16.msrb.mxu2 %v1778_v62  ;;  %516 = vmatpush.bf16.msra.mxu0 %v1801_v4 }
  0x65   : > { %540 = vmatpush.bf16.msra.mxu1 %v1808_v5  ;;  %655 = vmatpush.bf16.msra.mxu3 %v1801_v4 }
  0x68   : > { %678 = vmatpush.bf16.msrb.mxu2 %v1792_v0  ;;  %517 = vmatpush.bf16.msra.mxu0 %v1814_v6 }
  0x69   : > { %541 = vmatpush.bf16.msra.mxu1 %v1819_v7  ;;  %656 = vmatpush.bf16.msra.mxu3 %v1814_v6 }
  0x6b   : > { %518 = vmatmul.bf16.vlgmr.msra.gmra.mxu0 %v1170_v14  ;;  %v1471_v14 = vld [vmem:[%s1733_s18 + $0xa0] sm:$0xf0] }
  0x6c   : > { %679 = vmatpush.bf16.msrb.mxu2 %v1808_v5  ;;  %542 = vmatmul.bf16.vlgmr.msra.gmra.mxu1 %v1174_v15  ;;  %v1352_v15 = vor.u32 %v1471_v14, %v1351_v13 }
  0x6d   : > { %818 = vmatpush.bf16.msrb.mxu3 %v1706_v49  ;;  %794 = vmatpush.bf16.msrb.mxu1 %v1701_v48 }
  0x6e   : > { %657 = vmatmul.bf16.vlgmr.msra.gmra.mxu3 %v1293_v16  ;;  %703 = vmatpush.bf16.msrb.mxu0 %v1711_v50  ;;  %v1478_v16 = vld [vmem:[%s1733_s18 + $0xdc] sm:$0xf] }
  0x70   : > { %680 = vmatpush.bf16.msrb.mxu2 %v1819_v7 }
  0x71   : > { %819 = vmatpush.bf16.msrb.mxu3 %v1724_v52  ;;  %795 = vmatpush.bf16.msrb.mxu1 %v1719_v51 }
  0x72   : > { %704 = vmatpush.bf16.msrb.mxu0 %v1731_v53 }
  0x73   : > { %1277 = vmatmul.msk.bf16.gmra.mxu2 %vm500_vm0, %v1202_v19  ;;  %v1396_v19 = vld [vmem:[%s1733_s18 + $0xe4] sm:$0xf0] }
  0x74   : > { %1487 = vmatpush.bf16.msra.mxu2 %v1711_v50  ;;  %v1399_v23 = vor.u32 %v1478_v16, %v1396_v19 }
  0x75   : > { %820 = vmatpush.bf16.msrb.mxu3 %v1749_v58  ;;  %796 = vmatpush.bf16.msrb.mxu1 %v1742_v57 }
  0x76   : > { %939 = vmatpush.bf16.msra.mxu0 %v1701_v48  ;;  %v1469_v48 = vld [vmem:[%s1733_s18 + $0x94] sm:$0xf] }
  0x78   : > { %1488 = vmatpush.bf16.msra.mxu2 %v1731_v53 }
  0x79   : > { %821 = vmatpush.bf16.msrb.mxu3 %v1764_v60  ;;  %797 = vmatpush.bf16.msrb.mxu1 %v1757_v59 }
  0x7a   : > { %940 = vmatpush.bf16.msra.mxu0 %v1719_v51  ;;  %v1344_v51 = vor.u32 %v1470_v47, %v1343_v46 }
  0x7b   : > { %523 = vmatmul.bf16.gmra.mxu0 %v1182_v26  ;;  %v1474_v26 = vld [vmem:[%s1733_s18 + $0xb8] sm:$0xf0] }
  0x7c   : > { %547 = vmatmul.bf16.gmra.mxu1 %v1186_v27  ;;  %v1364_v27 = vor.u32 %v1474_v26, %v1363_v25 }
  0x7d   : > { %822 = vmatpush.bf16.msrb.mxu3 %v1778_v62  ;;  %798 = vmatpush.bf16.msrb.mxu1 %v1771_v61 }
  0x7e   : > { %662 = vmatmul.bf16.gmra.mxu3 %v1305_v28  ;;  %941 = vmatpush.bf16.msra.mxu0 %v1742_v57  ;;  %v1465_v57 = vld [vmem:[%s1733_s18 + $0x70] sm:$0xf0] }
  0x7f   : > { %v1481_v28 = vld [vmem:[%s1733_s18 + $0xf4] sm:$0xf] }
  0x81   : > { %823 = vmatpush.bf16.msrb.mxu3 %v1792_v0  ;;  %799 = vmatpush.bf16.msrb.mxu1 %v1785_v63 }
  0x82   : > { %942 = vmatpush.bf16.msra.mxu0 %v1757_v59  ;;  %v1473_v59 = vld [vmem:[%s1733_s18 + $0xb0] sm:$0xf0] }
  0x83   : > { %681 = vmatmul.bf16.vlgmr.msrb.gmra.mxu2 %v1297_v31  ;;  %v1408_v31 = vld [vmem:[%s1733_s18 + $0xfc] sm:$0xf0] }
  0x84   : > { %848 = vmatpush.bf16.msrb.mxu2 %v1711_v50  ;;  %v1411_v36 = vor.u32 %v1481_v28, %v1408_v31 }
  0x85   : > { %824 = vmatpush.bf16.msrb.mxu3 %v1808_v5  ;;  %800 = vmatpush.bf16.msrb.mxu1 %v1801_v4 }
  0x86   : > { %943 = vmatpush.bf16.msra.mxu0 %v1771_v61  ;;  %v1357_v61 = vld [vmem:[%s1733_s18 + $0xb4] sm:$0xf0] }
  0x88   : > { %849 = vmatpush.bf16.msrb.mxu2 %v1731_v53 }
  0x89   : > { %825 = vmatpush.bf16.msrb.mxu3 %v1819_v7  ;;  %801 = vmatpush.bf16.msrb.mxu1 %v1814_v6 }
  0x8a   : > { %944 = vmatpush.bf16.msra.mxu0 %v1785_v63 }
  0x8b   : > { %528 = vmatmul.bf16.gmra.mxu0 %v1194_v38  ;;  %v1375_v38 = vld [vmem:[%s1733_s18 + $0xc8] sm:$0xf] }
  0x8c   : > { %552 = vmatmul.bf16.gmra.mxu1 %v1198_v39  ;;  %v1477_v39 = vld [vmem:[%s1733_s18 + $0xd0] sm:$0xf0] }
  0x8d   : > { %993 = vmatpush.bf16.msra.mxu3 %v1711_v50  ;;  %963 = vmatpush.bf16.msra.mxu1 %v1706_v49  ;;  %v1345_v49 = vld [vmem:[%s1733_s18 + $0x9c] sm:$0xf0]  ;;  %v1301_v50 = vor.u32 %v1462_v45, %v1300_v44  ;;  %v1376_v41 = vor.u32 %v1477_v39, %v1375_v38  ;;  %v1426_v44 = vld [vmem:[%s1733_s18 + $0x110] sm:$0xf]  ;;  %v1486_v45 = vld [vmem:[%s1733_s18 + $0x118] sm:$0xf0] }
  0x8e   : > { %667 = vmatmul.bf16.gmra.mxu3 %v1317_v40  ;;  %945 = vmatpush.bf16.msra.mxu0 %v1801_v4  ;;  %v1367_v4 = vld [vmem:[%s1733_s18 + $0xc0] sm:$0xf] }
  0x91   : > { %964 = vmatpush.bf16.msra.mxu1 %v1724_v52  ;;  %994 = vmatpush.bf16.msra.mxu3 %v1731_v53  ;;  %v1348_v52 = vor.u32 %v1469_v48, %v1345_v49  ;;  %v1466_v53 = vld [vmem:[%s1733_s18 + $0x7c] sm:$0xf]  ;;  %v1427_v49 = vor.u32 %v1486_v45, %v1426_v44 }
  0x92   : > { %946 = vmatpush.bf16.msra.mxu0 %v1814_v6  ;;  %v1321_v55 = vor.u32 %v1466_v53, %v1318_v54  ;;  %v1479_v6 = vld [vmem:[%s1733_s18 + $0xe0] sm:$0xf0] }
  0x93   : > { %686 = vmatmul.bf16.gmra.mxu2 %v1309_v43  ;;  %v1420_v43 = vld [vmem:[%s1733_s18 + $0x114] sm:$0xf0] }
  0x94   : > { %v1423_v48 = vor.u32 %v1484_v42, %v1420_v43 }
  0x95   : > { %965 = vmatpush.bf16.msra.mxu1 %v1749_v58  ;;  %v1355_v58 = vld [vmem:[%s1733_s18 + $0xa8] sm:$0xf] }
  0x96   : > { %v1356_v63 = vor.u32 %v1473_v59, %v1355_v58 }
  0x99   : > { %966 = vmatpush.bf16.msra.mxu1 %v1764_v60  ;;  %v1472_v60 = vld [vmem:[%s1733_s18 + $0xac] sm:$0xf] }
  0x9b   : > { %1326 = vmatmul.msk.bf16.vlgmr.msrb.gmra.mxu0 %vm500_vm0, %v1301_v50 }
  0x9c   : > { %802 = vmatmul.bf16.vlgmr.msrb.gmra.mxu1 %v1344_v51 }
  0x9d   : > { %967 = vmatpush.bf16.msra.mxu1 %v1778_v62  ;;  %v1313_v62 = vor.u32 %v1465_v57, %v1312_v56 }
  0x9e   : > { %826 = vmatmul.bf16.vlgmr.msrb.gmra.mxu3 %v1348_v52 }
  0xa1   : > { %968 = vmatpush.bf16.msra.mxu1 %v1792_v0  ;;  %v1360_v0 = vor.u32 %v1472_v60, %v1357_v61 }
  0xa3   : > { %691 = vmatmul.bf16.gmra.mxu2 %v1321_v55 }
  0xa5   : > { %969 = vmatpush.bf16.msra.mxu1 %v1808_v5  ;;  %v1394_v5 = vld [vmem:[%s1733_s18 + $0xd8] sm:$0xf] }
  0xa6   : > { %v1395_v10 = vor.u32 %v1479_v6, %v1394_v5 }
  0xa9   : > { %970 = vmatpush.bf16.msra.mxu1 %v1819_v7  ;;  %v1476_v7 = vld [vmem:[%s1733_s18 + $0xc8] sm:$0xf0]  ;;  %s292_s18 = smul.u32 6, %s1112_s15 }
  0xaa   : > { %v1368_v11 = vor.u32 %v1476_v7, %v1367_v4 }
  0xab   : > { %1327 = vmatmul.msk.bf16.gmra.mxu0 %vm500_vm0, %v1313_v62  ;;  %p293_p8 = scmp.lt.s32.totalorder %s292_s18, 11 }
  0xac   : > { %807 = vmatmul.bf16.gmra.mxu1 %v1356_v63 }
  0xad   : > { %s2048_s18 = smov (!%p293_p8, %s292_s18), 11 }
  0xae   : > { %831 = vmatmul.bf16.gmra.mxu3 %v1360_v0  ;;  %s1166_s14 = sshll.u32 %s2048_s18, 2 }
  0xaf   : > { %s1998_s26 = scalar_lea.vmem %s2043_s3, %s1166_s14 }
  0xb3   : > { %1328 = vmatmul.msk.bf16.vlgmr.msra.gmra.mxu2 %vm500_vm0, %v1325_v3 }
  0xbb   : > { %947 = vmatmul.bf16.vlgmr.msra.gmra.mxu0 %v1395_v10 }
  0xbc   : > { %812 = vmatmul.bf16.gmra.mxu1 %v1368_v11 }
  0xbe   : > { %836 = vmatmul.bf16.gmra.mxu3 %v1372_v12 }
  0xc3   : > { %1377 = vmatmul.msk.bf16.vlgmr.msrb.gmra.mxu2 %vm500_vm0, %v1352_v15 }
  0xcb   : > { %952 = vmatmul.bf16.gmra.mxu0 %v1407_v22 }
  0xcc   : > { %971 = vmatmul.bf16.vlgmr.msra.gmra.mxu1 %v1399_v23 }
  0xce   : > { %1428 = vmatmul.msk.bf16.vlgmr.msra.gmra.mxu3 %vm500_vm0, %v1403_v24 }
  0xd3   : > { %1378 = vmatmul.msk.bf16.gmra.mxu2 %vm500_vm0, %v1364_v27 }
  0xd6   : > { %v567_v34 = vpop.f32.mrf.mxu2 }
  0xdb   : > { %957 = vmatmul.bf16.gmra.mxu0 %v1419_v35 }
  0xdc   : > { %976 = vmatmul.bf16.gmra.mxu1 %v1411_v36 }
  0xde   : > { %1429 = vmatmul.msk.bf16.gmra.mxu3 %vm500_vm0, %v1415_v37  ;;  %v569_v40 = vpop.f32.mrf.mxu2 }
  0xe3   : > { %1379 = vmatmul.msk.bf16.gmra.mxu2 %vm500_vm0, %v1376_v41 }
  0xe6   : > { %v572_v46 = vpop.f32.mrf.mxu2 }
  0xe8   : > { %v519_v47 = vpop.f32.mrf.mxu0 }
  0xe9   : > { %v543_v50 = vpop.f32.mrf.mxu1 }
  0xea   : > { %v544_v51 = vadd.f32 %v543_v50, %v519_v47 }
  0xec   : > { %v1948_v52 = vadd.f32 %v567_v34, %v544_v51  ;;  %981 = vmatmul.bf16.gmra.mxu1 %v1423_v48 }
  0xee   : > { %1430 = vmatmul.msk.bf16.gmra.mxu3 %vm500_vm0, %v1427_v49  ;;  %v574_v53 = vpop.f32.mrf.mxu2 }
  0xf0   : > { %v521_v55 = vpop.f32.mrf.mxu0 }
  0xf1   : > { %v658_v54 = vpop.f32.mrf.mxu3  ;;  %v545_v56 = vpop.f32.mrf.mxu1 }
  0xf2   : > { %v546_v57 = vadd.f32 %v545_v56, %v521_v55 }
  0xf4   : > { %v1951_v58 = vadd.f32 %v569_v40, %v546_v57 }
  0xf6   : > { %v577_v59 = vpop.f32.mrf.mxu2 }
  0xf8   : > { %v524_v61 = vpop.f32.mrf.mxu0 }
  0xf9   : > { %v660_v60 = vpop.f32.mrf.mxu3  ;;  %v548_v62 = vpop.f32.mrf.mxu1 }
  0xfa   : > { %v549_v63 = vadd.f32 %v548_v62, %v524_v61 }
  0xfc   : > { %v1953_v0 = vadd.f32 %v572_v46, %v549_v63 }
  0xfe   : > { %v579_v1 = vpop.f32.mrf.mxu2 }
 0x100   : > { %v526_v3 = vpop.f32.mrf.mxu0 }
 0x101   : > { %v663_v2 = vpop.f32.mrf.mxu3  ;;  %v550_v4 = vpop.f32.mrf.mxu1 }
 0x102   : > { %v551_v5 = vadd.f32 %v550_v4, %v526_v3 }
 0x104   : > { %v1955_v6 = vadd.f32 %v574_v53, %v551_v5 }
 0x106   : > { %v682_v8 = vpop.f32.mrf.mxu2 }
 0x107   : > { %v683_v19 = vadd.f32 %v682_v8, %v658_v54  ;;  %v1992_v8 = vld [vmem:[%s2042_s2] ss:$0 sm:$0xff] }
 0x108   : > { %v529_v9 = vpop.f32.mrf.mxu0 }
 0x109   : > { %v665_v7 = vpop.f32.mrf.mxu3  ;;  %v553_v10 = vpop.f32.mrf.mxu1 }
 0x10a   : > { %v554_v11 = vadd.f32 %v553_v10, %v529_v9 }
 0x10c   : > { %v1957_v12 = vadd.f32 %v577_v59, %v554_v11 }
 0x10e   : > { %v684_v14 = vpop.f32.mrf.mxu2 }
 0x10f   : > { %v685_v26 = vadd.f32 %v684_v14, %v660_v60 }
 0x110   : > { %v531_v15 = vpop.f32.mrf.mxu0 }
 0x111   : > { %v668_v13 = vpop.f32.mrf.mxu3  ;;  %v555_v16 = vpop.f32.mrf.mxu1 }
 0x112   : > { %v556_v17 = vadd.f32 %v555_v16, %v531_v15 }
 0x114   : > { %v1959_v18 = vadd.f32 %v579_v1, %v556_v17 }
 0x116   : > { %v687_v21 = vpop.f32.mrf.mxu2 }
 0x117   : > { %v688_v33 = vadd.f32 %v687_v21, %v663_v2 }
 0x118   : > { %v706_v22 = vpop.f32.mrf.mxu0 }
 0x119   : > { %v670_v20 = vpop.f32.mrf.mxu3  ;;  %v707_v23 = vadd.f32 %v706_v22, %v683_v19  ;;  %v803_v24 = vpop.f32.mrf.mxu1 }
 0x11b   : > { %v721_v25 = vmax.f32 %v1948_v52, %v707_v23 }
 0x11e   : > { %v689_v27 = vpop.f32.mrf.mxu2 }
 0x11f   : > { %v690_v40 = vadd.f32 %v689_v27, %v665_v7 }
 0x120   : > { %v708_v29 = vpop.f32.mrf.mxu0 }
 0x121   : > { %v827_v28 = vpop.f32.mrf.mxu3  ;;  %v709_v30 = vadd.f32 %v708_v29, %v685_v26  ;;  %v805_v31 = vpop.f32.mrf.mxu1 }
 0x122   : > { %v828_v63 = vadd.f32 %v827_v28, %v803_v24 }
 0x123   : > { %v722_v32 = vmax.f32 %v1951_v58, %v709_v30 }
 0x126   : > { %v692_v34 = vpop.f32.mrf.mxu2 }
 0x127   : > { %v693_v47 = vadd.f32 %v692_v34, %v668_v13 }
 0x128   : > { %v711_v36 = vpop.f32.mrf.mxu0 }
 0x129   : > { %v829_v35 = vpop.f32.mrf.mxu3  ;;  %v1963_v37 = vadd.f32 %v711_v36, %v688_v33  ;;  %v808_v38 = vpop.f32.mrf.mxu1 }
 0x12a   : > { %v830_v10 = vadd.f32 %v829_v35, %v805_v31 }
 0x12b   : > { %v723_v39 = vmax.f32 %v1953_v0, %v1963_v37 }
 0x12e   : > { %v694_v41 = vpop.f32.mrf.mxu2 }
 0x12f   : > { %v695_v53 = vadd.f32 %v694_v41, %v670_v20 }
 0x130   : > { %v713_v43 = vpop.f32.mrf.mxu0 }
 0x131   : > { %v832_v42 = vpop.f32.mrf.mxu3  ;;  %v1967_v44 = vadd.f32 %v713_v43, %v690_v40  ;;  %v810_v45 = vpop.f32.mrf.mxu1 }
 0x133   : > { %v724_v46 = vmax.f32 %v1955_v6, %v1967_v44 }
 0x136   : > { %v716_v48 = vpop.f32.mrf.mxu2 }
 0x137   : > { %v1971_v50 = vadd.f32 %v716_v48, %v693_v47 }
 0x138   : > { %v948_v59 = vpop.f32.mrf.mxu0 }
 0x139   : > { %v834_v49 = vpop.f32.mrf.mxu3  ;;  %v1973_v51 = vpop.f32.mrf.mxu1  ;;  %v725_v52 = vmax.f32 %v1957_v12, %v1971_v50 }
 0x13a   : > { %v835_v40 = vadd.f32 %v834_v49, %v810_v45 }
 0x13e   : > { %v718_v54 = vpop.f32.mrf.mxu2 }
 0x13f   : > { %v1979_v56 = vadd.f32 %v718_v54, %v695_v53 }
 0x140   : > { %v950_v2 = vpop.f32.mrf.mxu0 }
 0x141   : > { %v1977_v55 = vpop.f32.mrf.mxu3  ;;  %v1981_v57 = vpop.f32.mrf.mxu1  ;;  %v726_v58 = vmax.f32 %v1959_v18, %v1979_v56 }
 0x142   : > { %v838_v45 = vadd.f32 %v1977_v55, %v1973_v51 }
 0x146   : > { %v851_v61 = vpop.f32.mrf.mxu2 }
 0x147   : > { %v852_v0 = vadd.f32 %v851_v61, %v828_v63 }
 0x148   : > { %v953_v17 = vpop.f32.mrf.mxu0 }
 0x149   : > { %v1985_v60 = vpop.f32.mrf.mxu3  ;;  %v972_v62 = vpop.f32.mrf.mxu1  ;;  %v866_v5 = vmax.f32 %v721_v25, %v852_v0  ;;  %v833_v25 = vadd.f32 %v832_v42, %v808_v38 }
 0x14a   : > { %v973_v1 = vadd.f32 %v972_v62, %v948_v59  ;;  %v840_v51 = vadd.f32 %v1985_v60, %v1981_v57 }
 0x14e   : > { %v853_v3 = vpop.f32.mrf.mxu2 }
 0x14f   : > { %v854_v13 = vadd.f32 %v853_v3, %v830_v10 }
 0x150   : > { %v955_v37 = vpop.f32.mrf.mxu0 }
 0x151   : > { %v996_v4 = vpop.f32.mrf.mxu3  ;;  %v974_v9 = vpop.f32.mrf.mxu1  ;;  %v867_v21 = vmax.f32 %v722_v32, %v854_v13 }
 0x152   : > { %v997_v7 = vadd.f32 %v996_v4, %v973_v1  ;;  %v975_v16 = vadd.f32 %v974_v9, %v950_v2 }
 0x154   : > { %v1011_v11 = vmax.f32 %v866_v5, %v997_v7 }
 0x156   : > { %v1021_v14 = vadd.f32 %v1992_v8, %v1011_v11  ;;  %v856_v19 = vpop.f32.mrf.mxu2 }
 0x157   : > { %v857_v27 = vadd.f32 %v856_v19, %v833_v25 }
 0x158   : > { %v1027_v15 = vmax.f32 %v1021_v14, 0.0  ;;  %v958_v62 = vpop.f32.mrf.mxu0 }
 0x159   : > { %v998_v20 = vpop.f32.mrf.mxu3  ;;  %v977_v24 = vpop.f32.mrf.mxu1  ;;  %v868_v34 = vmax.f32 %v723_v39, %v857_v27 }
 0x15a   : > { %v1033_v22 = vpack.c.bf16 %v1027_v15, %v1027_v15  ;;  %v999_v23 = vadd.f32 %v998_v20, %v975_v16  ;;  %v978_v29 = vadd.f32 %v977_v24, %v953_v17 }
 0x15c   : > { %1040 = vst.msk [vmem:[%s1998_s26] sm:$0xf] %vm1039_vm1, %v1033_v22  ;;  %v1012_v26 = vmax.f32 %v867_v21, %v999_v23 }
 0x15e   : > { %v1022_v28 = vadd.f32 %v1992_v8, %v1012_v26  ;;  %v858_v31 = vpop.f32.mrf.mxu2 }
 0x15f   : > { %v859_v41 = vadd.f32 %v858_v31, %v835_v40 }
 0x160   : > { %v1028_v30 = vmax.f32 %v1022_v28, 0.0  ;;  %v960_v10 = vpop.f32.mrf.mxu0 }
 0x161   : > { %v1001_v33 = vpop.f32.mrf.mxu3  ;;  %v979_v32 = vpop.f32.mrf.mxu1  ;;  %v869_v39 = vmax.f32 %v724_v46, %v859_v41 }
 0x162   : > { %v1034_v35 = vpack.c.bf16 %v1028_v30, %v1028_v30  ;;  %v1002_v36 = vadd.f32 %v1001_v33, %v978_v29  ;;  %v980_v47 = vadd.f32 %v979_v32, %v955_v37 }
 0x164   : > { %1041 = vst.msk [vmem:[%s1998_s26 + $0x4] sm:$0xf] %vm1039_vm1, %v1034_v35  ;;  %v1013_v38 = vmax.f32 %v868_v34, %v1002_v36 }
 0x166   : > { %v1023_v42 = vadd.f32 %v1992_v8, %v1013_v38  ;;  %v861_v48 = vpop.f32.mrf.mxu2 }
 0x167   : > { %v862_v63 = vadd.f32 %v861_v48, %v838_v45 }
 0x168   : > { %v1029_v43 = vmax.f32 %v1023_v42, 0.0 }
 0x169   : > { %v1003_v53 = vpop.f32.mrf.mxu3  ;;  %v982_v61 = vpop.f32.mrf.mxu1  ;;  %v870_v6 = vmax.f32 %v725_v52, %v862_v63 }
 0x16a   : > { %v1035_v54 = vpack.c.bf16 %v1029_v43, %v1029_v43  ;;  %v1004_v59 = vadd.f32 %v1003_v53, %v980_v47  ;;  %v983_v1 = vadd.f32 %v982_v61, %v958_v62 }
 0x16c   : > { %1042 = vst.msk [vmem:[%s1998_s26 + $0x8] sm:$0xf] %vm1039_vm1, %v1035_v54  ;;  %v1014_v49 = vmax.f32 %v869_v39, %v1004_v59 }
 0x16e   : > { %v1024_v0 = vadd.f32 %v1992_v8, %v1014_v49  ;;  %v863_v4 = vpop.f32.mrf.mxu2 }
 0x16f   : > { %v864_v7 = vadd.f32 %v863_v4, %v840_v51 }
 0x170   : > { %v1030_v2 = vmax.f32 %v1024_v0, 0.0 }
 0x171   : > { %v1006_v3 = vpop.f32.mrf.mxu3  ;;  %v984_v5 = vpop.f32.mrf.mxu1  ;;  %v871_v50 = vmax.f32 %v726_v58, %v864_v7 }
 0x172   : > { %v1036_v44 = vpack.c.bf16 %v1030_v2, %v1030_v2  ;;  %v1007_v46 = vadd.f32 %v1006_v3, %v983_v1  ;;  %v985_v13 = vadd.f32 %v984_v5, %v960_v10 }
 0x174   : > { %1043 = vst.msk [vmem:[%s1998_s26 + $0xc] sm:$0xf] %vm1039_vm1, %v1036_v44  ;;  %v1015_v55 = vmax.f32 %v870_v6, %v1007_v46 }
 0x176   : > { %v1025_v9 = vadd.f32 %v1992_v8, %v1015_v55 }
 0x178   : > { %v1031_v11 = vmax.f32 %v1025_v9, 0.0 }
 0x179   : > { %v1008_v12 = vpop.f32.mrf.mxu3 }
 0x17a   : > { %v1037_v52 = vpack.c.bf16 %v1031_v11, %v1031_v11  ;;  %v1009_v14 = vadd.f32 %v1008_v12, %v985_v13 }
 0x17c   : > { %1044 = vst.msk [vmem:[%s1998_s26 + $0x10] sm:$0xf] %vm1039_vm1, %v1037_v52  ;;  %v1016_v57 = vmax.f32 %v871_v50, %v1009_v14 }
 0x17e   : > { %v1026_v60 = vadd.f32 %v1992_v8, %v1016_v57 }
 0x180   : > { %v1032_v15 = vmax.f32 %v1026_v60, 0.0 }
 0x182   : > { %v1038_v16 = vpack.c.bf16 %v1032_v15, %v1032_v15 }
 0x184   : > { %1045 = vst.msk [vmem:[%s1998_s26 + $0x14] sm:$0xf] %vm1039_vm1, %v1038_v16 }
 0x185 PF: > { %p10_p9 = scmp.ge.s32.totalorder %s1579_s16, 4   ;;  %s2044_s12 = smov %s1536_s13 }
 0x186   : > { %s2045_s13 = smov %s1588_s19  ;;  %s2046_s14 = smov %s1579_s16 }
 0x187   :  { %12 = sbr.rel (!%p10_p9) target bundleno = 2 (0x2), region = 102 }

// kernel: cnn1_bn_forward.6
= control target key start
LH: loop header
LB: loop body
LE: loop exit
PB: predicated region body
PF: predicated region fallthrough
CT: control target
= control target key end

     0   :  { %s897_s12 = smov 0   ;;  %s1041_s0 = inlined_call_operand.vmem [shape: bf16[1,32,576], index: 0, kind: input, shape index: {}]   ;;  %s1042_s1 = inlined_call_operand.vmem [shape: bf16[576,128], index: 1, kind: input, shape index: {}]   ;;  %s1043_s2 = inlined_call_operand.vmem [shape: f32[1,128], index: 2, kind: input, shape index: {}]   ;;  %s1044_s3 = inlined_call_operand.vmem [shape: bf16[32,128], index: 3, kind: output, shape index: {}]  }
   0x1 LB: > { %s637_s13 = sadd.s32 4294967295, %s875_s12   ;;  %p641_p0 = scmp.ge.s32.totalorder %s875_s12, 1  ;;  %s875_s12 = sphi %s897_s12, %s13_s12  }
   0x2   : > { %p139_p1 = scmp.lt.s32.totalorder %s875_s12, 3 }
   0x4   : > { %p140_p2 = pnand %p641_p0, %p139_p1 }
   0x5   : > { %s642_s11 = sshll.u32 (!%p140_p2), %s637_s13, 1 }
   0x6   : > { %143 = sbr.rel (%p140_p2) target bundleno = 200 (0xc8), region = 32  ;;  %p165_p3 = scmp.lt.s32.totalorder (!%p140_p2), %s642_s11, 3 }
   0xb   : > { %v820_v0 = vld [vmem:[%s1042_s1 + $0x38] sm:$0xff]  ;;  %v819_v4 = vld [vmem:[%s1042_s1 + $0x30] sm:$0xff]  ;;  %v818_v8 = vld [vmem:[%s1042_s1 + $0x28] sm:$0xff]  ;;  %s1046_s11 = smov (!%p165_p3, %s642_s11), 3  ;;  %vm501_vm0 = vcmask 523264  }
   0xc   : > { %v836_v1 = vld [vmem:[%s1042_s1 + $0xb8] sm:$0xff]  ;;  %505 = vmatpush.bf16.msra.mxu0 %v820_v0  ;;  %v835_v5 = vld [vmem:[%s1042_s1 + $0xb0] sm:$0xff]  ;;  %v834_v9 = vld [vmem:[%s1042_s1 + $0xa8] sm:$0xff]  ;;  %s859_s6 = smul.u32 20, %s1046_s11  ;;  %s645_s18 = sshll.u32 %s1046_s11, 2 }
   0xd   : > { %v844_v2 = vld [vmem:[%s1042_s1 + $0xf8] sm:$0xff]  ;;  %533 = vmatpush.bf16.msra.mxu2 %v836_v1  ;;  %v843_v6 = vld [vmem:[%s1042_s1 + $0xf0] sm:$0xff]  ;;  %v842_v10 = vld [vmem:[%s1042_s1 + $0xe8] sm:$0xff]  ;;  %s175_s21 = scalar_lea.vmem %s1044_s3, %s645_s18 }
   0xe   : > { %v828_v3 = vld [vmem:[%s1042_s1 + $0x78] sm:$0xff]  ;;  %547 = vmatpush.bf16.msra.mxu3 %v844_v2  ;;  %v827_v7 = vld [vmem:[%s1042_s1 + $0x70] sm:$0xff]  ;;  %v826_v11 = vld [vmem:[%s1042_s1 + $0x68] sm:$0xff]  ;;  %s989_s20 = scalar_lea.vmem %s1041_s0, %s859_s6 }
   0xf   : > { %519 = vmatpush.bf16.msra.mxu1 %v828_v3  ;;  %v817_v12 = vld [vmem:[%s1042_s1 + $0x20] sm:$0xff]  ;;  %v816_v16 = vld [vmem:[%s1042_s1 + $0x18] sm:$0xff]  ;;  %v815_v20 = vld [vmem:[%s1042_s1 + $0x10] sm:$0xff] }
  0x10   : > { %506 = vmatpush.bf16.msra.mxu0 %v819_v4  ;;  %v833_v13 = vld [vmem:[%s1042_s1 + $0xa0] sm:$0xff]  ;;  %v832_v17 = vld [vmem:[%s1042_s1 + $0x98] sm:$0xff]  ;;  %v831_v21 = vld [vmem:[%s1042_s1 + $0x90] sm:$0xff] }
  0x11   : > { %534 = vmatpush.bf16.msra.mxu2 %v835_v5  ;;  %v841_v14 = vld [vmem:[%s1042_s1 + $0xe0] sm:$0xff]  ;;  %v840_v18 = vld [vmem:[%s1042_s1 + $0xd8] sm:$0xff]  ;;  %v839_v22 = vld [vmem:[%s1042_s1 + $0xd0] sm:$0xff] }
  0x12   : > { %548 = vmatpush.bf16.msra.mxu3 %v843_v6  ;;  %v825_v15 = vld [vmem:[%s1042_s1 + $0x60] sm:$0xff]  ;;  %v824_v19 = vld [vmem:[%s1042_s1 + $0x58] sm:$0xff]  ;;  %v823_v23 = vld [vmem:[%s1042_s1 + $0x50] sm:$0xff] }
  0x13   : > { %520 = vmatpush.bf16.msra.mxu1 %v827_v7  ;;  %v814_v24 = vld [vmem:[%s1042_s1 + $0x8] sm:$0xff]  ;;  %v813_v28 = vld [vmem:[%s1042_s1] sm:$0xff]  ;;  %v851_v33 = vld [vmem:[%s989_s20 + $0x10] sm:$0xf0] }
  0x14   : > { %507 = vmatpush.bf16.msra.mxu0 %v818_v8  ;;  %v830_v25 = vld [vmem:[%s1042_s1 + $0x88] sm:$0xff]  ;;  %v829_v29 = vld [vmem:[%s1042_s1 + $0x80] sm:$0xff]  ;;  %v852_v35 = vld [vmem:[%s989_s20 + $0x18] sm:$0xf0] }
  0x15   : > { %535 = vmatpush.bf16.msra.mxu2 %v834_v9  ;;  %v838_v26 = vld [vmem:[%s1042_s1 + $0xc8] sm:$0xff]  ;;  %v837_v30 = vld [vmem:[%s1042_s1 + $0xc0] sm:$0xff]  ;;  %v650_v39 = vld [vmem:[%s989_s20 + $0x14] sm:$0xf0] }
  0x16   : > { %549 = vmatpush.bf16.msra.mxu3 %v842_v10  ;;  %v822_v27 = vld [vmem:[%s1042_s1 + $0x48] sm:$0xff]  ;;  %v821_v31 = vld [vmem:[%s1042_s1 + $0x40] sm:$0xff]  ;;  %v848_v40 = vld [vmem:[%s1042_s1 + $0x118] sm:$0xff] }
  0x17   : > { %521 = vmatpush.bf16.msra.mxu1 %v826_v11  ;;  %v648_v32 = vld [vmem:[%s989_s20] sm:$0xf]  ;;  %v656_v34 = vld [vmem:[%s989_s20 + $0x8] sm:$0xf]  ;;  %v850_v36 = vld [vmem:[%s989_s20 + $0xc] sm:$0xf] }
  0x18   : > { %508 = vmatpush.bf16.msra.mxu0 %v817_v12  ;;  %v658_v37 = vld [vmem:[%s989_s20 + $0x1c] sm:$0xf0]  ;;  %v849_v38 = vld [vmem:[%s989_s20 + $0x4] sm:$0xf]  ;;  %v649_v41 = vor.u32 %v851_v33, %v648_v32  ;;  %v657_v42 = vor.u32 %v852_v35, %v656_v34  ;;  %v847_v45 = vld [vmem:[%s1042_s1 + $0x110] sm:$0xff] }
  0x19   : > { %536 = vmatpush.bf16.msra.mxu2 %v833_v13  ;;  %v661_v43 = vor.u32 %v850_v36, %v658_v37  ;;  %v653_v44 = vor.u32 %v849_v38, %v650_v39  ;;  %v846_v46 = vld [vmem:[%s1042_s1 + $0x108] sm:$0xff]  ;;  %v845_v47 = vld [vmem:[%s1042_s1 + $0x100] sm:$0xff]  ;;  %v664_v48 = vld [vmem:[%s989_s20 + $0x10] sm:$0xf] }
  0x1a   : > { %550 = vmatpush.bf16.msra.mxu3 %v841_v14  ;;  %v853_v49 = vld [vmem:[%s989_s20 + $0x20] sm:$0xf0]  ;;  %v868_v54 = vld [vmem:[%s1043_s2] ss:$0 sm:$0xff] }
  0x1b   : > { %522 = vmatpush.bf16.msra.mxu1 %v825_v15  ;;  %v665_v50 = vor.u32 %v853_v49, %v664_v48 }
  0x1c   : > { %509 = vmatpush.bf16.msra.mxu0 %v816_v16 }
  0x1d   : > { %537 = vmatpush.bf16.msra.mxu2 %v832_v17 }
  0x1e   : > { %551 = vmatpush.bf16.msra.mxu3 %v840_v18 }
  0x1f   : > { %523 = vmatpush.bf16.msra.mxu1 %v824_v19 }
  0x20   : > { %510 = vmatpush.bf16.msra.mxu0 %v815_v20 }
  0x21   : > { %538 = vmatpush.bf16.msra.mxu2 %v831_v21 }
  0x22   : > { %552 = vmatpush.bf16.msra.mxu3 %v839_v22 }
  0x23   : > { %524 = vmatpush.bf16.msra.mxu1 %v823_v23 }
  0x24   : > { %511 = vmatpush.bf16.msra.mxu0 %v814_v24 }
  0x25   : > { %539 = vmatpush.bf16.msra.mxu2 %v830_v25 }
  0x26   : > { %553 = vmatpush.bf16.msra.mxu3 %v838_v26 }
  0x27   : > { %525 = vmatpush.bf16.msra.mxu1 %v822_v27 }
  0x28   : > { %512 = vmatpush.bf16.msra.mxu0 %v813_v28 }
  0x29   : > { %540 = vmatpush.bf16.msra.mxu2 %v829_v29 }
  0x2a   : > { %554 = vmatpush.bf16.msra.mxu3 %v837_v30 }
  0x2b   : > { %526 = vmatpush.bf16.msra.mxu1 %v821_v31  ;;  %513 = vmatmul.bf16.vlgmr.msra.gmra.mxu0 %v649_v41 }
  0x2c   : > { %565 = vmatpush.bf16.msrb.mxu0 %v848_v40  ;;  %541 = vmatmul.bf16.vlgmr.msra.gmra.mxu2 %v657_v42 }
  0x2d   : > { %555 = vmatmul.bf16.vlgmr.msra.gmra.mxu3 %v661_v43 }
  0x2e   : > { %527 = vmatmul.bf16.vlgmr.msra.gmra.mxu1 %v653_v44 }
  0x30   : > { %566 = vmatpush.bf16.msrb.mxu0 %v847_v45 }
  0x34   : > { %567 = vmatpush.bf16.msrb.mxu0 %v846_v46 }
  0x38   : > { %568 = vmatpush.bf16.msrb.mxu0 %v845_v47 }
  0x3b   : > { %810 = vmatmul.msk.bf16.vlgmr.msrb.gmra.mxu0 %vm501_vm0, %v665_v50 }
  0xa8   : > { %v514_v51 = vpop.f32.mrf.mxu0 }
  0xa9   : > { %v515_v56 = vadd.f32 %v868_v54, %v514_v51 }
  0xab   : > { %v528_v52 = vpop.f32.mrf.mxu1 }
  0xac   : > { %v529_v60 = vadd.f32 %v528_v52, %v515_v56 }
  0xaf   : > { %v542_v53 = vpop.f32.mrf.mxu2 }
  0xb0   : > { %v516_v55 = vpop.f32.mrf.mxu0  ;;  %v556_v57 = vpop.f32.mrf.mxu3  ;;  %v543_v63 = vadd.f32 %v542_v53, %v529_v60 }
  0xb1   : > { %v517_v58 = vadd.f32 %v868_v54, %v516_v55 }
  0xb2   : > { %v557_v2 = vadd.f32 %v556_v57, %v543_v63 }
  0xb3   : > { %v530_v59 = vpop.f32.mrf.mxu1 }
  0xb4   : > { %v531_v0 = vadd.f32 %v530_v59, %v517_v58 }
  0xb7   : > { %v544_v61 = vpop.f32.mrf.mxu2 }
  0xb8   : > { %v570_v62 = vpop.f32.mrf.mxu0  ;;  %v545_v1 = vadd.f32 %v544_v61, %v531_v0  ;;  %v558_v3 = vpop.f32.mrf.mxu3 }
  0xb9   : > { %v571_v5 = vadd.f32 %v570_v62, %v557_v2 }
  0xba   : > { %v559_v4 = vadd.f32 %v558_v3, %v545_v1 }
  0xbb   : > { %v575_v8 = vmax.f32 %v571_v5, 0.0 }
  0xc0   : > { %v572_v6 = vpop.f32.mrf.mxu0 }
  0xc1   : > { %v573_v7 = vadd.f32 %v572_v6, %v559_v4 }
  0xc3   : > { %v576_v9 = vmax.f32 %v573_v7, 0.0 }
  0xc5   : > { %v857_v10 = vpack.c.bf16 %v576_v9, %v575_v8 }
  0xc7   : > { %858 = vst [vmem:[%s175_s21] sm:$0xff] %v857_v10  }
  0xc8 PF: > { %s13_s12 = sadd.s32 1, %s875_s12  }
  0xc9   : > { %p10_p4 = scmp.ge.s32.totalorder %s13_s12, 4  }
  0xcb   :  { %12 = sbr.rel (!%p10_p4) target bundleno = 1 (0x1), region = 62 }

// kernel: cnn1_bn_forward.7
= control target key start
LH: loop header
LB: loop body
LE: loop exit
PB: predicated region body
PF: predicated region fallthrough
CT: control target
= control target key end

     0   :  { %s2598_s1 = inlined_call_operand.vmem [shape: bf16[2048,128], index: 1, kind: input, shape index: {}]   ;;  %s2599_s2 = inlined_call_operand.vmem [shape: f32[1,128], index: 2, kind: input, shape index: {}]   ;;  %s2600_s0 = inlined_call_operand.vmem [shape: bf16[16,2048], index: 0, kind: input, shape index: {}]   ;;  %s2601_s3 = inlined_call_operand.vmem [shape: f32[16,128], index: 3, kind: output, shape index: {}]  }
   0x1   :  { %v1967_v0 = vld [vmem:[%s2598_s1 + $0x38] sm:$0xff]  ;;  %v1966_v4 = vld [vmem:[%s2598_s1 + $0x30] sm:$0xff]  ;;  %v1965_v8 = vld [vmem:[%s2598_s1 + $0x28] sm:$0xff] }
   0x2   :  { %v1975_v1 = vld [vmem:[%s2598_s1 + $0x78] sm:$0xff]  ;;  %1138 = vmatpush.bf16.msra.mxu0 %v1967_v0  ;;  %v1974_v5 = vld [vmem:[%s2598_s1 + $0x70] sm:$0xff]  ;;  %v1973_v9 = vld [vmem:[%s2598_s1 + $0x68] sm:$0xff] }
   0x3   :  { %v1983_v2 = vld [vmem:[%s2598_s1 + $0xb8] sm:$0xff]  ;;  %1152 = vmatpush.bf16.msra.mxu1 %v1975_v1  ;;  %v1982_v6 = vld [vmem:[%s2598_s1 + $0xb0] sm:$0xff]  ;;  %v1981_v10 = vld [vmem:[%s2598_s1 + $0xa8] sm:$0xff] }
   0x4   :  { %v1991_v3 = vld [vmem:[%s2598_s1 + $0xf8] sm:$0xff]  ;;  %1166 = vmatpush.bf16.msra.mxu2 %v1983_v2  ;;  %v1990_v7 = vld [vmem:[%s2598_s1 + $0xf0] sm:$0xff]  ;;  %v1989_v11 = vld [vmem:[%s2598_s1 + $0xe8] sm:$0xff] }
   0x5   :  { %1180 = vmatpush.bf16.msra.mxu3 %v1991_v3  ;;  %v1964_v12 = vld [vmem:[%s2598_s1 + $0x20] sm:$0xff]  ;;  %v1963_v16 = vld [vmem:[%s2598_s1 + $0x18] sm:$0xff]  ;;  %v1962_v20 = vld [vmem:[%s2598_s1 + $0x10] sm:$0xff] }
   0x6   :  { %1139 = vmatpush.bf16.msra.mxu0 %v1966_v4  ;;  %v1972_v13 = vld [vmem:[%s2598_s1 + $0x60] sm:$0xff]  ;;  %v1971_v17 = vld [vmem:[%s2598_s1 + $0x58] sm:$0xff]  ;;  %v1970_v21 = vld [vmem:[%s2598_s1 + $0x50] sm:$0xff] }
   0x7   :  { %1153 = vmatpush.bf16.msra.mxu1 %v1974_v5  ;;  %v1980_v14 = vld [vmem:[%s2598_s1 + $0xa0] sm:$0xff]  ;;  %v1979_v18 = vld [vmem:[%s2598_s1 + $0x98] sm:$0xff]  ;;  %v1978_v22 = vld [vmem:[%s2598_s1 + $0x90] sm:$0xff] }
   0x8   :  { %1167 = vmatpush.bf16.msra.mxu2 %v1982_v6  ;;  %v1988_v15 = vld [vmem:[%s2598_s1 + $0xe0] sm:$0xff]  ;;  %v1987_v19 = vld [vmem:[%s2598_s1 + $0xd8] sm:$0xff]  ;;  %v1986_v23 = vld [vmem:[%s2598_s1 + $0xd0] sm:$0xff] }
   0x9   :  { %1181 = vmatpush.bf16.msra.mxu3 %v1990_v7  ;;  %v1961_v24 = vld [vmem:[%s2598_s1 + $0x8] sm:$0xff]  ;;  %v1960_v28 = vld [vmem:[%s2598_s1] sm:$0xff]  ;;  %v1999_v32 = vld [vmem:[%s2598_s1 + $0x138] sm:$0xff] }
   0xa   :  { %1140 = vmatpush.bf16.msra.mxu0 %v1965_v8  ;;  %v1969_v25 = vld [vmem:[%s2598_s1 + $0x48] sm:$0xff]  ;;  %v1968_v29 = vld [vmem:[%s2598_s1 + $0x40] sm:$0xff]  ;;  %v2007_v33 = vld [vmem:[%s2598_s1 + $0x178] sm:$0xff] }
   0xb   :  { %1154 = vmatpush.bf16.msra.mxu1 %v1973_v9  ;;  %v1977_v26 = vld [vmem:[%s2598_s1 + $0x88] sm:$0xff]  ;;  %v1976_v30 = vld [vmem:[%s2598_s1 + $0x80] sm:$0xff]  ;;  %v2015_v42 = vld [vmem:[%s2598_s1 + $0x1b8] sm:$0xff] }
   0xc   :  { %1168 = vmatpush.bf16.msra.mxu2 %v1981_v10  ;;  %v1985_v27 = vld [vmem:[%s2598_s1 + $0xc8] sm:$0xff]  ;;  %v1984_v31 = vld [vmem:[%s2598_s1 + $0xc0] sm:$0xff]  ;;  %v2023_v43 = vld [vmem:[%s2598_s1 + $0x1f8] sm:$0xff] }
   0xd   :  { %1182 = vmatpush.bf16.msra.mxu3 %v1989_v11  ;;  %v1370_v34 = vld [vmem:[%s2600_s0] sm:$0xf]  ;;  %v1378_v36 = vld [vmem:[%s2600_s0 + $0x8] sm:$0xf]  ;;  %v1944_v38 = vld [vmem:[%s2600_s0 + $0x4] sm:$0xf] }
   0xe   :  { %1141 = vmatpush.bf16.msra.mxu0 %v1964_v12  ;;  %v1952_v35 = vld [vmem:[%s2600_s0 + $0x3c] sm:$0xf0]  ;;  %v1953_v37 = vld [vmem:[%s2600_s0 + $0x44] sm:$0xf0]  ;;  %v1372_v39 = vld [vmem:[%s2600_s0 + $0x40] sm:$0xf0] }
   0xf   :  { %1155 = vmatpush.bf16.msra.mxu1 %v1972_v13  ;;  %v1945_v40 = vld [vmem:[%s2600_s0 + $0xc] sm:$0xf]  ;;  %v1371_v44 = vor.u32 %v1952_v35, %v1370_v34  ;;  %v1379_v45 = vor.u32 %v1953_v37, %v1378_v36  ;;  %v1375_v46 = vor.u32 %v1944_v38, %v1372_v39  ;;  %v1998_v48 = vld [vmem:[%s2598_s1 + $0x130] sm:$0xff]  ;;  %v1996_v56 = vld [vmem:[%s2598_s1 + $0x120] sm:$0xff] }
  0x10   :  { %1169 = vmatpush.bf16.msra.mxu2 %v1980_v14  ;;  %v1380_v41 = vld [vmem:[%s2600_s0 + $0x48] sm:$0xf0]  ;;  %v2006_v49 = vld [vmem:[%s2598_s1 + $0x170] sm:$0xff]  ;;  %v2004_v57 = vld [vmem:[%s2598_s1 + $0x160] sm:$0xff] }
  0x11   :  { %1183 = vmatpush.bf16.msra.mxu3 %v1988_v15  ;;  %v1383_v47 = vor.u32 %v1945_v40, %v1380_v41  ;;  %v2014_v50 = vld [vmem:[%s2598_s1 + $0x1b0] sm:$0xff]  ;;  %v1997_v52 = vld [vmem:[%s2598_s1 + $0x128] sm:$0xff]  ;;  %v2012_v58 = vld [vmem:[%s2598_s1 + $0x1a0] sm:$0xff] }
  0x12   :  { %1142 = vmatpush.bf16.msra.mxu0 %v1963_v16  ;;  %v2022_v51 = vld [vmem:[%s2598_s1 + $0x1f0] sm:$0xff]  ;;  %v2005_v53 = vld [vmem:[%s2598_s1 + $0x168] sm:$0xff]  ;;  %v2020_v59 = vld [vmem:[%s2598_s1 + $0x1e0] sm:$0xff] }
  0x13   :  { %1156 = vmatpush.bf16.msra.mxu1 %v1971_v17  ;;  %v2013_v54 = vld [vmem:[%s2598_s1 + $0x1a8] sm:$0xff]  ;;  %v1995_v60 = vld [vmem:[%s2598_s1 + $0x118] sm:$0xff]  ;;  %v1994_v0 = vld [vmem:[%s2598_s1 + $0x110] sm:$0xff] }
  0x14   :  { %1170 = vmatpush.bf16.msra.mxu2 %v1979_v18  ;;  %v2021_v55 = vld [vmem:[%s2598_s1 + $0x1e8] sm:$0xff]  ;;  %v2003_v61 = vld [vmem:[%s2598_s1 + $0x158] sm:$0xff]  ;;  %v2002_v1 = vld [vmem:[%s2598_s1 + $0x150] sm:$0xff] }
  0x15   :  { %1184 = vmatpush.bf16.msra.mxu3 %v1987_v19  ;;  %v2011_v62 = vld [vmem:[%s2598_s1 + $0x198] sm:$0xff]  ;;  %v2010_v2 = vld [vmem:[%s2598_s1 + $0x190] sm:$0xff]  ;;  %v1993_v4 = vld [vmem:[%s2598_s1 + $0x108] sm:$0xff] }
  0x16   :  { %1143 = vmatpush.bf16.msra.mxu0 %v1962_v20  ;;  %v2019_v63 = vld [vmem:[%s2598_s1 + $0x1d8] sm:$0xff]  ;;  %v2018_v3 = vld [vmem:[%s2598_s1 + $0x1d0] sm:$0xff]  ;;  %v2001_v5 = vld [vmem:[%s2598_s1 + $0x148] sm:$0xff] }
  0x17   :  { %1157 = vmatpush.bf16.msra.mxu1 %v1970_v21  ;;  %v2009_v6 = vld [vmem:[%s2598_s1 + $0x188] sm:$0xff]  ;;  %v1992_v8 = vld [vmem:[%s2598_s1 + $0x100] sm:$0xff]  ;;  %v2031_v12 = vld [vmem:[%s2598_s1 + $0x238] sm:$0xff] }
  0x18   :  { %1171 = vmatpush.bf16.msra.mxu2 %v1978_v22  ;;  %v2017_v7 = vld [vmem:[%s2598_s1 + $0x1c8] sm:$0xff]  ;;  %v2000_v9 = vld [vmem:[%s2598_s1 + $0x140] sm:$0xff]  ;;  %v2039_v13 = vld [vmem:[%s2598_s1 + $0x278] sm:$0xff] }
  0x19   :  { %1185 = vmatpush.bf16.msra.mxu3 %v1986_v23  ;;  %v2008_v10 = vld [vmem:[%s2598_s1 + $0x180] sm:$0xff]  ;;  %v1386_v14 = vld [vmem:[%s2600_s0 + $0x10] sm:$0xf]  ;;  %v1394_v16 = vld [vmem:[%s2600_s0 + $0x18] sm:$0xf] }
  0x1a   :  { %1144 = vmatpush.bf16.msra.mxu0 %v1961_v24  ;;  %v2016_v11 = vld [vmem:[%s2598_s1 + $0x1c0] sm:$0xff]  ;;  %v1954_v15 = vld [vmem:[%s2600_s0 + $0x4c] sm:$0xf0]  ;;  %v1955_v17 = vld [vmem:[%s2600_s0 + $0x54] sm:$0xf0] }
  0x1b   :  { %1158 = vmatpush.bf16.msra.mxu1 %v1969_v25  ;;  %v1946_v18 = vld [vmem:[%s2600_s0 + $0x14] sm:$0xf]  ;;  %v1947_v20 = vld [vmem:[%s2600_s0 + $0x1c] sm:$0xf]  ;;  %v1387_v24 = vor.u32 %v1954_v15, %v1386_v14  ;;  %v1395_v25 = vor.u32 %v1955_v17, %v1394_v16  ;;  %v2045_v34 = vld [vmem:[%s2598_s1 + $0x2a8] sm:$0xff] }
  0x1c   :  { %1172 = vmatpush.bf16.msra.mxu2 %v1977_v26  ;;  %v1388_v19 = vld [vmem:[%s2600_s0 + $0x50] sm:$0xf0]  ;;  %v1396_v21 = vld [vmem:[%s2600_s0 + $0x58] sm:$0xf0]  ;;  %v2053_v35 = vld [vmem:[%s2598_s1 + $0x2e8] sm:$0xff] }
  0x1d   :  { %1186 = vmatpush.bf16.msra.mxu3 %v1985_v27  ;;  %v2047_v22 = vld [vmem:[%s2598_s1 + $0x2b8] sm:$0xff]  ;;  %v1391_v26 = vor.u32 %v1946_v18, %v1388_v19  ;;  %v1399_v27 = vor.u32 %v1947_v20, %v1396_v21  ;;  %v2028_v36 = vld [vmem:[%s2598_s1 + $0x220] sm:$0xff]  ;;  %v2077_v14 = vld [vmem:[%s2598_s1 + $0x3a8] sm:$0xff] }
  0x1e   :  { %1145 = vmatpush.bf16.msra.mxu0 %v1960_v28  ;;  %v2055_v23 = vld [vmem:[%s2598_s1 + $0x2f8] sm:$0xff]  ;;  %v2030_v28 = vld [vmem:[%s2598_s1 + $0x230] sm:$0xff]  ;;  %v2036_v37 = vld [vmem:[%s2598_s1 + $0x260] sm:$0xff] }
  0x1f   :  { %1159 = vmatpush.bf16.msra.mxu1 %v1968_v29  ;;  %v2038_v29 = vld [vmem:[%s2598_s1 + $0x270] sm:$0xff]  ;;  %v2044_v38 = vld [vmem:[%s2598_s1 + $0x2a0] sm:$0xff]  ;;  %v2027_v40 = vld [vmem:[%s2598_s1 + $0x218] sm:$0xff] }
  0x20   :  { %1173 = vmatpush.bf16.msra.mxu2 %v1976_v30  ;;  %v2046_v30 = vld [vmem:[%s2598_s1 + $0x2b0] sm:$0xff]  ;;  %v2052_v39 = vld [vmem:[%s2598_s1 + $0x2e0] sm:$0xff]  ;;  %v2035_v41 = vld [vmem:[%s2598_s1 + $0x258] sm:$0xff] }
  0x21   :  { %1187 = vmatpush.bf16.msra.mxu3 %v1984_v31  ;;  %1146 = vmatmul.bf16.vlgmr.msra.gmra.mxu0 %v1371_v44  ;;  %v2054_v31 = vld [vmem:[%s2598_s1 + $0x2f0] sm:$0xff]  ;;  %v2085_v15 = vld [vmem:[%s2598_s1 + $0x3e8] sm:$0xff]  ;;  %v2060_v16 = vld [vmem:[%s2598_s1 + $0x320] sm:$0xff] }
  0x22   :  { %1194 = vmatpush.bf16.msrb.mxu0 %v1999_v32  ;;  %1160 = vmatmul.bf16.vlgmr.msra.gmra.mxu1 %v1375_v46  ;;  %v2029_v32 = vld [vmem:[%s2598_s1 + $0x228] sm:$0xff]  ;;  %v2026_v44 = vld [vmem:[%s2598_s1 + $0x210] sm:$0xff]  ;;  %v2068_v17 = vld [vmem:[%s2598_s1 + $0x360] sm:$0xff] }
  0x23   :  { %1208 = vmatpush.bf16.msrb.mxu1 %v2007_v33  ;;  %1174 = vmatmul.bf16.vlgmr.msra.gmra.mxu2 %v1379_v45  ;;  %v2037_v33 = vld [vmem:[%s2598_s1 + $0x268] sm:$0xff]  ;;  %v2034_v45 = vld [vmem:[%s2598_s1 + $0x250] sm:$0xff]  ;;  %v2076_v18 = vld [vmem:[%s2598_s1 + $0x3a0] sm:$0xff] }
  0x24   :  { %1222 = vmatpush.bf16.msrb.mxu2 %v2015_v42  ;;  %1188 = vmatmul.bf16.vlgmr.msra.gmra.mxu3 %v1383_v47  ;;  %v2043_v42 = vld [vmem:[%s2598_s1 + $0x298] sm:$0xff]  ;;  %v2042_v46 = vld [vmem:[%s2598_s1 + $0x290] sm:$0xff]  ;;  %v2084_v19 = vld [vmem:[%s2598_s1 + $0x3e0] sm:$0xff] }
  0x25   :  { %1236 = vmatpush.bf16.msrb.mxu3 %v2023_v43  ;;  %v2051_v43 = vld [vmem:[%s2598_s1 + $0x2d8] sm:$0xff]  ;;  %v2050_v47 = vld [vmem:[%s2598_s1 + $0x2d0] sm:$0xff] }
  0x26   :  { %1195 = vmatpush.bf16.msrb.mxu0 %v1998_v48  ;;  %v2025_v48 = vld [vmem:[%s2598_s1 + $0x208] sm:$0xff]  ;;  %v2059_v20 = vld [vmem:[%s2598_s1 + $0x318] sm:$0xff] }
  0x27   :  { %1209 = vmatpush.bf16.msrb.mxu1 %v2006_v49  ;;  %v2033_v49 = vld [vmem:[%s2598_s1 + $0x248] sm:$0xff]  ;;  %v2067_v21 = vld [vmem:[%s2598_s1 + $0x358] sm:$0xff] }
  0x28   :  { %1223 = vmatpush.bf16.msrb.mxu2 %v2014_v50  ;;  %v2041_v50 = vld [vmem:[%s2598_s1 + $0x288] sm:$0xff] }
  0x29   :  { %1237 = vmatpush.bf16.msrb.mxu3 %v2022_v51  ;;  %v2049_v51 = vld [vmem:[%s2598_s1 + $0x2c8] sm:$0xff] }
  0x2a   :  { %1196 = vmatpush.bf16.msrb.mxu0 %v1997_v52  ;;  %v2024_v52 = vld [vmem:[%s2598_s1 + $0x200] sm:$0xff] }
  0x2b   :  { %1210 = vmatpush.bf16.msrb.mxu1 %v2005_v53  ;;  %v2032_v53 = vld [vmem:[%s2598_s1 + $0x240] sm:$0xff] }
  0x2c   :  { %1224 = vmatpush.bf16.msrb.mxu2 %v2013_v54  ;;  %v2040_v54 = vld [vmem:[%s2598_s1 + $0x280] sm:$0xff] }
  0x2d   :  { %1238 = vmatpush.bf16.msrb.mxu3 %v2021_v55  ;;  %v2048_v55 = vld [vmem:[%s2598_s1 + $0x2c0] sm:$0xff] }
  0x2e   :  { %1197 = vmatpush.bf16.msrb.mxu0 %v1996_v56  ;;  %v2063_v56 = vld [vmem:[%s2598_s1 + $0x338] sm:$0xff] }
  0x2f   :  { %1211 = vmatpush.bf16.msrb.mxu1 %v2004_v57  ;;  %v2071_v57 = vld [vmem:[%s2598_s1 + $0x378] sm:$0xff] }
  0x30   :  { %1225 = vmatpush.bf16.msrb.mxu2 %v2012_v58  ;;  %v1402_v58 = vld [vmem:[%s2600_s0 + $0x20] sm:$0xf] }
  0x31   :  { %1239 = vmatpush.bf16.msrb.mxu3 %v2020_v59  ;;  %v1956_v59 = vld [vmem:[%s2600_s0 + $0x5c] sm:$0xf0] }
  0x32   :  { %1198 = vmatpush.bf16.msrb.mxu0 %v1995_v60  ;;  %v1410_v60 = vld [vmem:[%s2600_s0 + $0x28] sm:$0xf] }
  0x33   :  { %1212 = vmatpush.bf16.msrb.mxu1 %v2003_v61  ;;  %v1957_v61 = vld [vmem:[%s2600_s0 + $0x64] sm:$0xf0] }
  0x34   :  { %1226 = vmatpush.bf16.msrb.mxu2 %v2011_v62  ;;  %v1948_v62 = vld [vmem:[%s2600_s0 + $0x24] sm:$0xf] }
  0x35   :  { %1240 = vmatpush.bf16.msrb.mxu3 %v2019_v63  ;;  %v1404_v63 = vld [vmem:[%s2600_s0 + $0x60] sm:$0xf0] }
  0x36   :  { %1199 = vmatpush.bf16.msrb.mxu0 %v1994_v0  ;;  %v1949_v0 = vld [vmem:[%s2600_s0 + $0x2c] sm:$0xf] }
  0x37   :  { %1213 = vmatpush.bf16.msrb.mxu1 %v2002_v1  ;;  %v1412_v1 = vld [vmem:[%s2600_s0 + $0x68] sm:$0xf0] }
  0x38   :  { %1227 = vmatpush.bf16.msrb.mxu2 %v2010_v2  ;;  %v2079_v2 = vld [vmem:[%s2598_s1 + $0x3b8] sm:$0xff] }
  0x39   :  { %1241 = vmatpush.bf16.msrb.mxu3 %v2018_v3  ;;  %v2087_v3 = vld [vmem:[%s2598_s1 + $0x3f8] sm:$0xff] }
  0x3a   :  { %1200 = vmatpush.bf16.msrb.mxu0 %v1993_v4  ;;  %v1403_v4 = vor.u32 %v1956_v59, %v1402_v58 }
  0x3b   :  { %1214 = vmatpush.bf16.msrb.mxu1 %v2001_v5  ;;  %v1411_v5 = vor.u32 %v1957_v61, %v1410_v60 }
  0x3c   :  { %1228 = vmatpush.bf16.msrb.mxu2 %v2009_v6  ;;  %v1407_v6 = vor.u32 %v1948_v62, %v1404_v63 }
  0x3d   :  { %1242 = vmatpush.bf16.msrb.mxu3 %v2017_v7  ;;  %v1415_v7 = vor.u32 %v1949_v0, %v1412_v1 }
  0x3e   :  { %1201 = vmatpush.bf16.msrb.mxu0 %v1992_v8  ;;  %v2062_v8 = vld [vmem:[%s2598_s1 + $0x330] sm:$0xff] }
  0x3f   :  { %1215 = vmatpush.bf16.msrb.mxu1 %v2000_v9  ;;  %v2070_v9 = vld [vmem:[%s2598_s1 + $0x370] sm:$0xff] }
  0x40   :  { %1229 = vmatpush.bf16.msrb.mxu2 %v2008_v10  ;;  %v2078_v10 = vld [vmem:[%s2598_s1 + $0x3b0] sm:$0xff] }
  0x41   :  { %1243 = vmatpush.bf16.msrb.mxu3 %v2016_v11  ;;  %1202 = vmatmul.bf16.vlgmr.msrb.gmra.mxu0 %v1387_v24  ;;  %v2086_v11 = vld [vmem:[%s2598_s1 + $0x3f0] sm:$0xff] }
  0x42   :  { %1250 = vmatpush.bf16.msra.mxu0 %v2031_v12  ;;  %1216 = vmatmul.bf16.vlgmr.msrb.gmra.mxu1 %v1391_v26  ;;  %v2061_v12 = vld [vmem:[%s2598_s1 + $0x328] sm:$0xff]  ;;  %v2058_v24 = vld [vmem:[%s2598_s1 + $0x310] sm:$0xff] }
  0x43   :  { %1264 = vmatpush.bf16.msra.mxu1 %v2039_v13  ;;  %1230 = vmatmul.bf16.vlgmr.msrb.gmra.mxu2 %v1395_v25  ;;  %v2069_v13 = vld [vmem:[%s2598_s1 + $0x368] sm:$0xff]  ;;  %v2066_v25 = vld [vmem:[%s2598_s1 + $0x350] sm:$0xff] }
  0x44   :  { %1278 = vmatpush.bf16.msra.mxu2 %v2047_v22  ;;  %1244 = vmatmul.bf16.vlgmr.msrb.gmra.mxu3 %v1399_v27  ;;  %v2075_v22 = vld [vmem:[%s2598_s1 + $0x398] sm:$0xff]  ;;  %v2074_v26 = vld [vmem:[%s2598_s1 + $0x390] sm:$0xff] }
  0x45   :  { %1292 = vmatpush.bf16.msra.mxu3 %v2055_v23  ;;  %v2083_v23 = vld [vmem:[%s2598_s1 + $0x3d8] sm:$0xff]  ;;  %v2082_v27 = vld [vmem:[%s2598_s1 + $0x3d0] sm:$0xff] }
  0x46   :  { %1251 = vmatpush.bf16.msra.mxu0 %v2030_v28  ;;  %v2057_v28 = vld [vmem:[%s2598_s1 + $0x308] sm:$0xff] }
  0x47   :  { %1265 = vmatpush.bf16.msra.mxu1 %v2038_v29  ;;  %v2065_v29 = vld [vmem:[%s2598_s1 + $0x348] sm:$0xff] }
  0x48   :  { %1279 = vmatpush.bf16.msra.mxu2 %v2046_v30  ;;  %v2073_v30 = vld [vmem:[%s2598_s1 + $0x388] sm:$0xff] }
  0x49   :  { %1293 = vmatpush.bf16.msra.mxu3 %v2054_v31  ;;  %v2081_v31 = vld [vmem:[%s2598_s1 + $0x3c8] sm:$0xff] }
  0x4a   :  { %1252 = vmatpush.bf16.msra.mxu0 %v2029_v32  ;;  %v2056_v32 = vld [vmem:[%s2598_s1 + $0x300] sm:$0xff] }
  0x4b   :  { %1266 = vmatpush.bf16.msra.mxu1 %v2037_v33  ;;  %v2064_v33 = vld [vmem:[%s2598_s1 + $0x340] sm:$0xff] }
  0x4c   :  { %1280 = vmatpush.bf16.msra.mxu2 %v2045_v34  ;;  %v2072_v34 = vld [vmem:[%s2598_s1 + $0x380] sm:$0xff] }
  0x4d   :  { %1294 = vmatpush.bf16.msra.mxu3 %v2053_v35  ;;  %v2080_v35 = vld [vmem:[%s2598_s1 + $0x3c0] sm:$0xff] }
  0x4e   :  { %1253 = vmatpush.bf16.msra.mxu0 %v2028_v36  ;;  %v1418_v36 = vld [vmem:[%s2600_s0 + $0x30] sm:$0xf] }
  0x4f   :  { %1267 = vmatpush.bf16.msra.mxu1 %v2036_v37  ;;  %v1958_v37 = vld [vmem:[%s2600_s0 + $0x6c] sm:$0xf0] }
  0x50   :  { %1281 = vmatpush.bf16.msra.mxu2 %v2044_v38  ;;  %v1950_v38 = vld [vmem:[%s2600_s0 + $0x34] sm:$0xf] }
  0x51   :  { %1295 = vmatpush.bf16.msra.mxu3 %v2052_v39  ;;  %v1420_v39 = vld [vmem:[%s2600_s0 + $0x70] sm:$0xf0] }
  0x52   :  { %1254 = vmatpush.bf16.msra.mxu0 %v2027_v40  ;;  %v1426_v40 = vld [vmem:[%s2600_s0 + $0x38] sm:$0xf] }
  0x53   :  { %1268 = vmatpush.bf16.msra.mxu1 %v2035_v41  ;;  %v1959_v41 = vld [vmem:[%s2600_s0 + $0x74] sm:$0xf0] }
  0x54   :  { %1282 = vmatpush.bf16.msra.mxu2 %v2043_v42  ;;  %v1951_v42 = vld [vmem:[%s2600_s0 + $0x3c] sm:$0xf] }
  0x55   :  { %1296 = vmatpush.bf16.msra.mxu3 %v2051_v43  ;;  %v1428_v43 = vld [vmem:[%s2600_s0 + $0x78] sm:$0xf0] }
  0x56   :  { %1255 = vmatpush.bf16.msra.mxu0 %v2026_v44  ;;  %v1419_v44 = vor.u32 %v1958_v37, %v1418_v36 }
  0x57   :  { %1269 = vmatpush.bf16.msra.mxu1 %v2034_v45  ;;  %v1423_v45 = vor.u32 %v1950_v38, %v1420_v39 }
  0x58   :  { %1283 = vmatpush.bf16.msra.mxu2 %v2042_v46  ;;  %v1427_v46 = vor.u32 %v1959_v41, %v1426_v40 }
  0x59   :  { %1297 = vmatpush.bf16.msra.mxu3 %v2050_v47  ;;  %v1431_v47 = vor.u32 %v1951_v42, %v1428_v43 }
  0x5a   :  { %1256 = vmatpush.bf16.msra.mxu0 %v2025_v48 }
  0x5b   :  { %1270 = vmatpush.bf16.msra.mxu1 %v2033_v49 }
  0x5c   :  { %1284 = vmatpush.bf16.msra.mxu2 %v2041_v50 }
  0x5d   :  { %1298 = vmatpush.bf16.msra.mxu3 %v2049_v51 }
  0x5e   :  { %1257 = vmatpush.bf16.msra.mxu0 %v2024_v52 }
  0x5f   :  { %1271 = vmatpush.bf16.msra.mxu1 %v2032_v53  ;;  %v2088_v53 = vld [vmem:[%s2599_s2] ss:$0 sm:$0xff] }
  0x60   :  { %1285 = vmatpush.bf16.msra.mxu2 %v2040_v54 }
  0x61   :  { %1299 = vmatpush.bf16.msra.mxu3 %v2048_v55  ;;  %1258 = vmatmul.bf16.vlgmr.msra.gmra.mxu0 %v1403_v4 }
  0x62   :  { %1306 = vmatpush.bf16.msrb.mxu0 %v2063_v56  ;;  %1272 = vmatmul.bf16.vlgmr.msra.gmra.mxu1 %v1407_v6 }
  0x63   :  { %1320 = vmatpush.bf16.msrb.mxu1 %v2071_v57  ;;  %1286 = vmatmul.bf16.vlgmr.msra.gmra.mxu2 %v1411_v5 }
  0x64   :  { %1334 = vmatpush.bf16.msrb.mxu2 %v2079_v2  ;;  %1300 = vmatmul.bf16.vlgmr.msra.gmra.mxu3 %v1415_v7 }
  0x65   :  { %1348 = vmatpush.bf16.msrb.mxu3 %v2087_v3 }
  0x66   :  { %1307 = vmatpush.bf16.msrb.mxu0 %v2062_v8 }
  0x67   :  { %1321 = vmatpush.bf16.msrb.mxu1 %v2070_v9 }
  0x68   :  { %1335 = vmatpush.bf16.msrb.mxu2 %v2078_v10 }
  0x69   :  { %1349 = vmatpush.bf16.msrb.mxu3 %v2086_v11 }
  0x6a   :  { %1308 = vmatpush.bf16.msrb.mxu0 %v2061_v12 }
  0x6b   :  { %1322 = vmatpush.bf16.msrb.mxu1 %v2069_v13 }
  0x6c   :  { %1336 = vmatpush.bf16.msrb.mxu2 %v2077_v14 }
  0x6d   :  { %1350 = vmatpush.bf16.msrb.mxu3 %v2085_v15 }
  0x6e   :  { %1309 = vmatpush.bf16.msrb.mxu0 %v2060_v16 }
  0x6f   :  { %1323 = vmatpush.bf16.msrb.mxu1 %v2068_v17 }
  0x70   :  { %1337 = vmatpush.bf16.msrb.mxu2 %v2076_v18 }
  0x71   :  { %1351 = vmatpush.bf16.msrb.mxu3 %v2084_v19 }
  0x72   :  { %1310 = vmatpush.bf16.msrb.mxu0 %v2059_v20 }
  0x73   :  { %1324 = vmatpush.bf16.msrb.mxu1 %v2067_v21 }
  0x74   :  { %1338 = vmatpush.bf16.msrb.mxu2 %v2075_v22 }
  0x75   :  { %1352 = vmatpush.bf16.msrb.mxu3 %v2083_v23 }
  0x76   :  { %1311 = vmatpush.bf16.msrb.mxu0 %v2058_v24 }
  0x77   :  { %1325 = vmatpush.bf16.msrb.mxu1 %v2066_v25 }
  0x78   :  { %1339 = vmatpush.bf16.msrb.mxu2 %v2074_v26 }
  0x79   :  { %1353 = vmatpush.bf16.msrb.mxu3 %v2082_v27 }
  0x7a   :  { %1312 = vmatpush.bf16.msrb.mxu0 %v2057_v28 }
  0x7b   :  { %1326 = vmatpush.bf16.msrb.mxu1 %v2065_v29 }
  0x7c   :  { %1340 = vmatpush.bf16.msrb.mxu2 %v2073_v30 }
  0x7d   :  { %1354 = vmatpush.bf16.msrb.mxu3 %v2081_v31 }
  0x7e   :  { %1313 = vmatpush.bf16.msrb.mxu0 %v2056_v32 }
  0x7f   :  { %1327 = vmatpush.bf16.msrb.mxu1 %v2064_v33 }
  0x80   :  { %1341 = vmatpush.bf16.msrb.mxu2 %v2072_v34 }
  0x81   :  { %1355 = vmatpush.bf16.msrb.mxu3 %v2080_v35  ;;  %1314 = vmatmul.bf16.vlgmr.msrb.gmra.mxu0 %v1419_v44 }
  0x82   :  { %1328 = vmatmul.bf16.vlgmr.msrb.gmra.mxu1 %v1423_v45 }
  0x83   :  { %1342 = vmatmul.bf16.vlgmr.msrb.gmra.mxu2 %v1427_v46 }
  0x84   :  { %1356 = vmatmul.bf16.vlgmr.msrb.gmra.mxu3 %v1431_v47 }
  0x9e   :  { %v1147_v48 = vpop.f32.mrf.mxu0 }
  0x9f   :  { %v1161_v49 = vpop.f32.mrf.mxu1  ;;  %v1148_v55 = vadd.f32 %v2088_v53, %v1147_v48 }
  0xa1   :  { %v1162_v58 = vadd.f32 %v1161_v49, %v1148_v55 }
  0xa6   :  { %v1175_v50 = vpop.f32.mrf.mxu2  ;;  %v1149_v52 = vpop.f32.mrf.mxu0 }
  0xa7   :  { %v1189_v51 = vpop.f32.mrf.mxu3  ;;  %v1163_v54 = vpop.f32.mrf.mxu1  ;;  %v1176_v61 = vadd.f32 %v1175_v50, %v1162_v58  ;;  %v1150_v62 = vadd.f32 %v2088_v53, %v1149_v52 }
  0xa9   :  { %v1190_v1 = vadd.f32 %v1189_v51, %v1176_v61  ;;  %v1164_v2 = vadd.f32 %v1163_v54, %v1150_v62 }
  0xae   :  { %v1177_v56 = vpop.f32.mrf.mxu2 }
  0xaf   :  { %v1191_v57 = vpop.f32.mrf.mxu3  ;;  %v1178_v6 = vadd.f32 %v1177_v56, %v1164_v2 }
  0xb1   :  { %v1192_v10 = vadd.f32 %v1191_v57, %v1178_v6 }
  0xbe   :  { %v1203_v59 = vpop.f32.mrf.mxu0 }
  0xbf   :  { %v1217_v60 = vpop.f32.mrf.mxu1  ;;  %v1204_v4 = vadd.f32 %v1203_v59, %v1190_v1 }
  0xc1   :  { %v1218_v7 = vadd.f32 %v1217_v60, %v1204_v4 }
  0xc6   :  { %v1231_v63 = vpop.f32.mrf.mxu2  ;;  %v1205_v3 = vpop.f32.mrf.mxu0 }
  0xc7   :  { %v1245_v0 = vpop.f32.mrf.mxu3  ;;  %v1219_v5 = vpop.f32.mrf.mxu1  ;;  %v1232_v12 = vadd.f32 %v1231_v63, %v1218_v7  ;;  %v1206_v14 = vadd.f32 %v1205_v3, %v1192_v10 }
  0xc9   :  { %v1246_v15 = vadd.f32 %v1245_v0, %v1232_v12  ;;  %v1220_v18 = vadd.f32 %v1219_v5, %v1206_v14 }
  0xce   :  { %v1233_v8 = vpop.f32.mrf.mxu2 }
  0xcf   :  { %v1247_v9 = vpop.f32.mrf.mxu3  ;;  %v1234_v20 = vadd.f32 %v1233_v8, %v1220_v18 }
  0xd1   :  { %v1248_v24 = vadd.f32 %v1247_v9, %v1234_v20 }
  0xde   :  { %v1259_v11 = vpop.f32.mrf.mxu0 }
  0xdf   :  { %v1273_v13 = vpop.f32.mrf.mxu1  ;;  %v1260_v19 = vadd.f32 %v1259_v11, %v1246_v15 }
  0xe1   :  { %v1274_v22 = vadd.f32 %v1273_v13, %v1260_v19 }
  0xe6   :  { %v1287_v16 = vpop.f32.mrf.mxu2  ;;  %v1261_v21 = vpop.f32.mrf.mxu0 }
  0xe7   :  { %v1301_v17 = vpop.f32.mrf.mxu3  ;;  %v1275_v23 = vpop.f32.mrf.mxu1  ;;  %v1288_v25 = vadd.f32 %v1287_v16, %v1274_v22  ;;  %v1262_v26 = vadd.f32 %v1261_v21, %v1248_v24 }
  0xe9   :  { %v1302_v29 = vadd.f32 %v1301_v17, %v1288_v25  ;;  %v1276_v31 = vadd.f32 %v1275_v23, %v1262_v26 }
  0xee   :  { %v1289_v27 = vpop.f32.mrf.mxu2 }
  0xef   :  { %v1303_v28 = vpop.f32.mrf.mxu3  ;;  %v1290_v34 = vadd.f32 %v1289_v27, %v1276_v31 }
  0xf1   :  { %v1304_v38 = vadd.f32 %v1303_v28, %v1290_v34 }
  0xfe   :  { %v1315_v30 = vpop.f32.mrf.mxu0 }
  0xff   :  { %v1316_v32 = vadd.f32 %v1315_v30, %v1302_v29  ;;  %v1329_v33 = vpop.f32.mrf.mxu1 }
 0x101   :  { %v1330_v35 = vadd.f32 %v1329_v33, %v1316_v32 }
 0x106   :  { %v1343_v36 = vpop.f32.mrf.mxu2  ;;  %v1317_v40 = vpop.f32.mrf.mxu0 }
 0x107   :  { %v1357_v37 = vpop.f32.mrf.mxu3  ;;  %v1344_v39 = vadd.f32 %v1343_v36, %v1330_v35  ;;  %v1318_v42 = vadd.f32 %v1317_v40, %v1304_v38  ;;  %v1331_v43 = vpop.f32.mrf.mxu1 }
 0x109   :  { %v1358_v41 = vadd.f32 %v1357_v37, %v1344_v39  ;;  %v1332_v44 = vadd.f32 %v1331_v43, %v1318_v42 }
 0x10b   :  { %1362 = vst [vmem:[%s2601_s3] sm:$0xff] %v1358_v41 }
 0x10e   :  { %v1345_v45 = vpop.f32.mrf.mxu2 }
 0x10f   :  { %v1346_v46 = vadd.f32 %v1345_v45, %v1332_v44  ;;  %v1359_v47 = vpop.f32.mrf.mxu3 }
 0x111   :  { %v1360_v48 = vadd.f32 %v1359_v47, %v1346_v46 }
 0x113   :  { %1363 = vst [vmem:[%s2601_s3 + $0x8] sm:$0xff] %v1360_v48 }

</bundles_post_ra>
